<compile_context>
chip_gen: v6e
topology: v6e:2x2x1
jax: 0.10.0
libtpu: 0.0.40
codegen_flags: <defaults>
</compile_context>

<pallas_src>
import functools

import jax
import jax.numpy as jnp
from jax.experimental import pallas as pl
from jax.experimental.pallas import tpu as pltpu


# ----------------------------------------------------------------------------
# Pallas kernels (transposed layout: out (Cout, P) = W (Cout, K) @ patches (K, P))
# ----------------------------------------------------------------------------
def _mm_t_kernel(w_ref, p_ref, b_ref, o_ref, *, relu_out):
    acc = jnp.dot(w_ref[...], p_ref[...], preferred_element_type=jnp.float32)
    acc = acc + b_ref[...]                       # (Cout, 1) broadcasts over lanes
    if relu_out:
        acc = jnp.maximum(acc, 0.0)
    o_ref[...] = acc.astype(o_ref.dtype)


def _dblock_front_kernel(p_ref, x_ref, wa_ref, ba_ref, w1_ref, b1_ref,
                         hm_ref, hr_ref):
    # main branch: conv3x3 on relu(x) patches, then relu (input of the 2nd conv)
    acc_m = jnp.dot(wa_ref[...], p_ref[...], preferred_element_type=jnp.float32)
    hm_ref[...] = jnp.maximum(acc_m + ba_ref[...], 0.0).astype(hm_ref.dtype)
    # residual branch: 1x1 conv on the raw input
    acc_r = jnp.dot(w1_ref[...], x_ref[...], preferred_element_type=jnp.float32)
    hr_ref[...] = (acc_r + b1_ref[...]).astype(hr_ref.dtype)


def _tile_p(P):
    # >=2 parallel grid blocks (v7x: 2 TensorCores) whenever the lane dim splits
    # into 128-aligned halves; otherwise a single full-array block.
    return P // 2 if P % 256 == 0 else P


def matmul_t(w, p, b, *, relu_out=False, out_dtype=jnp.bfloat16):
    """o = act(w @ p + b).  w:(Cout,K) bf16, p:(K,P) bf16, b:(Cout,1) f32."""
    Cout, K = w.shape
    P = p.shape[1]
    TP = _tile_p(P)
    kernel = functools.partial(_mm_t_kernel, relu_out=relu_out)
    return pl.pallas_call(
        kernel,
        out_shape=jax.ShapeDtypeStruct((Cout, P), out_dtype),
        grid_spec=pltpu.PrefetchScalarGridSpec(
            num_scalar_prefetch=0,
            grid=(P // TP,),
            in_specs=[
                pl.BlockSpec((Cout, K), lambda i: (0, 0)),
                pl.BlockSpec((K, TP), lambda i: (0, i)),
                pl.BlockSpec((Cout, 1), lambda i: (0, 0)),
            ],
            out_specs=pl.BlockSpec((Cout, TP), lambda i: (0, i)),
        ),
        compiler_params=pltpu.CompilerParams(dimension_semantics=("parallel",)),
    )(w, p, b)


def dblock_front(p_relu, x_raw, w3aT, b3a, w1T, b1):
    """Fused DBlock front half: [relu->conv3x3->relu] and the 1x1 residual conv."""
    Cout, K = w3aT.shape
    Cin = w1T.shape[1]
    P = p_relu.shape[1]
    TP = _tile_p(P)
    return pl.pallas_call(
        _dblock_front_kernel,
        out_shape=(jax.ShapeDtypeStruct((Cout, P), jnp.bfloat16),
                   jax.ShapeDtypeStruct((Cout, P), jnp.bfloat16)),
        grid_spec=pltpu.PrefetchScalarGridSpec(
            num_scalar_prefetch=0,
            grid=(P // TP,),
            in_specs=[
                pl.BlockSpec((K, TP), lambda i: (0, i)),
                pl.BlockSpec((Cin, TP), lambda i: (0, i)),
                pl.BlockSpec((Cout, K), lambda i: (0, 0)),
                pl.BlockSpec((Cout, 1), lambda i: (0, 0)),
                pl.BlockSpec((Cout, Cin), lambda i: (0, 0)),
                pl.BlockSpec((Cout, 1), lambda i: (0, 0)),
            ],
            out_specs=[pl.BlockSpec((Cout, TP), lambda i: (0, i)),
                       pl.BlockSpec((Cout, TP), lambda i: (0, i))],
        ),
        compiler_params=pltpu.CompilerParams(dimension_semantics=("parallel",)),
    )(p_relu, x_raw, w3aT, b3a, w1T, b1)


# ----------------------------------------------------------------------------
# Glue: pixel-unshuffle, transposed im2col / pooling patches, parameter init
# ----------------------------------------------------------------------------
def pixel_unshuffle(x, r=2):
    """PixelUnshuffle on (B,T,C,H,W): out[..., c*r*r+i*r+j, h, w] = in[..., c, h*r+i, w*r+j]."""
    B, T, C, H, W = x.shape
    x = x.reshape(B, T, C, H // r, r, W // r, r)
    x = jnp.transpose(x, (0, 1, 2, 4, 6, 3, 5))
    return x.reshape(B, T, C * r * r, H // r, W // r)


def im2col_t(x):
    """(C, N, H, W) -> (9C, N*H*W) bf16 patches for a 3x3 / pad=1 conv (transposed)."""
    C, N, H, W = x.shape
    xp = jnp.pad(x, ((0, 0), (0, 0), (1, 1), (1, 1)))
    taps = [xp[:, :, dy:dy + H, dx:dx + W].reshape(C, N * H * W)
            for dy in range(3) for dx in range(3)]
    return jnp.concatenate(taps, axis=0).astype(jnp.bfloat16)


def pool_conv_patches(hm):
    """16 stride-2 taps of padded hm: patches of the pool-folded 3x3 conv (4x4/stride-2)."""
    C, N, H, W = hm.shape
    Ho, Wo = H // 2, W // 2
    hp = jnp.pad(hm, ((0, 0), (0, 0), (1, 1), (1, 1)))
    taps = [hp[:, :, p:p + 2 * Ho:2, q:q + 2 * Wo:2].reshape(C, N * Ho * Wo)
            for p in range(4) for q in range(4)]
    return jnp.concatenate(taps, axis=0).astype(jnp.bfloat16)


def pool_patches(hr):
    """4 stride-2 taps of hr: patches for the 2x2 average pooling of the residual."""
    C, N, H, W = hr.shape
    Ho, Wo = H // 2, W // 2
    taps = [hr[:, :, di::2, dj::2].reshape(C, N * Ho * Wo)
            for di in range(2) for dj in range(2)]
    return jnp.concatenate(taps, axis=0).astype(jnp.bfloat16)


def _conv_weights(key, kh, kw, cin, cout):
    k1, k2 = jax.random.split(key)
    fan_in = kh * kw * cin
    w = jax.random.normal(k1, (kh, kw, cin, cout), jnp.float32) / jnp.sqrt(float(fan_in))
    b = 0.01 * jax.random.normal(k2, (cout,), jnp.float32)
    return w.reshape(kh * kw * cin, cout), b   # flat (kh,kw,cin) order matches im2col_t


def _fold_pool_into_conv3(w3b_flat):
    """(9*Cmid, Cout) 3x3 weights -> (Cout, 16*Cmid) weights of the equivalent
    4x4/stride-2 conv that computes [3x3 conv -> 2x2 avg-pool] in one matmul."""
    cmid = w3b_flat.shape[0] // 9
    taps = [w3b_flat[t * cmid:(t + 1) * cmid, :].T for t in range(9)]   # (Cout, Cmid)
    blocks = []
    for p in range(4):
        dys = [dy for dy in range(3) if 0 <= p - dy <= 1]
        for q in range(4):
            dxs = [dx for dx in range(3) if 0 <= q - dx <= 1]
            blocks.append(0.25 * sum(taps[dy * 3 + dx] for dy in dys for dx in dxs))
    return jnp.concatenate(blocks, axis=1)


def init_params(key, input_channels=1, output_channels=32,
                num_context_steps=4, scale_channels=False):
    # TODO(synk): spectral normalization (power-iteration weight rescale) is omitted;
    # weights here are synthetic deterministic inits, so SN is a no-op structurally.
    first_input = 4 * input_channels
    ic = input_channels if scale_channels else 1
    T, oc = num_context_steps, output_channels
    db_io = [
        (first_input, oc // 4 * ic // T),
        (oc // 4 * ic // T, oc // 2 * ic // T),
        (oc // 2 * ic // T, oc * ic // T),
        (oc * ic // T, oc * 2 * ic // T),
    ]
    conv_io = [
        (oc // 4 * ic, oc // 8 * ic),
        (oc // 2 * ic, oc // 4 * ic),
        (oc * ic, oc // 2 * ic),
        (oc * 2 * ic, oc * ic),
    ]
    keys = jax.random.split(key, 3 * len(db_io) + len(conv_io))
    ki = iter(range(len(keys)))
    db_blocks = []
    for cin, cout in db_io:
        w1, b1 = _conv_weights(keys[next(ki)], 1, 1, cin, cout)
        w3a, b3a = _conv_weights(keys[next(ki)], 3, 3, cin, cout)
        w3b, b3b = _conv_weights(keys[next(ki)], 3, 3, cout, cout)
        wpool = _fold_pool_into_conv3(w3b)                       # (cout, 16*cout)
        wres = jnp.tile(0.25 * jnp.eye(cout, dtype=jnp.float32), (1, 4))
        w2 = jnp.concatenate([wpool, wres], axis=1)              # (cout, 20*cout)
        db_blocks.append(dict(
            w1T=w1.T.astype(jnp.bfloat16), b1=b1.reshape(cout, 1),
            w3aT=w3a.T.astype(jnp.bfloat16), b3a=b3a.reshape(cout, 1),
            w2T=w2.astype(jnp.bfloat16), b3b=b3b.reshape(cout, 1)))
    convs = []
    for cin, cout in conv_io:
        w, b = _conv_weights(keys[next(ki)], 3, 3, cin, cout)
        convs.append(dict(wT=w.T.astype(jnp.bfloat16), b=b.reshape(cout, 1)))
    return dict(db_blocks=db_blocks, convs=convs)


# ----------------------------------------------------------------------------
# ConditioningStack forward
# ----------------------------------------------------------------------------
def conditioning_stack_forward(x, params):
    """x: (B, T, C, H, W) float32 -> tuple of 4 NCHW scale tensors."""
    xs = pixel_unshuffle(x, 2)                               # (B, T, 4C, H/2, W/2)
    B, T, C4, H2, W2 = xs.shape
    N = B * T
    # channels-first, timesteps folded into the pixel/batch dim (weights shared over T)
    cur = jnp.transpose(xs, (2, 0, 1, 3, 4)).reshape(C4, N, H2, W2)
    scale_feats = []
    for dbp in params["db_blocks"]:
        Cin, _, H, W = cur.shape
        Cout = dbp["w3aT"].shape[0]
        Pfull = N * H * W
        # front half: fused [relu -> conv3x3 -> relu] main branch + 1x1 residual conv
        p_relu = im2col_t(jnp.maximum(cur, 0.0))             # (9*Cin, P) bf16
        x_raw = cur.reshape(Cin, Pfull).astype(jnp.bfloat16)
        hm, hr = dblock_front(p_relu, x_raw, dbp["w3aT"], dbp["b3a"],
                              dbp["w1T"], dbp["b1"])
        hm4 = hm.reshape(Cout, N, H, W)
        hr4 = hr.reshape(Cout, N, H, W)
        # back half: [conv3x3 -> 2x2 avg-pool] + pooled residual, one matmul
        p2 = jnp.concatenate([pool_conv_patches(hm4), pool_patches(hr4)], axis=0)
        out = matmul_t(dbp["w2T"], p2, dbp["b3b"], relu_out=False,
                       out_dtype=jnp.bfloat16)               # (Cout, N*Ho*Wo)
        cur = out.reshape(Cout, N, H // 2, W // 2)
        scale_feats.append(cur)

    outs = []
    for feat, cp in zip(scale_feats, params["convs"]):
        Cj, _, Hs, Ws = feat.shape
        Coutj = cp["wT"].shape[0]
        # einops 'b t c h w -> b (c t) h w'  ->  channel index = c*T + t
        f = feat.reshape(Cj, B, T, Hs, Ws)
        f = jnp.transpose(f, (0, 2, 1, 3, 4)).reshape(Cj * T, B, Hs, Ws)
        o = matmul_t(cp["wT"], im2col_t(f), cp["b"], relu_out=True,
                     out_dtype=jnp.float32)                  # (Coutj, B*Hs*Ws)
        o = o.reshape(Coutj, B, Hs, Ws)
        outs.append(jnp.transpose(o, (1, 0, 2, 3)))          # back to NCHW
    return tuple(outs)


# ----------------------------------------------------------------------------
if __name__ == "__main__":
    key = jax.random.PRNGKey(0)
    kx, kp = jax.random.split(key)

    # small config: input_channels=1, output_channels=32, num_context_steps=4
    B, T, C, H, W = 2, 4, 1, 64, 64
    x = jax.random.normal(kx, (B, T, C, H, W), jnp.float32)
    params = init_params(kp, input_channels=1, output_channels=32,
                         num_context_steps=4, scale_channels=False)

    fwd = jax.jit(lambda inp: conditioning_stack_forward(inp, params))
    s1, s2, s3, s4 = jax.block_until_ready(fwd(x))

    # expected shapes (NCHW): (2,4,16,16), (2,8,8,8), (2,16,4,4), (2,32,2,2)
    assert s1.shape == (2, 4, 16, 16), s1.shape
    assert s2.shape == (2, 8, 8, 8), s2.shape
    assert s3.shape == (2, 16, 4, 4), s3.shape
    assert s4.shape == (2, 32, 2, 2), s4.shape
    assert all(bool(jnp.all(jnp.isfinite(s))) for s in (s1, s2, s3, s4))
    print("KERNEL_OK")
</pallas_src>

<mosaic_0001>
module attributes {stable_mosaic.version = 11 : i64} {
  func.func @_dblock_front_kernel(%arg0: i32, %arg1: memref<36x4096xbf16, #tpu.memory_space<vmem>>, %arg2: memref<4x4096xbf16, #tpu.memory_space<vmem>>, %arg3: memref<2x36xbf16, #tpu.memory_space<vmem>>, %arg4: memref<2x1xf32, #tpu.memory_space<vmem>>, %arg5: memref<2x4xbf16, #tpu.memory_space<vmem>>, %arg6: memref<2x1xf32, #tpu.memory_space<vmem>>, %arg7: memref<2x4096xbf16, #tpu.memory_space<vmem>>, %arg8: memref<2x4096xbf16, #tpu.memory_space<vmem>>) attributes {dimension_semantics = [#tpu.dimension_semantics<parallel>], iteration_bounds = array<i64: 2>, scalar_prefetch = 0 : i64, scratch_operands = 0 : i64, tpu.core_type = #tpu.core_type<tc>, window_params = [{transform_indices = @transform_0, window_bounds = array<i64: 36, 4096>}, {transform_indices = @transform_1, window_bounds = array<i64: 4, 4096>}, {pipeline_mode = #tpu.pipeline_mode<synchronous>, transform_indices = @transform_2, window_bounds = array<i64: 2, 36>}, {pipeline_mode = #tpu.pipeline_mode<synchronous>, transform_indices = @transform_3, window_bounds = array<i64: 2, 1>}, {pipeline_mode = #tpu.pipeline_mode<synchronous>, transform_indices = @transform_4, window_bounds = array<i64: 2, 4>}, {pipeline_mode = #tpu.pipeline_mode<synchronous>, transform_indices = @transform_5, window_bounds = array<i64: 2, 1>}, {transform_indices = @transform_6, window_bounds = array<i64: 2, 4096>}, {transform_indices = @transform_7, window_bounds = array<i64: 2, 4096>}]} {
    %c0 = arith.constant 0 : index
    %c0_0 = arith.constant 0 : index
    %0 = vector.load %arg3[%c0, %c0_0] : memref<2x36xbf16, #tpu.memory_space<vmem>>, vector<2x36xbf16>
    %c0_1 = arith.constant 0 : index
    %c0_2 = arith.constant 0 : index
    %1 = vector.load %arg1[%c0_1, %c0_2] : memref<36x4096xbf16, #tpu.memory_space<vmem>>, vector<36x4096xbf16>
    %cst = arith.constant dense<0.000000e+00> : vector<2x4096xf32>
    %2 = tpu.matmul %0, %1, %cst {dimension_numbers = #tpu.dot_dimension_numbers<[1], [0], [0], [1], [0, 0, 1, 1], [], []>} : vector<2x36xbf16>, vector<36x4096xbf16>, vector<2x4096xf32> -> vector<2x4096xf32>
    %c0_3 = arith.constant 0 : index
    %c0_4 = arith.constant 0 : index
    %3 = vector.load %arg4[%c0_3, %c0_4] : memref<2x1xf32, #tpu.memory_space<vmem>>, vector<2x1xf32>
    %4 = vector.broadcast %3 : vector<2x1xf32> to vector<2x4096xf32>
    %5 = arith.addf %2, %4 : vector<2x4096xf32>
    %cst_5 = arith.constant 0.000000e+00 : f32
    %6 = vector.broadcast %cst_5 : f32 to vector<2x4096xf32>
    %7 = arith.maximumf %5, %6 : vector<2x4096xf32>
    %8 = arith.truncf %7 : vector<2x4096xf32> to vector<2x4096xbf16>
    %c0_6 = arith.constant 0 : index
    %c0_7 = arith.constant 0 : index
    %9 = vector.load %arg7[%c0_6, %c0_7] : memref<2x4096xbf16, #tpu.memory_space<vmem>>, vector<2x4096xbf16>
    tpu.vector_store %arg7[%c0_6, %c0_7], %8 {strides = array<i32>} : memref<2x4096xbf16, #tpu.memory_space<vmem>>, vector<2x4096xbf16>,
    %c0_8 = arith.constant 0 : index
    %c0_9 = arith.constant 0 : index
    %10 = vector.load %arg5[%c0_8, %c0_9] : memref<2x4xbf16, #tpu.memory_space<vmem>>, vector<2x4xbf16>
    %c0_10 = arith.constant 0 : index
    %c0_11 = arith.constant 0 : index
    %11 = vector.load %arg2[%c0_10, %c0_11] : memref<4x4096xbf16, #tpu.memory_space<vmem>>, vector<4x4096xbf16>
    %cst_12 = arith.constant dense<0.000000e+00> : vector<2x4096xf32>
    %12 = tpu.matmul %10, %11, %cst_12 {dimension_numbers = #tpu.dot_dimension_numbers<[1], [0], [0], [1], [0, 0, 1, 1], [], []>} : vector<2x4xbf16>, vector<4x4096xbf16>, vector<2x4096xf32> -> vector<2x4096xf32>
    %c0_13 = arith.constant 0 : index
    %c0_14 = arith.constant 0 : index
    %13 = vector.load %arg6[%c0_13, %c0_14] : memref<2x1xf32, #tpu.memory_space<vmem>>, vector<2x1xf32>
    %14 = vector.broadcast %13 : vector<2x1xf32> to vector<2x4096xf32>
    %15 = arith.addf %12, %14 : vector<2x4096xf32>
    %16 = arith.truncf %15 : vector<2x4096xf32> to vector<2x4096xbf16>
    %c0_15 = arith.constant 0 : index
    %c0_16 = arith.constant 0 : index
    %17 = vector.load %arg8[%c0_15, %c0_16] : memref<2x4096xbf16, #tpu.memory_space<vmem>>, vector<2x4096xbf16>
    tpu.vector_store %arg8[%c0_15, %c0_16], %16 {strides = array<i32>} : memref<2x4096xbf16, #tpu.memory_space<vmem>>, vector<2x4096xbf16>,
    return
  }
  func.func @transform_0(%arg0: i32) -> (i32, i32) {
    %c0_i32 = arith.constant 0 : i32
    %c0_i32_0 = arith.constant 0 : i32
    return %c0_i32, %arg0 : i32, i32
  }
  func.func @transform_1(%arg0: i32) -> (i32, i32) {
    %c0_i32 = arith.constant 0 : i32
    %c0_i32_0 = arith.constant 0 : i32
    return %c0_i32, %arg0 : i32, i32
  }
  func.func @transform_2(%arg0: i32) -> (i32, i32) {
    %c0_i32 = arith.constant 0 : i32
    %c0_i32_0 = arith.constant 0 : i32
    %c0_i32_1 = arith.constant 0 : i32
    return %c0_i32, %c0_i32_0 : i32, i32
  }
  func.func @transform_3(%arg0: i32) -> (i32, i32) {
    %c0_i32 = arith.constant 0 : i32
    %c0_i32_0 = arith.constant 0 : i32
    %c0_i32_1 = arith.constant 0 : i32
    return %c0_i32, %c0_i32_0 : i32, i32
  }
  func.func @transform_4(%arg0: i32) -> (i32, i32) {
    %c0_i32 = arith.constant 0 : i32
    %c0_i32_0 = arith.constant 0 : i32
    %c0_i32_1 = arith.constant 0 : i32
    return %c0_i32, %c0_i32_0 : i32, i32
  }
  func.func @transform_5(%arg0: i32) -> (i32, i32) {
    %c0_i32 = arith.constant 0 : i32
    %c0_i32_0 = arith.constant 0 : i32
    %c0_i32_1 = arith.constant 0 : i32
    return %c0_i32, %c0_i32_0 : i32, i32
  }
  func.func @transform_6(%arg0: i32) -> (i32, i32) {
    %c0_i32 = arith.constant 0 : i32
    %c0_i32_0 = arith.constant 0 : i32
    return %c0_i32, %arg0 : i32, i32
  }
  func.func @transform_7(%arg0: i32) -> (i32, i32) {
    %c0_i32 = arith.constant 0 : i32
    %c0_i32_0 = arith.constant 0 : i32
    return %c0_i32, %arg0 : i32, i32
  }
}

module attributes {stable_mosaic.version = 11 : i64} {
  func.func @_mm_t_kernel(%arg0: i32, %arg1: memref<2x40xbf16, #tpu.memory_space<vmem>>, %arg2: memref<40x1024xbf16, #tpu.memory_space<vmem>>, %arg3: memref<2x1xf32, #tpu.memory_space<vmem>>, %arg4: memref<2x1024xbf16, #tpu.memory_space<vmem>>) attributes {dimension_semantics = [#tpu.dimension_semantics<parallel>], iteration_bounds = array<i64: 2>, scalar_prefetch = 0 : i64, scratch_operands = 0 : i64, tpu.core_type = #tpu.core_type<tc>, window_params = [{pipeline_mode = #tpu.pipeline_mode<synchronous>, transform_indices = @transform_0, window_bounds = array<i64: 2, 40>}, {transform_indices = @transform_1, window_bounds = array<i64: 40, 1024>}, {pipeline_mode = #tpu.pipeline_mode<synchronous>, transform_indices = @transform_2, window_bounds = array<i64: 2, 1>}, {transform_indices = @transform_3, window_bounds = array<i64: 2, 1024>}]} {
    %c0 = arith.constant 0 : index
    %c0_0 = arith.constant 0 : index
    %0 = vector.load %arg1[%c0, %c0_0] : memref<2x40xbf16, #tpu.memory_space<vmem>>, vector<2x40xbf16>
    %c0_1 = arith.constant 0 : index
    %c0_2 = arith.constant 0 : index
    %1 = vector.load %arg2[%c0_1, %c0_2] : memref<40x1024xbf16, #tpu.memory_space<vmem>>, vector<40x1024xbf16>
    %cst = arith.constant dense<0.000000e+00> : vector<2x1024xf32>
    %2 = tpu.matmul %0, %1, %cst {dimension_numbers = #tpu.dot_dimension_numbers<[1], [0], [0], [1], [0, 0, 1, 1], [], []>} : vector<2x40xbf16>, vector<40x1024xbf16>, vector<2x1024xf32> -> vector<2x1024xf32>
    %c0_3 = arith.constant 0 : index
    %c0_4 = arith.constant 0 : index
    %3 = vector.load %arg3[%c0_3, %c0_4] : memref<2x1xf32, #tpu.memory_space<vmem>>, vector<2x1xf32>
    %4 = vector.broadcast %3 : vector<2x1xf32> to vector<2x1024xf32>
    %5 = arith.addf %2, %4 : vector<2x1024xf32>
    %6 = arith.truncf %5 : vector<2x1024xf32> to vector<2x1024xbf16>
    %c0_5 = arith.constant 0 : index
    %c0_6 = arith.constant 0 : index
    %7 = vector.load %arg4[%c0_5, %c0_6] : memref<2x1024xbf16, #tpu.memory_space<vmem>>, vector<2x1024xbf16>
    tpu.vector_store %arg4[%c0_5, %c0_6], %6 {strides = array<i32>} : memref<2x1024xbf16, #tpu.memory_space<vmem>>, vector<2x1024xbf16>,
    return
  }
  func.func @transform_0(%arg0: i32) -> (i32, i32) {
    %c0_i32 = arith.constant 0 : i32
    %c0_i32_0 = arith.constant 0 : i32
    %c0_i32_1 = arith.constant 0 : i32
    return %c0_i32, %c0_i32_0 : i32, i32
  }
  func.func @transform_1(%arg0: i32) -> (i32, i32) {
    %c0_i32 = arith.constant 0 : i32
    %c0_i32_0 = arith.constant 0 : i32
    return %c0_i32, %arg0 : i32, i32
  }
  func.func @transform_2(%arg0: i32) -> (i32, i32) {
    %c0_i32 = arith.constant 0 : i32
    %c0_i32_0 = arith.constant 0 : i32
    %c0_i32_1 = arith.constant 0 : i32
    return %c0_i32, %c0_i32_0 : i32, i32
  }
  func.func @transform_3(%arg0: i32) -> (i32, i32) {
    %c0_i32 = arith.constant 0 : i32
    %c0_i32_0 = arith.constant 0 : i32
    return %c0_i32, %arg0 : i32, i32
  }
}

module attributes {stable_mosaic.version = 11 : i64} {
  func.func @_mm_t_kernel(%arg0: i32, %arg1: memref<4x72xbf16, #tpu.memory_space<vmem>>, %arg2: memref<72x256xbf16, #tpu.memory_space<vmem>>, %arg3: memref<4x1xf32, #tpu.memory_space<vmem>>, %arg4: memref<4x256xf32, #tpu.memory_space<vmem>>) attributes {dimension_semantics = [#tpu.dimension_semantics<parallel>], iteration_bounds = array<i64: 2>, scalar_prefetch = 0 : i64, scratch_operands = 0 : i64, tpu.core_type = #tpu.core_type<tc>, window_params = [{pipeline_mode = #tpu.pipeline_mode<synchronous>, transform_indices = @transform_0, window_bounds = array<i64: 4, 72>}, {transform_indices = @transform_1, window_bounds = array<i64: 72, 256>}, {pipeline_mode = #tpu.pipeline_mode<synchronous>, transform_indices = @transform_2, window_bounds = array<i64: 4, 1>}, {transform_indices = @transform_3, window_bounds = array<i64: 4, 256>}]} {
    %c0 = arith.constant 0 : index
    %c0_0 = arith.constant 0 : index
    %0 = vector.load %arg1[%c0, %c0_0] : memref<4x72xbf16, #tpu.memory_space<vmem>>, vector<4x72xbf16>
    %c0_1 = arith.constant 0 : index
    %c0_2 = arith.constant 0 : index
    %1 = vector.load %arg2[%c0_1, %c0_2] : memref<72x256xbf16, #tpu.memory_space<vmem>>, vector<72x256xbf16>
    %cst = arith.constant dense<0.000000e+00> : vector<4x256xf32>
    %2 = tpu.matmul %0, %1, %cst {dimension_numbers = #tpu.dot_dimension_numbers<[1], [0], [0], [1], [0, 0, 1, 1], [], []>} : vector<4x72xbf16>, vector<72x256xbf16>, vector<4x256xf32> -> vector<4x256xf32>
    %c0_3 = arith.constant 0 : index
    %c0_4 = arith.constant 0 : index
    %3 = vector.load %arg3[%c0_3, %c0_4] : memref<4x1xf32, #tpu.memory_space<vmem>>, vector<4x1xf32>
    %4 = vector.broadcast %3 : vector<4x1xf32> to vector<4x256xf32>
    %5 = arith.addf %2, %4 : vector<4x256xf32>
    %cst_5 = arith.constant 0.000000e+00 : f32
    %6 = vector.broadcast %cst_5 : f32 to vector<4x256xf32>
    %7 = arith.maximumf %5, %6 : vector<4x256xf32>
    %c0_6 = arith.constant 0 : index
    %c0_7 = arith.constant 0 : index
    %8 = vector.load %arg4[%c0_6, %c0_7] : memref<4x256xf32, #tpu.memory_space<vmem>>, vector<4x256xf32>
    tpu.vector_store %arg4[%c0_6, %c0_7], %7 {strides = array<i32>} : memref<4x256xf32, #tpu.memory_space<vmem>>, vector<4x256xf32>,
    return
  }
  func.func @transform_0(%arg0: i32) -> (i32, i32) {
    %c0_i32 = arith.constant 0 : i32
    %c0_i32_0 = arith.constant 0 : i32
    %c0_i32_1 = arith.constant 0 : i32
    return %c0_i32, %c0_i32_0 : i32, i32
  }
  func.func @transform_1(%arg0: i32) -> (i32, i32) {
    %c0_i32 = arith.constant 0 : i32
    %c0_i32_0 = arith.constant 0 : i32
    return %c0_i32, %arg0 : i32, i32
  }
  func.func @transform_2(%arg0: i32) -> (i32, i32) {
    %c0_i32 = arith.constant 0 : i32
    %c0_i32_0 = arith.constant 0 : i32
    %c0_i32_1 = arith.constant 0 : i32
    return %c0_i32, %c0_i32_0 : i32, i32
  }
  func.func @transform_3(%arg0: i32) -> (i32, i32) {
    %c0_i32 = arith.constant 0 : i32
    %c0_i32_0 = arith.constant 0 : i32
    return %c0_i32, %arg0 : i32, i32
  }
}

module attributes {stable_mosaic.version = 11 : i64} {
  func.func @_dblock_front_kernel(%arg0: i32, %arg1: memref<18x1024xbf16, #tpu.memory_space<vmem>>, %arg2: memref<2x1024xbf16, #tpu.memory_space<vmem>>, %arg3: memref<4x18xbf16, #tpu.memory_space<vmem>>, %arg4: memref<4x1xf32, #tpu.memory_space<vmem>>, %arg5: memref<4x2xbf16, #tpu.memory_space<vmem>>, %arg6: memref<4x1xf32, #tpu.memory_space<vmem>>, %arg7: memref<4x1024xbf16, #tpu.memory_space<vmem>>, %arg8: memref<4x1024xbf16, #tpu.memory_space<vmem>>) attributes {dimension_semantics = [#tpu.dimension_semantics<parallel>], iteration_bounds = array<i64: 2>, scalar_prefetch = 0 : i64, scratch_operands = 0 : i64, tpu.core_type = #tpu.core_type<tc>, window_params = [{transform_indices = @transform_0, window_bounds = array<i64: 18, 1024>}, {transform_indices = @transform_1, window_bounds = array<i64: 2, 1024>}, {pipeline_mode = #tpu.pipeline_mode<synchronous>, transform_indices = @transform_2, window_bounds = array<i64: 4, 18>}, {pipeline_mode = #tpu.pipeline_mode<synchronous>, transform_indices = @transform_3, window_bounds = array<i64: 4, 1>}, {pipeline_mode = #tpu.pipeline_mode<synchronous>, transform_indices = @transform_4, window_bounds = array<i64: 4, 2>}, {pipeline_mode = #tpu.pipeline_mode<synchronous>, transform_indices = @transform_5, window_bounds = array<i64: 4, 1>}, {transform_indices = @transform_6, window_bounds = array<i64: 4, 1024>}, {transform_indices = @transform_7, window_bounds = array<i64: 4, 1024>}]} {
    %c0 = arith.constant 0 : index
    %c0_0 = arith.constant 0 : index
    %0 = vector.load %arg3[%c0, %c0_0] : memref<4x18xbf16, #tpu.memory_space<vmem>>, vector<4x18xbf16>
    %c0_1 = arith.constant 0 : index
    %c0_2 = arith.constant 0 : index
    %1 = vector.load %arg1[%c0_1, %c0_2] : memref<18x1024xbf16, #tpu.memory_space<vmem>>, vector<18x1024xbf16>
    %cst = arith.constant dense<0.000000e+00> : vector<4x1024xf32>
    %2 = tpu.matmul %0, %1, %cst {dimension_numbers = #tpu.dot_dimension_numbers<[1], [0], [0], [1], [0, 0, 1, 1], [], []>} : vector<4x18xbf16>, vector<18x1024xbf16>, vector<4x1024xf32> -> vector<4x1024xf32>
    %c0_3 = arith.constant 0 : index
    %c0_4 = arith.constant 0 : index
    %3 = vector.load %arg4[%c0_3, %c0_4] : memref<4x1xf32, #tpu.memory_space<vmem>>, vector<4x1xf32>
    %4 = vector.broadcast %3 : vector<4x1xf32> to vector<4x1024xf32>
    %5 = arith.addf %2, %4 : vector<4x1024xf32>
    %cst_5 = arith.constant 0.000000e+00 : f32
    %6 = vector.broadcast %cst_5 : f32 to vector<4x1024xf32>
    %7 = arith.maximumf %5, %6 : vector<4x1024xf32>
    %8 = arith.truncf %7 : vector<4x1024xf32> to vector<4x1024xbf16>
    %c0_6 = arith.constant 0 : index
    %c0_7 = arith.constant 0 : index
    %9 = vector.load %arg7[%c0_6, %c0_7] : memref<4x1024xbf16, #tpu.memory_space<vmem>>, vector<4x1024xbf16>
    tpu.vector_store %arg7[%c0_6, %c0_7], %8 {strides = array<i32>} : memref<4x1024xbf16, #tpu.memory_space<vmem>>, vector<4x1024xbf16>,
    %c0_8 = arith.constant 0 : index
    %c0_9 = arith.constant 0 : index
    %10 = vector.load %arg5[%c0_8, %c0_9] : memref<4x2xbf16, #tpu.memory_space<vmem>>, vector<4x2xbf16>
    %c0_10 = arith.constant 0 : index
    %c0_11 = arith.constant 0 : index
    %11 = vector.load %arg2[%c0_10, %c0_11] : memref<2x1024xbf16, #tpu.memory_space<vmem>>, vector<2x1024xbf16>
    %cst_12 = arith.constant dense<0.000000e+00> : vector<4x1024xf32>
    %12 = tpu.matmul %10, %11, %cst_12 {dimension_numbers = #tpu.dot_dimension_numbers<[1], [0], [0], [1], [0, 0, 1, 1], [], []>} : vector<4x2xbf16>, vector<2x1024xbf16>, vector<4x1024xf32> -> vector<4x1024xf32>
    %c0_13 = arith.constant 0 : index
    %c0_14 = arith.constant 0 : index
    %13 = vector.load %arg6[%c0_13, %c0_14] : memref<4x1xf32, #tpu.memory_space<vmem>>, vector<4x1xf32>
    %14 = vector.broadcast %13 : vector<4x1xf32> to vector<4x1024xf32>
    %15 = arith.addf %12, %14 : vector<4x1024xf32>
    %16 = arith.truncf %15 : vector<4x1024xf32> to vector<4x1024xbf16>
    %c0_15 = arith.constant 0 : index
    %c0_16 = arith.constant 0 : index
    %17 = vector.load %arg8[%c0_15, %c0_16] : memref<4x1024xbf16, #tpu.memory_space<vmem>>, vector<4x1024xbf16>
    tpu.vector_store %arg8[%c0_15, %c0_16], %16 {strides = array<i32>} : memref<4x1024xbf16, #tpu.memory_space<vmem>>, vector<4x1024xbf16>,
    return
  }
  func.func @transform_0(%arg0: i32) -> (i32, i32) {
    %c0_i32 = arith.constant 0 : i32
    %c0_i32_0 = arith.constant 0 : i32
    return %c0_i32, %arg0 : i32, i32
  }
  func.func @transform_1(%arg0: i32) -> (i32, i32) {
    %c0_i32 = arith.constant 0 : i32
    %c0_i32_0 = arith.constant 0 : i32
    return %c0_i32, %arg0 : i32, i32
  }
  func.func @transform_2(%arg0: i32) -> (i32, i32) {
    %c0_i32 = arith.constant 0 : i32
    %c0_i32_0 = arith.constant 0 : i32
    %c0_i32_1 = arith.constant 0 : i32
    return %c0_i32, %c0_i32_0 : i32, i32
  }
  func.func @transform_3(%arg0: i32) -> (i32, i32) {
    %c0_i32 = arith.constant 0 : i32
    %c0_i32_0 = arith.constant 0 : i32
    %c0_i32_1 = arith.constant 0 : i32
    return %c0_i32, %c0_i32_0 : i32, i32
  }
  func.func @transform_4(%arg0: i32) -> (i32, i32) {
    %c0_i32 = arith.constant 0 : i32
    %c0_i32_0 = arith.constant 0 : i32
    %c0_i32_1 = arith.constant 0 : i32
    return %c0_i32, %c0_i32_0 : i32, i32
  }
  func.func @transform_5(%arg0: i32) -> (i32, i32) {
    %c0_i32 = arith.constant 0 : i32
    %c0_i32_0 = arith.constant 0 : i32
    %c0_i32_1 = arith.constant 0 : i32
    return %c0_i32, %c0_i32_0 : i32, i32
  }
  func.func @transform_6(%arg0: i32) -> (i32, i32) {
    %c0_i32 = arith.constant 0 : i32
    %c0_i32_0 = arith.constant 0 : i32
    return %c0_i32, %arg0 : i32, i32
  }
  func.func @transform_7(%arg0: i32) -> (i32, i32) {
    %c0_i32 = arith.constant 0 : i32
    %c0_i32_0 = arith.constant 0 : i32
    return %c0_i32, %arg0 : i32, i32
  }
}

module attributes {stable_mosaic.version = 11 : i64} {
  func.func @_mm_t_kernel(%arg0: i32, %arg1: memref<4x80xbf16, #tpu.memory_space<vmem>>, %arg2: memref<80x256xbf16, #tpu.memory_space<vmem>>, %arg3: memref<4x1xf32, #tpu.memory_space<vmem>>, %arg4: memref<4x256xbf16, #tpu.memory_space<vmem>>) attributes {dimension_semantics = [#tpu.dimension_semantics<parallel>], iteration_bounds = array<i64: 2>, scalar_prefetch = 0 : i64, scratch_operands = 0 : i64, tpu.core_type = #tpu.core_type<tc>, window_params = [{pipeline_mode = #tpu.pipeline_mode<synchronous>, transform_indices = @transform_0, window_bounds = array<i64: 4, 80>}, {transform_indices = @transform_1, window_bounds = array<i64: 80, 256>}, {pipeline_mode = #tpu.pipeline_mode<synchronous>, transform_indices = @transform_2, window_bounds = array<i64: 4, 1>}, {transform_indices = @transform_3, window_bounds = array<i64: 4, 256>}]} {
    %c0 = arith.constant 0 : index
    %c0_0 = arith.constant 0 : index
    %0 = vector.load %arg1[%c0, %c0_0] : memref<4x80xbf16, #tpu.memory_space<vmem>>, vector<4x80xbf16>
    %c0_1 = arith.constant 0 : index
    %c0_2 = arith.constant 0 : index
    %1 = vector.load %arg2[%c0_1, %c0_2] : memref<80x256xbf16, #tpu.memory_space<vmem>>, vector<80x256xbf16>
    %cst = arith.constant dense<0.000000e+00> : vector<4x256xf32>
    %2 = tpu.matmul %0, %1, %cst {dimension_numbers = #tpu.dot_dimension_numbers<[1], [0], [0], [1], [0, 0, 1, 1], [], []>} : vector<4x80xbf16>, vector<80x256xbf16>, vector<4x256xf32> -> vector<4x256xf32>
    %c0_3 = arith.constant 0 : index
    %c0_4 = arith.constant 0 : index
    %3 = vector.load %arg3[%c0_3, %c0_4] : memref<4x1xf32, #tpu.memory_space<vmem>>, vector<4x1xf32>
    %4 = vector.broadcast %3 : vector<4x1xf32> to vector<4x256xf32>
    %5 = arith.addf %2, %4 : vector<4x256xf32>
    %6 = arith.truncf %5 : vector<4x256xf32> to vector<4x256xbf16>
    %c0_5 = arith.constant 0 : index
    %c0_6 = arith.constant 0 : index
    %7 = vector.load %arg4[%c0_5, %c0_6] : memref<4x256xbf16, #tpu.memory_space<vmem>>, vector<4x256xbf16>
    tpu.vector_store %arg4[%c0_5, %c0_6], %6 {strides = array<i32>} : memref<4x256xbf16, #tpu.memory_space<vmem>>, vector<4x256xbf16>,
    return
  }
  func.func @transform_0(%arg0: i32) -> (i32, i32) {
    %c0_i32 = arith.constant 0 : i32
    %c0_i32_0 = arith.constant 0 : i32
    %c0_i32_1 = arith.constant 0 : i32
    return %c0_i32, %c0_i32_0 : i32, i32
  }
  func.func @transform_1(%arg0: i32) -> (i32, i32) {
    %c0_i32 = arith.constant 0 : i32
    %c0_i32_0 = arith.constant 0 : i32
    return %c0_i32, %arg0 : i32, i32
  }
  func.func @transform_2(%arg0: i32) -> (i32, i32) {
    %c0_i32 = arith.constant 0 : i32
    %c0_i32_0 = arith.constant 0 : i32
    %c0_i32_1 = arith.constant 0 : i32
    return %c0_i32, %c0_i32_0 : i32, i32
  }
  func.func @transform_3(%arg0: i32) -> (i32, i32) {
    %c0_i32 = arith.constant 0 : i32
    %c0_i32_0 = arith.constant 0 : i32
    return %c0_i32, %arg0 : i32, i32
  }
}

module attributes {stable_mosaic.version = 11 : i64} {
  func.func @_mm_t_kernel(%arg0: i32, %arg1: memref<8x144xbf16, #tpu.memory_space<vmem>>, %arg2: memref<144x128xbf16, #tpu.memory_space<vmem>>, %arg3: memref<8x1xf32, #tpu.memory_space<vmem>>, %arg4: memref<8x128xf32, #tpu.memory_space<vmem>>) attributes {dimension_semantics = [#tpu.dimension_semantics<parallel>], iteration_bounds = array<i64: 1>, scalar_prefetch = 0 : i64, scratch_operands = 0 : i64, tpu.core_type = #tpu.core_type<tc>, window_params = [{pipeline_mode = #tpu.pipeline_mode<synchronous>, transform_indices = @transform_0, window_bounds = array<i64: 8, 144>}, {transform_indices = @transform_1, window_bounds = array<i64: 144, 128>}, {pipeline_mode = #tpu.pipeline_mode<synchronous>, transform_indices = @transform_2, window_bounds = array<i64: 8, 1>}, {transform_indices = @transform_3, window_bounds = array<i64: 8, 128>}]} {
    %c0 = arith.constant 0 : index
    %c0_0 = arith.constant 0 : index
    %0 = vector.load %arg1[%c0, %c0_0] : memref<8x144xbf16, #tpu.memory_space<vmem>>, vector<8x144xbf16>
    %c0_1 = arith.constant 0 : index
    %c0_2 = arith.constant 0 : index
    %1 = vector.load %arg2[%c0_1, %c0_2] : memref<144x128xbf16, #tpu.memory_space<vmem>>, vector<144x128xbf16>
    %cst = arith.constant dense<0.000000e+00> : vector<8x128xf32>
    %2 = tpu.matmul %0, %1, %cst {dimension_numbers = #tpu.dot_dimension_numbers<[1], [0], [0], [1], [0, 0, 1, 1], [], []>} : vector<8x144xbf16>, vector<144x128xbf16>, vector<8x128xf32> -> vector<8x128xf32>
    %c0_3 = arith.constant 0 : index
    %c0_4 = arith.constant 0 : index
    %3 = vector.load %arg3[%c0_3, %c0_4] : memref<8x1xf32, #tpu.memory_space<vmem>>, vector<8x1xf32>
    %4 = vector.broadcast %3 : vector<8x1xf32> to vector<8x128xf32>
    %5 = arith.addf %2, %4 : vector<8x128xf32>
    %cst_5 = arith.constant 0.000000e+00 : f32
    %6 = vector.broadcast %cst_5 : f32 to vector<8x128xf32>
    %7 = arith.maximumf %5, %6 : vector<8x128xf32>
    %c0_6 = arith.constant 0 : index
    %c0_7 = arith.constant 0 : index
    %8 = vector.load %arg4[%c0_6, %c0_7] : memref<8x128xf32, #tpu.memory_space<vmem>>, vector<8x128xf32>
    tpu.vector_store %arg4[%c0_6, %c0_7], %7 {strides = array<i32>} : memref<8x128xf32, #tpu.memory_space<vmem>>, vector<8x128xf32>,
    return
  }
  func.func @transform_0(%arg0: i32) -> (i32, i32) {
    %c0_i32 = arith.constant 0 : i32
    %c0_i32_0 = arith.constant 0 : i32
    %c0_i32_1 = arith.constant 0 : i32
    return %c0_i32, %c0_i32_0 : i32, i32
  }
  func.func @transform_1(%arg0: i32) -> (i32, i32) {
    %c0_i32 = arith.constant 0 : i32
    %c0_i32_0 = arith.constant 0 : i32
    return %c0_i32, %arg0 : i32, i32
  }
  func.func @transform_2(%arg0: i32) -> (i32, i32) {
    %c0_i32 = arith.constant 0 : i32
    %c0_i32_0 = arith.constant 0 : i32
    %c0_i32_1 = arith.constant 0 : i32
    return %c0_i32, %c0_i32_0 : i32, i32
  }
  func.func @transform_3(%arg0: i32) -> (i32, i32) {
    %c0_i32 = arith.constant 0 : i32
    %c0_i32_0 = arith.constant 0 : i32
    return %c0_i32, %arg0 : i32, i32
  }
}

module attributes {stable_mosaic.version = 11 : i64} {
  func.func @_dblock_front_kernel(%arg0: i32, %arg1: memref<36x256xbf16, #tpu.memory_space<vmem>>, %arg2: memref<4x256xbf16, #tpu.memory_space<vmem>>, %arg3: memref<8x36xbf16, #tpu.memory_space<vmem>>, %arg4: memref<8x1xf32, #tpu.memory_space<vmem>>, %arg5: memref<8x4xbf16, #tpu.memory_space<vmem>>, %arg6: memref<8x1xf32, #tpu.memory_space<vmem>>, %arg7: memref<8x256xbf16, #tpu.memory_space<vmem>>, %arg8: memref<8x256xbf16, #tpu.memory_space<vmem>>) attributes {dimension_semantics = [#tpu.dimension_semantics<parallel>], iteration_bounds = array<i64: 2>, scalar_prefetch = 0 : i64, scratch_operands = 0 : i64, tpu.core_type = #tpu.core_type<tc>, window_params = [{transform_indices = @transform_0, window_bounds = array<i64: 36, 256>}, {transform_indices = @transform_1, window_bounds = array<i64: 4, 256>}, {pipeline_mode = #tpu.pipeline_mode<synchronous>, transform_indices = @transform_2, window_bounds = array<i64: 8, 36>}, {pipeline_mode = #tpu.pipeline_mode<synchronous>, transform_indices = @transform_3, window_bounds = array<i64: 8, 1>}, {pipeline_mode = #tpu.pipeline_mode<synchronous>, transform_indices = @transform_4, window_bounds = array<i64: 8, 4>}, {pipeline_mode = #tpu.pipeline_mode<synchronous>, transform_indices = @transform_5, window_bounds = array<i64: 8, 1>}, {transform_indices = @transform_6, window_bounds = array<i64: 8, 256>}, {transform_indices = @transform_7, window_bounds = array<i64: 8, 256>}]} {
    %c0 = arith.constant 0 : index
    %c0_0 = arith.constant 0 : index
    %0 = vector.load %arg3[%c0, %c0_0] : memref<8x36xbf16, #tpu.memory_space<vmem>>, vector<8x36xbf16>
    %c0_1 = arith.constant 0 : index
    %c0_2 = arith.constant 0 : index
    %1 = vector.load %arg1[%c0_1, %c0_2] : memref<36x256xbf16, #tpu.memory_space<vmem>>, vector<36x256xbf16>
    %cst = arith.constant dense<0.000000e+00> : vector<8x256xf32>
    %2 = tpu.matmul %0, %1, %cst {dimension_numbers = #tpu.dot_dimension_numbers<[1], [0], [0], [1], [0, 0, 1, 1], [], []>} : vector<8x36xbf16>, vector<36x256xbf16>, vector<8x256xf32> -> vector<8x256xf32>
    %c0_3 = arith.constant 0 : index
    %c0_4 = arith.constant 0 : index
    %3 = vector.load %arg4[%c0_3, %c0_4] : memref<8x1xf32, #tpu.memory_space<vmem>>, vector<8x1xf32>
    %4 = vector.broadcast %3 : vector<8x1xf32> to vector<8x256xf32>
    %5 = arith.addf %2, %4 : vector<8x256xf32>
    %cst_5 = arith.constant 0.000000e+00 : f32
    %6 = vector.broadcast %cst_5 : f32 to vector<8x256xf32>
    %7 = arith.maximumf %5, %6 : vector<8x256xf32>
    %8 = arith.truncf %7 : vector<8x256xf32> to vector<8x256xbf16>
    %c0_6 = arith.constant 0 : index
    %c0_7 = arith.constant 0 : index
    %9 = vector.load %arg7[%c0_6, %c0_7] : memref<8x256xbf16, #tpu.memory_space<vmem>>, vector<8x256xbf16>
    tpu.vector_store %arg7[%c0_6, %c0_7], %8 {strides = array<i32>} : memref<8x256xbf16, #tpu.memory_space<vmem>>, vector<8x256xbf16>,
    %c0_8 = arith.constant 0 : index
    %c0_9 = arith.constant 0 : index
    %10 = vector.load %arg5[%c0_8, %c0_9] : memref<8x4xbf16, #tpu.memory_space<vmem>>, vector<8x4xbf16>
    %c0_10 = arith.constant 0 : index
    %c0_11 = arith.constant 0 : index
    %11 = vector.load %arg2[%c0_10, %c0_11] : memref<4x256xbf16, #tpu.memory_space<vmem>>, vector<4x256xbf16>
    %cst_12 = arith.constant dense<0.000000e+00> : vector<8x256xf32>
    %12 = tpu.matmul %10, %11, %cst_12 {dimension_numbers = #tpu.dot_dimension_numbers<[1], [0], [0], [1], [0, 0, 1, 1], [], []>} : vector<8x4xbf16>, vector<4x256xbf16>, vector<8x256xf32> -> vector<8x256xf32>
    %c0_13 = arith.constant 0 : index
    %c0_14 = arith.constant 0 : index
    %13 = vector.load %arg6[%c0_13, %c0_14] : memref<8x1xf32, #tpu.memory_space<vmem>>, vector<8x1xf32>
    %14 = vector.broadcast %13 : vector<8x1xf32> to vector<8x256xf32>
    %15 = arith.addf %12, %14 : vector<8x256xf32>
    %16 = arith.truncf %15 : vector<8x256xf32> to vector<8x256xbf16>
    %c0_15 = arith.constant 0 : index
    %c0_16 = arith.constant 0 : index
    %17 = vector.load %arg8[%c0_15, %c0_16] : memref<8x256xbf16, #tpu.memory_space<vmem>>, vector<8x256xbf16>
    tpu.vector_store %arg8[%c0_15, %c0_16], %16 {strides = array<i32>} : memref<8x256xbf16, #tpu.memory_space<vmem>>, vector<8x256xbf16>,
    return
  }
  func.func @transform_0(%arg0: i32) -> (i32, i32) {
    %c0_i32 = arith.constant 0 : i32
    %c0_i32_0 = arith.constant 0 : i32
    return %c0_i32, %arg0 : i32, i32
  }
  func.func @transform_1(%arg0: i32) -> (i32, i32) {
    %c0_i32 = arith.constant 0 : i32
    %c0_i32_0 = arith.constant 0 : i32
    return %c0_i32, %arg0 : i32, i32
  }
  func.func @transform_2(%arg0: i32) -> (i32, i32) {
    %c0_i32 = arith.constant 0 : i32
    %c0_i32_0 = arith.constant 0 : i32
    %c0_i32_1 = arith.constant 0 : i32
    return %c0_i32, %c0_i32_0 : i32, i32
  }
  func.func @transform_3(%arg0: i32) -> (i32, i32) {
    %c0_i32 = arith.constant 0 : i32
    %c0_i32_0 = arith.constant 0 : i32
    %c0_i32_1 = arith.constant 0 : i32
    return %c0_i32, %c0_i32_0 : i32, i32
  }
  func.func @transform_4(%arg0: i32) -> (i32, i32) {
    %c0_i32 = arith.constant 0 : i32
    %c0_i32_0 = arith.constant 0 : i32
    %c0_i32_1 = arith.constant 0 : i32
    return %c0_i32, %c0_i32_0 : i32, i32
  }
  func.func @transform_5(%arg0: i32) -> (i32, i32) {
    %c0_i32 = arith.constant 0 : i32
    %c0_i32_0 = arith.constant 0 : i32
    %c0_i32_1 = arith.constant 0 : i32
    return %c0_i32, %c0_i32_0 : i32, i32
  }
  func.func @transform_6(%arg0: i32) -> (i32, i32) {
    %c0_i32 = arith.constant 0 : i32
    %c0_i32_0 = arith.constant 0 : i32
    return %c0_i32, %arg0 : i32, i32
  }
  func.func @transform_7(%arg0: i32) -> (i32, i32) {
    %c0_i32 = arith.constant 0 : i32
    %c0_i32_0 = arith.constant 0 : i32
    return %c0_i32, %arg0 : i32, i32
  }
}

module attributes {stable_mosaic.version = 11 : i64} {
  func.func @_mm_t_kernel(%arg0: i32, %arg1: memref<8x160xbf16, #tpu.memory_space<vmem>>, %arg2: memref<160x128xbf16, #tpu.memory_space<vmem>>, %arg3: memref<8x1xf32, #tpu.memory_space<vmem>>, %arg4: memref<8x128xbf16, #tpu.memory_space<vmem>>) attributes {dimension_semantics = [#tpu.dimension_semantics<parallel>], iteration_bounds = array<i64: 1>, scalar_prefetch = 0 : i64, scratch_operands = 0 : i64, tpu.core_type = #tpu.core_type<tc>, window_params = [{pipeline_mode = #tpu.pipeline_mode<synchronous>, transform_indices = @transform_0, window_bounds = array<i64: 8, 160>}, {transform_indices = @transform_1, window_bounds = array<i64: 160, 128>}, {pipeline_mode = #tpu.pipeline_mode<synchronous>, transform_indices = @transform_2, window_bounds = array<i64: 8, 1>}, {transform_indices = @transform_3, window_bounds = array<i64: 8, 128>}]} {
    %c0 = arith.constant 0 : index
    %c0_0 = arith.constant 0 : index
    %0 = vector.load %arg1[%c0, %c0_0] : memref<8x160xbf16, #tpu.memory_space<vmem>>, vector<8x160xbf16>
    %c0_1 = arith.constant 0 : index
    %c0_2 = arith.constant 0 : index
    %1 = vector.load %arg2[%c0_1, %c0_2] : memref<160x128xbf16, #tpu.memory_space<vmem>>, vector<160x128xbf16>
    %cst = arith.constant dense<0.000000e+00> : vector<8x128xf32>
    %2 = tpu.matmul %0, %1, %cst {dimension_numbers = #tpu.dot_dimension_numbers<[1], [0], [0], [1], [0, 0, 1, 1], [], []>} : vector<8x160xbf16>, vector<160x128xbf16>, vector<8x128xf32> -> vector<8x128xf32>
    %c0_3 = arith.constant 0 : index
    %c0_4 = arith.constant 0 : index
    %3 = vector.load %arg3[%c0_3, %c0_4] : memref<8x1xf32, #tpu.memory_space<vmem>>, vector<8x1xf32>
    %4 = vector.broadcast %3 : vector<8x1xf32> to vector<8x128xf32>
    %5 = arith.addf %2, %4 : vector<8x128xf32>
    %6 = arith.truncf %5 : vector<8x128xf32> to vector<8x128xbf16>
    %c0_5 = arith.constant 0 : index
    %c0_6 = arith.constant 0 : index
    %7 = vector.load %arg4[%c0_5, %c0_6] : memref<8x128xbf16, #tpu.memory_space<vmem>>, vector<8x128xbf16>
    tpu.vector_store %arg4[%c0_5, %c0_6], %6 {strides = array<i32>} : memref<8x128xbf16, #tpu.memory_space<vmem>>, vector<8x128xbf16>,
    return
  }
  func.func @transform_0(%arg0: i32) -> (i32, i32) {
    %c0_i32 = arith.constant 0 : i32
    %c0_i32_0 = arith.constant 0 : i32
    %c0_i32_1 = arith.constant 0 : i32
    return %c0_i32, %c0_i32_0 : i32, i32
  }
  func.func @transform_1(%arg0: i32) -> (i32, i32) {
    %c0_i32 = arith.constant 0 : i32
    %c0_i32_0 = arith.constant 0 : i32
    return %c0_i32, %arg0 : i32, i32
  }
  func.func @transform_2(%arg0: i32) -> (i32, i32) {
    %c0_i32 = arith.constant 0 : i32
    %c0_i32_0 = arith.constant 0 : i32
    %c0_i32_1 = arith.constant 0 : i32
    return %c0_i32, %c0_i32_0 : i32, i32
  }
  func.func @transform_3(%arg0: i32) -> (i32, i32) {
    %c0_i32 = arith.constant 0 : i32
    %c0_i32_0 = arith.constant 0 : i32
    return %c0_i32, %arg0 : i32, i32
  }
}

module attributes {stable_mosaic.version = 11 : i64} {
  func.func @_mm_t_kernel(%arg0: i32, %arg1: memref<16x288xbf16, #tpu.memory_space<vmem>>, %arg2: memref<288x32xbf16, #tpu.memory_space<vmem>>, %arg3: memref<16x1xf32, #tpu.memory_space<vmem>>, %arg4: memref<16x32xf32, #tpu.memory_space<vmem>>) attributes {dimension_semantics = [#tpu.dimension_semantics<parallel>], iteration_bounds = array<i64: 1>, scalar_prefetch = 0 : i64, scratch_operands = 0 : i64, tpu.core_type = #tpu.core_type<tc>, window_params = [{pipeline_mode = #tpu.pipeline_mode<synchronous>, transform_indices = @transform_0, window_bounds = array<i64: 16, 288>}, {transform_indices = @transform_1, window_bounds = array<i64: 288, 32>}, {pipeline_mode = #tpu.pipeline_mode<synchronous>, transform_indices = @transform_2, window_bounds = array<i64: 16, 1>}, {transform_indices = @transform_3, window_bounds = array<i64: 16, 32>}]} {
    %c0 = arith.constant 0 : index
    %c0_0 = arith.constant 0 : index
    %0 = vector.load %arg1[%c0, %c0_0] : memref<16x288xbf16, #tpu.memory_space<vmem>>, vector<16x288xbf16>
    %c0_1 = arith.constant 0 : index
    %c0_2 = arith.constant 0 : index
    %1 = vector.load %arg2[%c0_1, %c0_2] : memref<288x32xbf16, #tpu.memory_space<vmem>>, vector<288x32xbf16>
    %cst = arith.constant dense<0.000000e+00> : vector<16x32xf32>
    %2 = tpu.matmul %0, %1, %cst {dimension_numbers = #tpu.dot_dimension_numbers<[1], [0], [0], [1], [0, 0, 1, 1], [], []>} : vector<16x288xbf16>, vector<288x32xbf16>, vector<16x32xf32> -> vector<16x32xf32>
    %c0_3 = arith.constant 0 : index
    %c0_4 = arith.constant 0 : index
    %3 = vector.load %arg3[%c0_3, %c0_4] : memref<16x1xf32, #tpu.memory_space<vmem>>, vector<16x1xf32>
    %4 = vector.broadcast %3 : vector<16x1xf32> to vector<16x32xf32>
    %5 = arith.addf %2, %4 : vector<16x32xf32>
    %cst_5 = arith.constant 0.000000e+00 : f32
    %6 = vector.broadcast %cst_5 : f32 to vector<16x32xf32>
    %7 = arith.maximumf %5, %6 : vector<16x32xf32>
    %c0_6 = arith.constant 0 : index
    %c0_7 = arith.constant 0 : index
    %8 = vector.load %arg4[%c0_6, %c0_7] : memref<16x32xf32, #tpu.memory_space<vmem>>, vector<16x32xf32>
    tpu.vector_store %arg4[%c0_6, %c0_7], %7 {strides = array<i32>} : memref<16x32xf32, #tpu.memory_space<vmem>>, vector<16x32xf32>,
    return
  }
  func.func @transform_0(%arg0: i32) -> (i32, i32) {
    %c0_i32 = arith.constant 0 : i32
    %c0_i32_0 = arith.constant 0 : i32
    %c0_i32_1 = arith.constant 0 : i32
    return %c0_i32, %c0_i32_0 : i32, i32
  }
  func.func @transform_1(%arg0: i32) -> (i32, i32) {
    %c0_i32 = arith.constant 0 : i32
    %c0_i32_0 = arith.constant 0 : i32
    return %c0_i32, %arg0 : i32, i32
  }
  func.func @transform_2(%arg0: i32) -> (i32, i32) {
    %c0_i32 = arith.constant 0 : i32
    %c0_i32_0 = arith.constant 0 : i32
    %c0_i32_1 = arith.constant 0 : i32
    return %c0_i32, %c0_i32_0 : i32, i32
  }
  func.func @transform_3(%arg0: i32) -> (i32, i32) {
    %c0_i32 = arith.constant 0 : i32
    %c0_i32_0 = arith.constant 0 : i32
    return %c0_i32, %arg0 : i32, i32
  }
}

module attributes {stable_mosaic.version = 11 : i64} {
  func.func @_dblock_front_kernel(%arg0: i32, %arg1: memref<72x128xbf16, #tpu.memory_space<vmem>>, %arg2: memref<8x128xbf16, #tpu.memory_space<vmem>>, %arg3: memref<16x72xbf16, #tpu.memory_space<vmem>>, %arg4: memref<16x1xf32, #tpu.memory_space<vmem>>, %arg5: memref<16x8xbf16, #tpu.memory_space<vmem>>, %arg6: memref<16x1xf32, #tpu.memory_space<vmem>>, %arg7: memref<16x128xbf16, #tpu.memory_space<vmem>>, %arg8: memref<16x128xbf16, #tpu.memory_space<vmem>>) attributes {dimension_semantics = [#tpu.dimension_semantics<parallel>], iteration_bounds = array<i64: 1>, scalar_prefetch = 0 : i64, scratch_operands = 0 : i64, tpu.core_type = #tpu.core_type<tc>, window_params = [{transform_indices = @transform_0, window_bounds = array<i64: 72, 128>}, {transform_indices = @transform_1, window_bounds = array<i64: 8, 128>}, {pipeline_mode = #tpu.pipeline_mode<synchronous>, transform_indices = @transform_2, window_bounds = array<i64: 16, 72>}, {pipeline_mode = #tpu.pipeline_mode<synchronous>, transform_indices = @transform_3, window_bounds = array<i64: 16, 1>}, {pipeline_mode = #tpu.pipeline_mode<synchronous>, transform_indices = @transform_4, window_bounds = array<i64: 16, 8>}, {pipeline_mode = #tpu.pipeline_mode<synchronous>, transform_indices = @transform_5, window_bounds = array<i64: 16, 1>}, {transform_indices = @transform_6, window_bounds = array<i64: 16, 128>}, {transform_indices = @transform_7, window_bounds = array<i64: 16, 128>}]} {
    %c0 = arith.constant 0 : index
    %c0_0 = arith.constant 0 : index
    %0 = vector.load %arg3[%c0, %c0_0] : memref<16x72xbf16, #tpu.memory_space<vmem>>, vector<16x72xbf16>
    %c0_1 = arith.constant 0 : index
    %c0_2 = arith.constant 0 : index
    %1 = vector.load %arg1[%c0_1, %c0_2] : memref<72x128xbf16, #tpu.memory_space<vmem>>, vector<72x128xbf16>
    %cst = arith.constant dense<0.000000e+00> : vector<16x128xf32>
    %2 = tpu.matmul %0, %1, %cst {dimension_numbers = #tpu.dot_dimension_numbers<[1], [0], [0], [1], [0, 0, 1, 1], [], []>} : vector<16x72xbf16>, vector<72x128xbf16>, vector<16x128xf32> -> vector<16x128xf32>
    %c0_3 = arith.constant 0 : index
    %c0_4 = arith.constant 0 : index
    %3 = vector.load %arg4[%c0_3, %c0_4] : memref<16x1xf32, #tpu.memory_space<vmem>>, vector<16x1xf32>
    %4 = vector.broadcast %3 : vector<16x1xf32> to vector<16x128xf32>
    %5 = arith.addf %2, %4 : vector<16x128xf32>
    %cst_5 = arith.constant 0.000000e+00 : f32
    %6 = vector.broadcast %cst_5 : f32 to vector<16x128xf32>
    %7 = arith.maximumf %5, %6 : vector<16x128xf32>
    %8 = arith.truncf %7 : vector<16x128xf32> to vector<16x128xbf16>
    %c0_6 = arith.constant 0 : index
    %c0_7 = arith.constant 0 : index
    %9 = vector.load %arg7[%c0_6, %c0_7] : memref<16x128xbf16, #tpu.memory_space<vmem>>, vector<16x128xbf16>
    tpu.vector_store %arg7[%c0_6, %c0_7], %8 {strides = array<i32>} : memref<16x128xbf16, #tpu.memory_space<vmem>>, vector<16x128xbf16>,
    %c0_8 = arith.constant 0 : index
    %c0_9 = arith.constant 0 : index
    %10 = vector.load %arg5[%c0_8, %c0_9] : memref<16x8xbf16, #tpu.memory_space<vmem>>, vector<16x8xbf16>
    %c0_10 = arith.constant 0 : index
    %c0_11 = arith.constant 0 : index
    %11 = vector.load %arg2[%c0_10, %c0_11] : memref<8x128xbf16, #tpu.memory_space<vmem>>, vector<8x128xbf16>
    %cst_12 = arith.constant dense<0.000000e+00> : vector<16x128xf32>
    %12 = tpu.matmul %10, %11, %cst_12 {dimension_numbers = #tpu.dot_dimension_numbers<[1], [0], [0], [1], [0, 0, 1, 1], [], []>} : vector<16x8xbf16>, vector<8x128xbf16>, vector<16x128xf32> -> vector<16x128xf32>
    %c0_13 = arith.constant 0 : index
    %c0_14 = arith.constant 0 : index
    %13 = vector.load %arg6[%c0_13, %c0_14] : memref<16x1xf32, #tpu.memory_space<vmem>>, vector<16x1xf32>
    %14 = vector.broadcast %13 : vector<16x1xf32> to vector<16x128xf32>
    %15 = arith.addf %12, %14 : vector<16x128xf32>
    %16 = arith.truncf %15 : vector<16x128xf32> to vector<16x128xbf16>
    %c0_15 = arith.constant 0 : index
    %c0_16 = arith.constant 0 : index
    %17 = vector.load %arg8[%c0_15, %c0_16] : memref<16x128xbf16, #tpu.memory_space<vmem>>, vector<16x128xbf16>
    tpu.vector_store %arg8[%c0_15, %c0_16], %16 {strides = array<i32>} : memref<16x128xbf16, #tpu.memory_space<vmem>>, vector<16x128xbf16>,
    return
  }
  func.func @transform_0(%arg0: i32) -> (i32, i32) {
    %c0_i32 = arith.constant 0 : i32
    %c0_i32_0 = arith.constant 0 : i32
    return %c0_i32, %arg0 : i32, i32
  }
  func.func @transform_1(%arg0: i32) -> (i32, i32) {
    %c0_i32 = arith.constant 0 : i32
    %c0_i32_0 = arith.constant 0 : i32
    return %c0_i32, %arg0 : i32, i32
  }
  func.func @transform_2(%arg0: i32) -> (i32, i32) {
    %c0_i32 = arith.constant 0 : i32
    %c0_i32_0 = arith.constant 0 : i32
    %c0_i32_1 = arith.constant 0 : i32
    return %c0_i32, %c0_i32_0 : i32, i32
  }
  func.func @transform_3(%arg0: i32) -> (i32, i32) {
    %c0_i32 = arith.constant 0 : i32
    %c0_i32_0 = arith.constant 0 : i32
    %c0_i32_1 = arith.constant 0 : i32
    return %c0_i32, %c0_i32_0 : i32, i32
  }
  func.func @transform_4(%arg0: i32) -> (i32, i32) {
    %c0_i32 = arith.constant 0 : i32
    %c0_i32_0 = arith.constant 0 : i32
    %c0_i32_1 = arith.constant 0 : i32
    return %c0_i32, %c0_i32_0 : i32, i32
  }
  func.func @transform_5(%arg0: i32) -> (i32, i32) {
    %c0_i32 = arith.constant 0 : i32
    %c0_i32_0 = arith.constant 0 : i32
    %c0_i32_1 = arith.constant 0 : i32
    return %c0_i32, %c0_i32_0 : i32, i32
  }
  func.func @transform_6(%arg0: i32) -> (i32, i32) {
    %c0_i32 = arith.constant 0 : i32
    %c0_i32_0 = arith.constant 0 : i32
    return %c0_i32, %arg0 : i32, i32
  }
  func.func @transform_7(%arg0: i32) -> (i32, i32) {
    %c0_i32 = arith.constant 0 : i32
    %c0_i32_0 = arith.constant 0 : i32
    return %c0_i32, %arg0 : i32, i32
  }
}

module attributes {stable_mosaic.version = 11 : i64} {
  func.func @_mm_t_kernel(%arg0: i32, %arg1: memref<16x320xbf16, #tpu.memory_space<vmem>>, %arg2: memref<320x32xbf16, #tpu.memory_space<vmem>>, %arg3: memref<16x1xf32, #tpu.memory_space<vmem>>, %arg4: memref<16x32xbf16, #tpu.memory_space<vmem>>) attributes {dimension_semantics = [#tpu.dimension_semantics<parallel>], iteration_bounds = array<i64: 1>, scalar_prefetch = 0 : i64, scratch_operands = 0 : i64, tpu.core_type = #tpu.core_type<tc>, window_params = [{pipeline_mode = #tpu.pipeline_mode<synchronous>, transform_indices = @transform_0, window_bounds = array<i64: 16, 320>}, {transform_indices = @transform_1, window_bounds = array<i64: 320, 32>}, {pipeline_mode = #tpu.pipeline_mode<synchronous>, transform_indices = @transform_2, window_bounds = array<i64: 16, 1>}, {transform_indices = @transform_3, window_bounds = array<i64: 16, 32>}]} {
    %c0 = arith.constant 0 : index
    %c0_0 = arith.constant 0 : index
    %0 = vector.load %arg1[%c0, %c0_0] : memref<16x320xbf16, #tpu.memory_space<vmem>>, vector<16x320xbf16>
    %c0_1 = arith.constant 0 : index
    %c0_2 = arith.constant 0 : index
    %1 = vector.load %arg2[%c0_1, %c0_2] : memref<320x32xbf16, #tpu.memory_space<vmem>>, vector<320x32xbf16>
    %cst = arith.constant dense<0.000000e+00> : vector<16x32xf32>
    %2 = tpu.matmul %0, %1, %cst {dimension_numbers = #tpu.dot_dimension_numbers<[1], [0], [0], [1], [0, 0, 1, 1], [], []>} : vector<16x320xbf16>, vector<320x32xbf16>, vector<16x32xf32> -> vector<16x32xf32>
    %c0_3 = arith.constant 0 : index
    %c0_4 = arith.constant 0 : index
    %3 = vector.load %arg3[%c0_3, %c0_4] : memref<16x1xf32, #tpu.memory_space<vmem>>, vector<16x1xf32>
    %4 = vector.broadcast %3 : vector<16x1xf32> to vector<16x32xf32>
    %5 = arith.addf %2, %4 : vector<16x32xf32>
    %6 = arith.truncf %5 : vector<16x32xf32> to vector<16x32xbf16>
    %c0_5 = arith.constant 0 : index
    %c0_6 = arith.constant 0 : index
    %7 = vector.load %arg4[%c0_5, %c0_6] : memref<16x32xbf16, #tpu.memory_space<vmem>>, vector<16x32xbf16>
    tpu.vector_store %arg4[%c0_5, %c0_6], %6 {strides = array<i32>} : memref<16x32xbf16, #tpu.memory_space<vmem>>, vector<16x32xbf16>,
    return
  }
  func.func @transform_0(%arg0: i32) -> (i32, i32) {
    %c0_i32 = arith.constant 0 : i32
    %c0_i32_0 = arith.constant 0 : i32
    %c0_i32_1 = arith.constant 0 : i32
    return %c0_i32, %c0_i32_0 : i32, i32
  }
  func.func @transform_1(%arg0: i32) -> (i32, i32) {
    %c0_i32 = arith.constant 0 : i32
    %c0_i32_0 = arith.constant 0 : i32
    return %c0_i32, %arg0 : i32, i32
  }
  func.func @transform_2(%arg0: i32) -> (i32, i32) {
    %c0_i32 = arith.constant 0 : i32
    %c0_i32_0 = arith.constant 0 : i32
    %c0_i32_1 = arith.constant 0 : i32
    return %c0_i32, %c0_i32_0 : i32, i32
  }
  func.func @transform_3(%arg0: i32) -> (i32, i32) {
    %c0_i32 = arith.constant 0 : i32
    %c0_i32_0 = arith.constant 0 : i32
    return %c0_i32, %arg0 : i32, i32
  }
}

module attributes {stable_mosaic.version = 11 : i64} {
  func.func @_mm_t_kernel(%arg0: i32, %arg1: memref<32x576xbf16, #tpu.memory_space<vmem>>, %arg2: memref<576x8xbf16, #tpu.memory_space<vmem>>, %arg3: memref<32x1xf32, #tpu.memory_space<vmem>>, %arg4: memref<32x8xf32, #tpu.memory_space<vmem>>) attributes {dimension_semantics = [#tpu.dimension_semantics<parallel>], iteration_bounds = array<i64: 1>, scalar_prefetch = 0 : i64, scratch_operands = 0 : i64, tpu.core_type = #tpu.core_type<tc>, window_params = [{pipeline_mode = #tpu.pipeline_mode<synchronous>, transform_indices = @transform_0, window_bounds = array<i64: 32, 576>}, {transform_indices = @transform_1, window_bounds = array<i64: 576, 8>}, {pipeline_mode = #tpu.pipeline_mode<synchronous>, transform_indices = @transform_2, window_bounds = array<i64: 32, 1>}, {transform_indices = @transform_3, window_bounds = array<i64: 32, 8>}]} {
    %c0 = arith.constant 0 : index
    %c0_0 = arith.constant 0 : index
    %0 = vector.load %arg1[%c0, %c0_0] : memref<32x576xbf16, #tpu.memory_space<vmem>>, vector<32x576xbf16>
    %c0_1 = arith.constant 0 : index
    %c0_2 = arith.constant 0 : index
    %1 = vector.load %arg2[%c0_1, %c0_2] : memref<576x8xbf16, #tpu.memory_space<vmem>>, vector<576x8xbf16>
    %cst = arith.constant dense<0.000000e+00> : vector<32x8xf32>
    %2 = tpu.matmul %0, %1, %cst {dimension_numbers = #tpu.dot_dimension_numbers<[1], [0], [0], [1], [0, 0, 1, 1], [], []>} : vector<32x576xbf16>, vector<576x8xbf16>, vector<32x8xf32> -> vector<32x8xf32>
    %c0_3 = arith.constant 0 : index
    %c0_4 = arith.constant 0 : index
    %3 = vector.load %arg3[%c0_3, %c0_4] : memref<32x1xf32, #tpu.memory_space<vmem>>, vector<32x1xf32>
    %4 = vector.broadcast %3 : vector<32x1xf32> to vector<32x8xf32>
    %5 = arith.addf %2, %4 : vector<32x8xf32>
    %cst_5 = arith.constant 0.000000e+00 : f32
    %6 = vector.broadcast %cst_5 : f32 to vector<32x8xf32>
    %7 = arith.maximumf %5, %6 : vector<32x8xf32>
    %c0_6 = arith.constant 0 : index
    %c0_7 = arith.constant 0 : index
    %8 = vector.load %arg4[%c0_6, %c0_7] : memref<32x8xf32, #tpu.memory_space<vmem>>, vector<32x8xf32>
    tpu.vector_store %arg4[%c0_6, %c0_7], %7 {strides = array<i32>} : memref<32x8xf32, #tpu.memory_space<vmem>>, vector<32x8xf32>,
    return
  }
  func.func @transform_0(%arg0: i32) -> (i32, i32) {
    %c0_i32 = arith.constant 0 : i32
    %c0_i32_0 = arith.constant 0 : i32
    %c0_i32_1 = arith.constant 0 : i32
    return %c0_i32, %c0_i32_0 : i32, i32
  }
  func.func @transform_1(%arg0: i32) -> (i32, i32) {
    %c0_i32 = arith.constant 0 : i32
    %c0_i32_0 = arith.constant 0 : i32
    return %c0_i32, %arg0 : i32, i32
  }
  func.func @transform_2(%arg0: i32) -> (i32, i32) {
    %c0_i32 = arith.constant 0 : i32
    %c0_i32_0 = arith.constant 0 : i32
    %c0_i32_1 = arith.constant 0 : i32
    return %c0_i32, %c0_i32_0 : i32, i32
  }
  func.func @transform_3(%arg0: i32) -> (i32, i32) {
    %c0_i32 = arith.constant 0 : i32
    %c0_i32_0 = arith.constant 0 : i32
    return %c0_i32, %arg0 : i32, i32
  }
}

</mosaic_0001>

<bundles_post_ra>
// kernel: _lambda_.12
= control target key start
LH: loop header
LB: loop body
LE: loop exit
PB: predicated region body
PF: predicated region fallthrough
CT: control target
= control target key end

     0   :  { %s3658_s24 = smov 0   ;;  %s3660_s25 = smov 0   ;;  %s4306_s0 = inlined_call_operand.vmem [shape: bf16[36,8192], index: 0, kind: input, shape index: {}]   ;;  %s4307_s1 = inlined_call_operand.vmem [shape: bf16[4,8192], index: 1, kind: input, shape index: {}]   ;;  %s4308_s2 = inlined_call_operand.vmem [shape: bf16[2,36], index: 2, kind: input, shape index: {}]   ;;  %s4309_s3 = inlined_call_operand.vmem [shape: f32[2,1], index: 3, kind: input, shape index: {}]   ;;  %s4310_s4 = inlined_call_operand.vmem [shape: bf16[2,4], index: 4, kind: input, shape index: {}]   ;;  %s4311_s5 = inlined_call_operand.vmem [shape: f32[2,1], index: 5, kind: input, shape index: {}]   ;;  %s4312_s6 = inlined_call_operand.vmem [shape: bf16[2,8192], index: 6, kind: output, shape index: {0}]   ;;  %s4313_s7 = inlined_call_operand.vmem [shape: bf16[2,8192], index: 7, kind: output, shape index: {1}]  }
   0x1   :  { %s3662_s26 = smov 0  }
   0x2 LB: > { %s3315_s27 = sadd.s32 4294967295, %s3613_s26   ;;  %s3675_s28 = sadd.s32 1, %s3613_s26   ;;  %s3613_s26 = sphi %s3662_s26, %s4316_s26   ;;  %s3609_s25 = sphi %s3660_s25, %s4315_s25   ;;  %s3605_s24 = sphi %s3658_s24, %s4314_s24  }
   0x3   : > { %s22_s29 = ssub.s32 %s3613_s26, %s3675_s28  ;;  %s25_s30 = sadd.s32 1, %s3609_s25 }
   0x4   : > { %p23_p0 = scmp.eq.s32.totalorder %s22_s29, 0  ;;  %p32_p1 = scmp.ne.s32.totalorder %s3609_s25, %s3605_s24 }
   0x5   : > { %p33_p2 = scmp.eq.s32.totalorder %s3613_s26, 0  ;;  %p3318_p4 = scmp.ge.s32.totalorder %s3613_s26, 2 }
   0x6   : > { %s3684_s8 = scalar_select %p23_p0, %s3609_s25, %s25_s30  }
   0x7   : > { %p34_p3 = por %p33_p2, %p32_p1  ;;  %232 = sbr.rel (%p3318_p4) target bundleno = 57 (0x39), region = 32 }
   0xc   : > { %235 = sbr.rel (!%p34_p3) target bundleno = 57 (0x39), region = 36  ;;  %s237_s9 = sand.u32 (%p34_p3), 1, %s3609_s25  }
   0xd   : > { %s3520_s10 = sshll.u32 (%p34_p3), %s3613_s26, 7  ;;  %s3521_s11 = smul.u32 (%p34_p3), 640, %s237_s9 }
   0xe   : > { %s3692_s14 = scalar_lea.vmem (%p34_p3), %s4306_s0, %s3520_s10 }
   0xf   : > { %v255_v0 = vld [vmem:[%s3692_s14] sm:$0xff] (%p34_p3)  ;;  %v257_v1 = vld [vmem:[%s3692_s14 + $0x8] sm:$0xff] (%p34_p3)  ;;  %v259_v2 = vld [vmem:[%s3692_s14 + $0x10] sm:$0xff] (%p34_p3)  ;;  %s3700_s15 = scalar_lea.vmem (%p34_p3), [#allocation2], %s3521_s11 }
  0x10   : > { %v261_v3 = vld [vmem:[%s3692_s14 + $0x18] sm:$0xff] (%p34_p3)  ;;  %v263_v4 = vld [vmem:[%s3692_s14 + $0x20] sm:$0xff] (%p34_p3)  ;;  %v265_v5 = vld [vmem:[%s3692_s14 + $0x28] sm:$0xff] (%p34_p3)  ;;  %256 = vst [vmem:[%s3700_s15] sm:$0xff] (%p34_p3), %v255_v0 }
  0x11   : > { %258 = vst [vmem:[%s3700_s15 + $0x8] sm:$0xff] %v257_v1  ;;  %260 = vst [vmem:[%s3700_s15 + $0x10] sm:$0xff] %v259_v2  ;;  %v267_v6 = vld [vmem:[%s3692_s14 + $0x30] sm:$0xff]  ;;  %v269_v7 = vld [vmem:[%s3692_s14 + $0x38] sm:$0xff] }
  0x12   : > { %262 = vst [vmem:[%s3700_s15 + $0x18] sm:$0xff] %v261_v3  ;;  %264 = vst [vmem:[%s3700_s15 + $0x20] sm:$0xff] %v263_v4  ;;  %v271_v8 = vld [vmem:[%s3692_s14 + $0x40] sm:$0xff]  ;;  %v273_v9 = vld [vmem:[%s3692_s14 + $0x48] sm:$0xff] }
  0x13   : > { %266 = vst [vmem:[%s3700_s15 + $0x28] sm:$0xff] %v265_v5  ;;  %268 = vst [vmem:[%s3700_s15 + $0x30] sm:$0xff] %v267_v6  ;;  %v275_v10 = vld [vmem:[%s3692_s14 + $0x50] sm:$0xff]  ;;  %v277_v11 = vld [vmem:[%s3692_s14 + $0x58] sm:$0xff] }
  0x14   : > { %270 = vst [vmem:[%s3700_s15 + $0x38] sm:$0xff] %v269_v7  ;;  %272 = vst [vmem:[%s3700_s15 + $0x40] sm:$0xff] %v271_v8  ;;  %v279_v12 = vld [vmem:[%s3692_s14 + $0x60] sm:$0xff]  ;;  %v281_v13 = vld [vmem:[%s3692_s14 + $0x68] sm:$0xff] }
  0x15   : > { %274 = vst [vmem:[%s3700_s15 + $0x48] sm:$0xff] %v273_v9  ;;  %276 = vst [vmem:[%s3700_s15 + $0x50] sm:$0xff] %v275_v10  ;;  %v283_v14 = vld [vmem:[%s3692_s14 + $0x70] sm:$0xff]  ;;  %v285_v15 = vld [vmem:[%s3692_s14 + $0x78] sm:$0xff] }
  0x16   : > { %278 = vst [vmem:[%s3700_s15 + $0x58] sm:$0xff] %v277_v11  ;;  %280 = vst [vmem:[%s3700_s15 + $0x60] sm:$0xff] %v279_v12  ;;  %v287_v16 = vld [vmem:[%s3692_s14 + $0x100] sm:$0xff]  ;;  %v289_v17 = vld [vmem:[%s3692_s14 + $0x108] sm:$0xff] }
  0x17   : > { %282 = vst [vmem:[%s3700_s15 + $0x68] sm:$0xff] %v281_v13  ;;  %284 = vst [vmem:[%s3700_s15 + $0x70] sm:$0xff] %v283_v14  ;;  %v291_v18 = vld [vmem:[%s3692_s14 + $0x110] sm:$0xff]  ;;  %v293_v19 = vld [vmem:[%s3692_s14 + $0x118] sm:$0xff] }
  0x18   : > { %286 = vst [vmem:[%s3700_s15 + $0x78] sm:$0xff] %v285_v15  ;;  %288 = vst [vmem:[%s3700_s15 + $0x80] sm:$0xff] %v287_v16  ;;  %v295_v20 = vld [vmem:[%s3692_s14 + $0x120] sm:$0xff]  ;;  %v297_v21 = vld [vmem:[%s3692_s14 + $0x128] sm:$0xff] }
  0x19   : > { %290 = vst [vmem:[%s3700_s15 + $0x88] sm:$0xff] %v289_v17  ;;  %292 = vst [vmem:[%s3700_s15 + $0x90] sm:$0xff] %v291_v18  ;;  %v299_v22 = vld [vmem:[%s3692_s14 + $0x130] sm:$0xff]  ;;  %v301_v23 = vld [vmem:[%s3692_s14 + $0x138] sm:$0xff] }
  0x1a   : > { %294 = vst [vmem:[%s3700_s15 + $0x98] sm:$0xff] %v293_v19  ;;  %296 = vst [vmem:[%s3700_s15 + $0xa0] sm:$0xff] %v295_v20  ;;  %v303_v24 = vld [vmem:[%s3692_s14 + $0x140] sm:$0xff]  ;;  %v305_v25 = vld [vmem:[%s3692_s14 + $0x148] sm:$0xff] }
  0x1b   : > { %298 = vst [vmem:[%s3700_s15 + $0xa8] sm:$0xff] %v297_v21  ;;  %300 = vst [vmem:[%s3700_s15 + $0xb0] sm:$0xff] %v299_v22  ;;  %v307_v26 = vld [vmem:[%s3692_s14 + $0x150] sm:$0xff]  ;;  %v309_v27 = vld [vmem:[%s3692_s14 + $0x158] sm:$0xff] }
  0x1c   : > { %302 = vst [vmem:[%s3700_s15 + $0xb8] sm:$0xff] %v301_v23  ;;  %304 = vst [vmem:[%s3700_s15 + $0xc0] sm:$0xff] %v303_v24  ;;  %v311_v28 = vld [vmem:[%s3692_s14 + $0x160] sm:$0xff]  ;;  %v313_v29 = vld [vmem:[%s3692_s14 + $0x168] sm:$0xff] }
  0x1d   : > { %306 = vst [vmem:[%s3700_s15 + $0xc8] sm:$0xff] %v305_v25  ;;  %308 = vst [vmem:[%s3700_s15 + $0xd0] sm:$0xff] %v307_v26  ;;  %v315_v30 = vld [vmem:[%s3692_s14 + $0x170] sm:$0xff]  ;;  %v317_v31 = vld [vmem:[%s3692_s14 + $0x178] sm:$0xff] }
  0x1e   : > { %310 = vst [vmem:[%s3700_s15 + $0xd8] sm:$0xff] %v309_v27  ;;  %312 = vst [vmem:[%s3700_s15 + $0xe0] sm:$0xff] %v311_v28  ;;  %v319_v32 = vld [vmem:[%s3692_s14 + $0x200] sm:$0xff]  ;;  %v321_v33 = vld [vmem:[%s3692_s14 + $0x208] sm:$0xff] }
  0x1f   : > { %314 = vst [vmem:[%s3700_s15 + $0xe8] sm:$0xff] %v313_v29  ;;  %316 = vst [vmem:[%s3700_s15 + $0xf0] sm:$0xff] %v315_v30  ;;  %v323_v34 = vld [vmem:[%s3692_s14 + $0x210] sm:$0xff]  ;;  %v325_v35 = vld [vmem:[%s3692_s14 + $0x218] sm:$0xff] }
  0x20   : > { %318 = vst [vmem:[%s3700_s15 + $0xf8] sm:$0xff] %v317_v31  ;;  %320 = vst [vmem:[%s3700_s15 + $0x100] sm:$0xff] %v319_v32  ;;  %v327_v36 = vld [vmem:[%s3692_s14 + $0x220] sm:$0xff]  ;;  %v329_v37 = vld [vmem:[%s3692_s14 + $0x228] sm:$0xff] }
  0x21   : > { %322 = vst [vmem:[%s3700_s15 + $0x108] sm:$0xff] %v321_v33  ;;  %324 = vst [vmem:[%s3700_s15 + $0x110] sm:$0xff] %v323_v34  ;;  %v331_v38 = vld [vmem:[%s3692_s14 + $0x230] sm:$0xff]  ;;  %v333_v39 = vld [vmem:[%s3692_s14 + $0x238] sm:$0xff] }
  0x22   : > { %326 = vst [vmem:[%s3700_s15 + $0x118] sm:$0xff] %v325_v35  ;;  %328 = vst [vmem:[%s3700_s15 + $0x120] sm:$0xff] %v327_v36  ;;  %v335_v40 = vld [vmem:[%s3692_s14 + $0x240] sm:$0xff]  ;;  %v337_v41 = vld [vmem:[%s3692_s14 + $0x248] sm:$0xff] }
  0x23   : > { %330 = vst [vmem:[%s3700_s15 + $0x128] sm:$0xff] %v329_v37  ;;  %332 = vst [vmem:[%s3700_s15 + $0x130] sm:$0xff] %v331_v38  ;;  %v339_v42 = vld [vmem:[%s3692_s14 + $0x250] sm:$0xff]  ;;  %v341_v43 = vld [vmem:[%s3692_s14 + $0x258] sm:$0xff] }
  0x24   : > { %334 = vst [vmem:[%s3700_s15 + $0x138] sm:$0xff] %v333_v39  ;;  %336 = vst [vmem:[%s3700_s15 + $0x140] sm:$0xff] %v335_v40  ;;  %v343_v44 = vld [vmem:[%s3692_s14 + $0x260] sm:$0xff]  ;;  %v345_v45 = vld [vmem:[%s3692_s14 + $0x268] sm:$0xff] }
  0x25   : > { %338 = vst [vmem:[%s3700_s15 + $0x148] sm:$0xff] %v337_v41  ;;  %340 = vst [vmem:[%s3700_s15 + $0x150] sm:$0xff] %v339_v42  ;;  %v347_v46 = vld [vmem:[%s3692_s14 + $0x270] sm:$0xff]  ;;  %v349_v47 = vld [vmem:[%s3692_s14 + $0x278] sm:$0xff] }
  0x26   : > { %342 = vst [vmem:[%s3700_s15 + $0x158] sm:$0xff] %v341_v43  ;;  %344 = vst [vmem:[%s3700_s15 + $0x160] sm:$0xff] %v343_v44  ;;  %v351_v48 = vld [vmem:[%s3692_s14 + $0x300] sm:$0xff]  ;;  %v353_v49 = vld [vmem:[%s3692_s14 + $0x308] sm:$0xff] }
  0x27   : > { %346 = vst [vmem:[%s3700_s15 + $0x168] sm:$0xff] %v345_v45  ;;  %348 = vst [vmem:[%s3700_s15 + $0x170] sm:$0xff] %v347_v46  ;;  %v355_v50 = vld [vmem:[%s3692_s14 + $0x310] sm:$0xff]  ;;  %v357_v51 = vld [vmem:[%s3692_s14 + $0x318] sm:$0xff] }
  0x28   : > { %350 = vst [vmem:[%s3700_s15 + $0x178] sm:$0xff] %v349_v47  ;;  %352 = vst [vmem:[%s3700_s15 + $0x180] sm:$0xff] %v351_v48  ;;  %v359_v52 = vld [vmem:[%s3692_s14 + $0x320] sm:$0xff]  ;;  %v361_v53 = vld [vmem:[%s3692_s14 + $0x328] sm:$0xff] }
  0x29   : > { %354 = vst [vmem:[%s3700_s15 + $0x188] sm:$0xff] %v353_v49  ;;  %356 = vst [vmem:[%s3700_s15 + $0x190] sm:$0xff] %v355_v50  ;;  %v363_v54 = vld [vmem:[%s3692_s14 + $0x330] sm:$0xff]  ;;  %v365_v55 = vld [vmem:[%s3692_s14 + $0x338] sm:$0xff] }
  0x2a   : > { %358 = vst [vmem:[%s3700_s15 + $0x198] sm:$0xff] %v357_v51  ;;  %360 = vst [vmem:[%s3700_s15 + $0x1a0] sm:$0xff] %v359_v52  ;;  %v367_v56 = vld [vmem:[%s3692_s14 + $0x340] sm:$0xff]  ;;  %v369_v57 = vld [vmem:[%s3692_s14 + $0x348] sm:$0xff] }
  0x2b   : > { %362 = vst [vmem:[%s3700_s15 + $0x1a8] sm:$0xff] %v361_v53  ;;  %364 = vst [vmem:[%s3700_s15 + $0x1b0] sm:$0xff] %v363_v54  ;;  %v371_v58 = vld [vmem:[%s3692_s14 + $0x350] sm:$0xff]  ;;  %v373_v59 = vld [vmem:[%s3692_s14 + $0x358] sm:$0xff] }
  0x2c   : > { %366 = vst [vmem:[%s3700_s15 + $0x1b8] sm:$0xff] %v365_v55  ;;  %368 = vst [vmem:[%s3700_s15 + $0x1c0] sm:$0xff] %v367_v56  ;;  %v375_v60 = vld [vmem:[%s3692_s14 + $0x360] sm:$0xff]  ;;  %v377_v61 = vld [vmem:[%s3692_s14 + $0x368] sm:$0xff] }
  0x2d   : > { %370 = vst [vmem:[%s3700_s15 + $0x1c8] sm:$0xff] %v369_v57  ;;  %372 = vst [vmem:[%s3700_s15 + $0x1d0] sm:$0xff] %v371_v58  ;;  %v379_v62 = vld [vmem:[%s3692_s14 + $0x370] sm:$0xff]  ;;  %v381_v63 = vld [vmem:[%s3692_s14 + $0x378] sm:$0xff] }
  0x2e   : > { %374 = vst [vmem:[%s3700_s15 + $0x1d8] sm:$0xff] %v373_v59  ;;  %376 = vst [vmem:[%s3700_s15 + $0x1e0] sm:$0xff] %v375_v60  ;;  %v383_v0 = vld [vmem:[%s3692_s14 + $0x400] sm:$0xff]  ;;  %v385_v1 = vld [vmem:[%s3692_s14 + $0x408] sm:$0xff] }
  0x2f   : > { %378 = vst [vmem:[%s3700_s15 + $0x1e8] sm:$0xff] %v377_v61  ;;  %380 = vst [vmem:[%s3700_s15 + $0x1f0] sm:$0xff] %v379_v62  ;;  %v387_v2 = vld [vmem:[%s3692_s14 + $0x410] sm:$0xff]  ;;  %v389_v3 = vld [vmem:[%s3692_s14 + $0x418] sm:$0xff] }
  0x30   : > { %382 = vst [vmem:[%s3700_s15 + $0x1f8] sm:$0xff] %v381_v63  ;;  %384 = vst [vmem:[%s3700_s15 + $0x200] sm:$0xff] %v383_v0  ;;  %v391_v4 = vld [vmem:[%s3692_s14 + $0x420] sm:$0xff]  ;;  %v393_v5 = vld [vmem:[%s3692_s14 + $0x428] sm:$0xff] }
  0x31   : > { %386 = vst [vmem:[%s3700_s15 + $0x208] sm:$0xff] %v385_v1  ;;  %388 = vst [vmem:[%s3700_s15 + $0x210] sm:$0xff] %v387_v2  ;;  %v395_v6 = vld [vmem:[%s3692_s14 + $0x430] sm:$0xff]  ;;  %v397_v7 = vld [vmem:[%s3692_s14 + $0x438] sm:$0xff] }
  0x32   : > { %390 = vst [vmem:[%s3700_s15 + $0x218] sm:$0xff] %v389_v3  ;;  %392 = vst [vmem:[%s3700_s15 + $0x220] sm:$0xff] %v391_v4  ;;  %v399_v8 = vld [vmem:[%s3692_s14 + $0x440] sm:$0xff]  ;;  %v401_v9 = vld [vmem:[%s3692_s14 + $0x448] sm:$0xff] }
  0x33   : > { %394 = vst [vmem:[%s3700_s15 + $0x228] sm:$0xff] %v393_v5  ;;  %396 = vst [vmem:[%s3700_s15 + $0x230] sm:$0xff] %v395_v6  ;;  %v403_v10 = vld [vmem:[%s3692_s14 + $0x450] sm:$0xff]  ;;  %v405_v11 = vld [vmem:[%s3692_s14 + $0x458] sm:$0xff] }
  0x34   : > { %398 = vst [vmem:[%s3700_s15 + $0x238] sm:$0xff] %v397_v7  ;;  %400 = vst [vmem:[%s3700_s15 + $0x240] sm:$0xff] %v399_v8  ;;  %v407_v12 = vld [vmem:[%s3692_s14 + $0x460] sm:$0xff]  ;;  %v409_v13 = vld [vmem:[%s3692_s14 + $0x468] sm:$0xff] }
  0x35   : > { %402 = vst [vmem:[%s3700_s15 + $0x248] sm:$0xff] %v401_v9  ;;  %404 = vst [vmem:[%s3700_s15 + $0x250] sm:$0xff] %v403_v10  ;;  %v411_v14 = vld [vmem:[%s3692_s14 + $0x470] sm:$0xff]  ;;  %v413_v15 = vld [vmem:[%s3692_s14 + $0x478] sm:$0xff] }
  0x36   : > { %406 = vst [vmem:[%s3700_s15 + $0x258] sm:$0xff] %v405_v11  ;;  %408 = vst [vmem:[%s3700_s15 + $0x260] sm:$0xff] %v407_v12 }
  0x37   : > { %410 = vst [vmem:[%s3700_s15 + $0x268] sm:$0xff] %v409_v13  ;;  %412 = vst [vmem:[%s3700_s15 + $0x270] sm:$0xff] %v411_v14 }
  0x38   : > { %414 = vst [vmem:[%s3700_s15 + $0x278] sm:$0xff] %v413_v15 }
  0x39 PF: > { %p3321_p5 = scmp.ge.s32.totalorder %s3613_s26, 1  ;;  %p428_p6 = scmp.lt.s32.totalorder %s3613_s26, 3 }
  0x3b   : > { %p429_p7 = pnand %p3321_p5, %p428_p6 }
  0x3c   : > { %s435_s16 = sand.u32 (!%p429_p7), 1, %s3605_s24   ;;  %s3322_s29 = sshll.u32 (!%p429_p7), %s3315_s27, 5 }
  0x3d   : > { %432 = sbr.rel (%p429_p7) target bundleno = 438 (0x1b6), region = 63  ;;  %p476_p8 = scmp.lt.s32.totalorder (!%p429_p7), %s3322_s29, 63 }
  0x3e   : > { %s3522_s17 = smul.u32 (!%p429_p7), 640, %s435_s16 }
  0x40   : > { %s3865_s20 = scalar_lea.vmem (!%p429_p7), [#allocation2], %s3522_s17 }
  0x42   : > { %v3615_v16 = vmov 0   ;;  %v573_v17 = vld [vmem:[%s4309_s3] sm:$0x3]  ;;  %vm983_vm0 = vcmask 1041408   ;;  %v558_v19 = vld [vmem:[%s3865_s20 + $0x208] sm:$0x33] }
  0x43   : > { %1112 = vmatprep.mubr.bf16.mxu0 %v3615_v16  ;;  %1153 = vmatprep.mubr.bf16.mxu1 %v3615_v16  ;;  %v557_v18 = vld [vmem:[%s3865_s20 + $0x200] sm:$0x33]  ;;  %v3393_v22 = vcombine.high %v558_v19, %v558_v19  ;;  %v3392_v24 = vcombine.low %v558_v19, %v558_v19  ;;  %v526_v26 = vld [vmem:[%s3865_s20 + $0x108] sm:$0xff]  ;;  %v559_v40 = vld [vmem:[%s3865_s20 + $0x210] sm:$0x33]  ;;  %vm979_vm1 = vcmask 293888  }
  0x44   : > { %3550 = vset.pattern.permute.xlu0 %v3615_v16  ;;  %v525_v20 = vld [vmem:[%s3865_s20 + $0x100] sm:$0xff]  ;;  %v3391_v21 = vcombine.high %v557_v18, %v557_v18  ;;  %v3390_v23 = vcombine.low %v557_v18, %v557_v18  ;;  %v542_v27 = vld [vmem:[%s3865_s20 + $0x188] sm:$0xff]  ;;  %v560_v41 = vld [vmem:[%s3865_s20 + $0x218] sm:$0x33]  ;;  %v3395_v44 = vcombine.high %v559_v40, %v559_v40  ;;  %v3394_v46 = vcombine.low %v559_v40, %v559_v40  ;;  %s4318_s29 = smov (!%p476_p8, %s3322_s29), 63 }
  0x45   : > { %576 = vperm.xlu0 %3550, %v573_v17   ;;  %v541_v25 = vld [vmem:[%s3865_s20 + $0x180] sm:$0xff]  ;;  %v3361_v29 = vcombine.high %v526_v26, %v542_v27  ;;  %v494_v32 = vld [vmem:[%s3865_s20 + $0x8] sm:$0xff]  ;;  %3424 = vmatprep.subr.msk.bf16.mxu1 %vm983_vm0, %v3393_v22  ;;  %v991_v34 = vsel %vm983_vm0, %v3392_v24, 0  ;;  %v3360_v37 = vcombine.low %v526_v26, %v542_v27  ;;  %v3397_v45 = vcombine.high %v560_v41, %v560_v41  ;;  %v527_v48 = vld [vmem:[%s3865_s20 + $0x110] sm:$0xff]  ;;  %s3323_s26 = sshll.u32 %s4318_s29, 1  ;;  %s4180_s14 = scalar_lea.vmem %s4312_s6, %s4318_s29 }
  0x46   : > { %v3359_v28 = vcombine.high %v525_v20, %v541_v25  ;;  %v493_v30 = vld [vmem:[%s3865_s20] sm:$0xff]  ;;  %3422 = vmatprep.subr.msk.bf16.mxu0 %vm983_vm0, %v3391_v21  ;;  %v985_v33 = vsel %vm983_vm0, %v3390_v23, 0  ;;  %v510_v35 = vld [vmem:[%s3865_s20 + $0x88] sm:$0xff]  ;;  %1132 = vmatpush1.bf16.msra.mxu1 %v991_v34  ;;  %v3358_v36 = vcombine.low %v525_v20, %v541_v25  ;;  %v3396_v47 = vcombine.low %v560_v41, %v560_v41  ;;  %v543_v49 = vld [vmem:[%s3865_s20 + $0x190] sm:$0xff]  ;;  %s4019_s9 = scalar_lea.vmem %s4307_s1, %s3323_s26  ;;  %s4250_s17 = scalar_lea.vmem %s4313_s7, %s4318_s29 }
  0x47   : > { %v509_v31 = vld [vmem:[%s3865_s20 + $0x80] sm:$0xff]  ;;  %1091 = vmatpush1.bf16.msra.mxu0 %v985_v33  ;;  %1133 = vmatprep.subr.bf16.mxu1 %v3361_v29  ;;  %v3329_v39 = vcombine.high %v494_v32, %v510_v35  ;;  %v3328_v43 = vcombine.low %v494_v32, %v510_v35  ;;  %v528_v50 = vld [vmem:[%s3865_s20 + $0x118] sm:$0xff]  ;;  %v997_v53 = vsel %vm983_vm0, %v3394_v46, 0  ;;  %v3363_v55 = vcombine.high %v527_v48, %v543_v49  ;;  %v495_v57 = vld [vmem:[%s3865_s20 + $0x10] sm:$0xff] }
  0x48   : > { %1092 = vmatprep.subr.bf16.mxu0 %v3359_v28  ;;  %v3327_v38 = vcombine.high %v493_v30, %v509_v31  ;;  %v3326_v42 = vcombine.low %v493_v30, %v509_v31  ;;  %v544_v51 = vld [vmem:[%s3865_s20 + $0x198] sm:$0xff]  ;;  %v3890_v52 = vld [vmem:[%s4308_s2] sm:$0x1]  ;;  %v1003_v54 = vsel %vm983_vm0, %v3396_v47, 0  ;;  %v511_v58 = vld [vmem:[%s3865_s20 + $0x90] sm:$0xff]  ;;  %v3362_v61 = vcombine.low %v527_v48, %v543_v49 }
  0x49   : > { %v3365_v56 = vcombine.high %v528_v50, %v544_v51  ;;  %v496_v59 = vld [vmem:[%s3865_s20 + $0x18] sm:$0xff]  ;;  %v3364_v62 = vcombine.low %v528_v50, %v544_v51  ;;  %v3331_v63 = vcombine.high %v495_v57, %v511_v58  ;;  %v561_v1 = vld [vmem:[%s3865_s20 + $0x220] sm:$0x33]  ;;  %v562_v2 = vld [vmem:[%s3865_s20 + $0x228] sm:$0x33]  ;;  %v3330_v3 = vcombine.low %v495_v57, %v511_v58 }
  0x4a   : > { %1134 = vmatpush1.bf16.msra.mxu1 %v3360_v37  ;;  %v512_v60 = vld [vmem:[%s3865_s20 + $0x98] sm:$0xff]  ;;  %v3399_v5 = vcombine.high %v561_v1, %v561_v1  ;;  %v3401_v6 = vcombine.high %v562_v2, %v562_v2  ;;  %v3398_v7 = vcombine.low %v561_v1, %v561_v1  ;;  %v3400_v8 = vcombine.low %v562_v2, %v562_v2  ;;  %v529_v9 = vld [vmem:[%s3865_s20 + $0x120] sm:$0xff]  ;;  %v530_v11 = vld [vmem:[%s3865_s20 + $0x128] sm:$0xff] }
  0x4b   : > { %1093 = vmatpush1.bf16.msra.mxu0 %v3358_v36  ;;  %1135 = vmatprep.subr.bf16.mxu1 %v3329_v39  ;;  %v3333_v0 = vcombine.high %v496_v59, %v512_v60  ;;  %v3332_v4 = vcombine.low %v496_v59, %v512_v60  ;;  %v545_v10 = vld [vmem:[%s3865_s20 + $0x1a0] sm:$0xff]  ;;  %v546_v12 = vld [vmem:[%s3865_s20 + $0x1a8] sm:$0xff]  ;;  %v563_v26 = vld [vmem:[%s3865_s20 + $0x230] sm:$0x33]  ;;  %vm2195_vm2 = vcmask 31744  }
  0x4c   : > { %1094 = vmatprep.subr.bf16.mxu0 %v3327_v38  ;;  %v1009_v13 = vsel %vm983_vm0, %v3398_v7, 0  ;;  %v1015_v14 = vsel %vm983_vm0, %v3400_v8, 0  ;;  %v3367_v15 = vcombine.high %v529_v9, %v545_v10  ;;  %v3369_v17 = vcombine.high %v530_v11, %v546_v12  ;;  %v497_v18 = vld [vmem:[%s3865_s20 + $0x20] sm:$0xff]  ;;  %v498_v20 = vld [vmem:[%s3865_s20 + $0x28] sm:$0xff]  ;;  %v564_v27 = vld [vmem:[%s3865_s20 + $0x238] sm:$0x33] }
  0x4d   : > { %v513_v19 = vld [vmem:[%s3865_s20 + $0xa0] sm:$0xff]  ;;  %v514_v21 = vld [vmem:[%s3865_s20 + $0xa8] sm:$0xff]  ;;  %v3366_v22 = vcombine.low %v529_v9, %v545_v10  ;;  %v3368_v23 = vcombine.low %v530_v11, %v546_v12  ;;  %v3403_v30 = vcombine.high %v563_v26, %v563_v26  ;;  %v3405_v31 = vcombine.high %v564_v27, %v564_v27  ;;  %v531_v34 = vld [vmem:[%s3865_s20 + $0x130] sm:$0xff] }
  0x4e   : > { %1136 = vmatpush1.bf16.msra.mxu1 %v3328_v43  ;;  %v3335_v24 = vcombine.high %v497_v18, %v513_v19  ;;  %v3337_v25 = vcombine.high %v498_v20, %v514_v21  ;;  %v3334_v28 = vcombine.low %v497_v18, %v513_v19  ;;  %v3336_v29 = vcombine.low %v498_v20, %v514_v21  ;;  %v547_v35 = vld [vmem:[%s3865_s20 + $0x1b0] sm:$0xff]  ;;  %v532_v36 = vld [vmem:[%s3865_s20 + $0x138] sm:$0xff]  ;;  %v2045_v38 = vld [vmem:[%s4311_s5] sm:$0x3] }
  0x4f   : > { %1095 = vmatpush1.bf16.msra.mxu0 %v3326_v42  ;;  %3428 = vmatprep.subr.msk.bf16.mxu1 %vm983_vm0, %v3397_v45  ;;  %v3402_v32 = vcombine.low %v563_v26, %v563_v26  ;;  %v3404_v33 = vcombine.low %v564_v27, %v564_v27  ;;  %v548_v37 = vld [vmem:[%s3865_s20 + $0x1b8] sm:$0xff]  ;;  %v3371_v41 = vcombine.high %v531_v34, %v547_v35  ;;  %v499_v43 = vld [vmem:[%s3865_s20 + $0x30] sm:$0xff]  ;;  %v565_v51 = vld [vmem:[%s3865_s20 + $0x240] sm:$0x33] }
  0x50   : > { %3426 = vmatprep.subr.msk.bf16.mxu0 %vm983_vm0, %v3395_v44  ;;  %v3373_v42 = vcombine.high %v532_v36, %v548_v37  ;;  %v515_v44 = vld [vmem:[%s3865_s20 + $0xb0] sm:$0xff]  ;;  %v500_v45 = vld [vmem:[%s3865_s20 + $0x38] sm:$0xff]  ;;  %2048 = vperm.xlu0 %3550, %v2045_v38   ;;  %v3370_v47 = vcombine.low %v531_v34, %v547_v35  ;;  %v3372_v48 = vcombine.low %v532_v36, %v548_v37  ;;  %v533_v60 = vld [vmem:[%s3865_s20 + $0x140] sm:$0xff] }
  0x51   : > { %3425 = vmatmul.mubr.msk.bf16.vlgmr.msra.gmra.mxu1 %vm979_vm1, %v3890_v52  ;;  %v1021_v39 = vsel %vm983_vm0, %v3402_v32, 0  ;;  %v1027_v40 = vsel %vm983_vm0, %v3404_v33, 0  ;;  %v516_v46 = vld [vmem:[%s3865_s20 + $0xb8] sm:$0xff]  ;;  %v3339_v49 = vcombine.high %v499_v43, %v515_v44  ;;  %v3406_v58 = vcombine.low %v565_v51, %v565_v51  ;;  %v518_v7 = vld [vmem:[%s3865_s20 + $0xc8] sm:$0xff]  ;;  %v567_v12 = vld [vmem:[%s3865_s20 + $0x250] sm:$0x33] }
  0x52   : > { %3423 = vmatmul.mubr.msk.bf16.vlgmr.msra.gmra.mxu0 %vm979_vm1, %v3890_v52  ;;  %1214 = vmatpush1.bf16.msra.mxu1 %v1003_v54  ;;  %v3341_v50 = vcombine.high %v500_v45, %v516_v46  ;;  %v3338_v54 = vcombine.low %v499_v43, %v515_v44  ;;  %v3410_v19 = vcombine.low %v567_v12, %v567_v12  ;;  %v535_v21 = vld [vmem:[%s3865_s20 + $0x150] sm:$0xff]  ;;  %v520_v32 = vld [vmem:[%s3865_s20 + $0xd8] sm:$0xff]  ;;  %v569_v37 = vld [vmem:[%s3865_s20 + $0x260] sm:$0x33] }
  0x53   : > { %1173 = vmatpush1.bf16.msra.mxu0 %v997_v53  ;;  %1215 = vmatprep.subr.bf16.mxu1 %v3365_v56  ;;  %v566_v53 = vld [vmem:[%s3865_s20 + $0x248] sm:$0x33]  ;;  %v3407_v56 = vcombine.high %v565_v51, %v565_v51  ;;  %v3414_v43 = vcombine.low %v569_v37, %v569_v37 }
  0x54   : > { %1174 = vmatprep.subr.bf16.mxu0 %v3363_v55  ;;  %1194 = vmatprep.mubr.bf16.mxu0 %v3615_v16  ;;  %v3340_v55 = vcombine.low %v500_v45, %v516_v46  ;;  %v3409_v57 = vcombine.high %v566_v53, %v566_v53  ;;  %v3408_v59 = vcombine.low %v566_v53, %v566_v53  ;;  %v570_v38 = vld [vmem:[%s3865_s20 + $0x268] sm:$0x33]  ;;  %v537_v45 = vld [vmem:[%s3865_s20 + $0x160] sm:$0xff] }
  0x55   : > { %1235 = vmatprep.mubr.bf16.mxu1 %v3615_v16  ;;  %v3416_v44 = vcombine.low %v570_v38, %v570_v38  ;;  %v553_v46 = vld [vmem:[%s3865_s20 + $0x1e0] sm:$0xff] }
  0x56   : > { %1216 = vmatpush1.bf16.msra.mxu1 %v3364_v62  ;;  %v534_v62 = vld [vmem:[%s3865_s20 + $0x148] sm:$0xff]  ;;  %v1039_v1 = vsel %vm983_vm0, %v3408_v59, 0  ;;  %v3383_v51 = vcombine.high %v537_v45, %v553_v46 }
  0x57   : > { %1175 = vmatpush1.bf16.msra.mxu0 %v3362_v61  ;;  %1217 = vmatprep.subr.bf16.mxu1 %v3333_v0  ;;  %v549_v61 = vld [vmem:[%s3865_s20 + $0x1c0] sm:$0xff]  ;;  %v1033_v0 = vsel %vm983_vm0, %v3406_v58, 0  ;;  %v3382_v58 = vcombine.low %v537_v45, %v553_v46 }
  0x58   : > { %1176 = vmatprep.subr.bf16.mxu0 %v3331_v63  ;;  %v550_v63 = vld [vmem:[%s3865_s20 + $0x1c8] sm:$0xff]  ;;  %v3375_v2 = vcombine.high %v533_v60, %v549_v61  ;;  %v3374_v8 = vcombine.low %v533_v60, %v549_v61  ;;  %v1839_v60 = vlaneseq }
  0x59   : > { %v3376_v9 = vcombine.low %v534_v62, %v550_v63 }
  0x5a   : > { %1218 = vmatpush1.bf16.msra.mxu1 %v3332_v4  ;;  %v501_v4 = vld [vmem:[%s3865_s20 + $0x40] sm:$0xff] }
  0x5b   : > { %1177 = vmatpush1.bf16.msra.mxu0 %v3330_v3  ;;  %3432 = vmatprep.subr.msk.bf16.mxu1 %vm983_vm0, %v3401_v6  ;;  %v3377_v3 = vcombine.high %v534_v62, %v550_v63  ;;  %v502_v6 = vld [vmem:[%s3865_s20 + $0x48] sm:$0xff]  ;;  %v571_v63 = vld [vmem:[%s3865_s20 + $0x270] sm:$0x33] }
  0x5c   : > { %3430 = vmatprep.subr.msk.bf16.mxu0 %vm983_vm0, %v3399_v5  ;;  %v517_v5 = vld [vmem:[%s3865_s20 + $0xc0] sm:$0xff]  ;;  %v3345_v11 = vcombine.high %v502_v6, %v518_v7 }
  0x5d   : > { %3429 = vmatmul.mubr.msk.bf16.vlgmr.msra.gmra.mxu1 %vm979_vm1, %v3890_v52  ;;  %v3343_v10 = vcombine.high %v501_v4, %v517_v5 }
  0x5e   : > { %3427 = vmatmul.mubr.msk.bf16.vlgmr.msra.gmra.mxu0 %vm979_vm1, %v3890_v52  ;;  %1296 = vmatpush1.bf16.msra.mxu1 %v1015_v14  ;;  %v3342_v14 = vcombine.low %v501_v4, %v517_v5  ;;  %v3418_v5 = vcombine.low %v571_v63, %v571_v63 }
  0x5f   : > { %1255 = vmatpush1.bf16.msra.mxu0 %v1009_v13  ;;  %1297 = vmatprep.subr.bf16.mxu1 %v3369_v17  ;;  %v568_v13 = vld [vmem:[%s3865_s20 + $0x258] sm:$0x33]  ;;  %v3411_v17 = vcombine.high %v567_v12, %v567_v12 }
  0x60   : > { %1256 = vmatprep.subr.bf16.mxu0 %v3367_v15  ;;  %1276 = vmatprep.mubr.bf16.mxu0 %v3615_v16  ;;  %v3344_v15 = vcombine.low %v502_v6, %v518_v7  ;;  %v3413_v18 = vcombine.high %v568_v13, %v568_v13  ;;  %v3412_v20 = vcombine.low %v568_v13, %v568_v13  ;;  %v4021_v6 = vshrl.u32 %v1839_v60, 7  ;;  %v540_v13 = vld [vmem:[%s3865_s20 + $0x178] sm:$0xff] }
  0x61   : > { %1317 = vmatprep.mubr.bf16.mxu1 %v3615_v16  ;;  %v3419_v7 = vcombine.high %v571_v63, %v571_v63 }
  0x62   : > { %1298 = vmatpush1.bf16.msra.mxu1 %v3368_v23  ;;  %v536_v23 = vld [vmem:[%s3865_s20 + $0x158] sm:$0xff]  ;;  %v1051_v26 = vsel %vm983_vm0, %v3412_v20, 0 }
  0x63   : > { %1257 = vmatpush1.bf16.msra.mxu0 %v3366_v22  ;;  %1299 = vmatprep.subr.bf16.mxu1 %v3337_v25  ;;  %v551_v22 = vld [vmem:[%s3865_s20 + $0x1d0] sm:$0xff]  ;;  %v1045_v25 = vsel %vm983_vm0, %v3410_v19, 0 }
  0x64   : > { %1258 = vmatprep.subr.bf16.mxu0 %v3335_v24  ;;  %v552_v24 = vld [vmem:[%s3865_s20 + $0x1d8] sm:$0xff]  ;;  %v3379_v27 = vcombine.high %v535_v21, %v551_v22  ;;  %v3378_v33 = vcombine.low %v535_v21, %v551_v22  ;;  %v507_v21 = vld [vmem:[%s3865_s20 + $0x70] sm:$0xff] }
  0x65   : > { %v3380_v34 = vcombine.low %v536_v23, %v552_v24  ;;  %v523_v22 = vld [vmem:[%s3865_s20 + $0xf0] sm:$0xff] }
  0x66   : > { %1300 = vmatpush1.bf16.msra.mxu1 %v3336_v29  ;;  %v503_v29 = vld [vmem:[%s3865_s20 + $0x50] sm:$0xff] }
  0x67   : > { %1259 = vmatpush1.bf16.msra.mxu0 %v3334_v28  ;;  %3436 = vmatprep.subr.msk.bf16.mxu1 %vm983_vm0, %v3405_v31  ;;  %v3381_v28 = vcombine.high %v536_v23, %v552_v24  ;;  %v504_v31 = vld [vmem:[%s3865_s20 + $0x58] sm:$0xff] }
  0x68   : > { %3434 = vmatprep.subr.msk.bf16.mxu0 %vm983_vm0, %v3403_v30  ;;  %v519_v30 = vld [vmem:[%s3865_s20 + $0xd0] sm:$0xff]  ;;  %v3349_v36 = vcombine.high %v504_v31, %v520_v32 }
  0x69   : > { %3433 = vmatmul.mubr.msk.bf16.vlgmr.msra.gmra.mxu1 %vm979_vm1, %v3890_v52  ;;  %v3347_v35 = vcombine.high %v503_v29, %v519_v30 }
  0x6a   : > { %3431 = vmatmul.mubr.msk.bf16.vlgmr.msra.gmra.mxu0 %vm979_vm1, %v3890_v52  ;;  %1378 = vmatpush1.bf16.msra.mxu1 %v1027_v40  ;;  %v3348_v40 = vcombine.low %v504_v31, %v520_v32 }
  0x6b   : > { %1337 = vmatpush1.bf16.msra.mxu0 %v1021_v39  ;;  %1379 = vmatprep.subr.bf16.mxu1 %v3373_v42  ;;  %v3346_v39 = vcombine.low %v503_v29, %v519_v30  ;;  %v3417_v42 = vcombine.high %v570_v38, %v570_v38  ;;  %v3355_v30 = vcombine.high %v507_v21, %v523_v22 }
  0x6c   : > { %1338 = vmatprep.subr.bf16.mxu0 %v3371_v41  ;;  %1358 = vmatprep.mubr.bf16.mxu0 %v3615_v16  ;;  %v3415_v41 = vcombine.high %v569_v37, %v569_v37 }
  0x6d   : > { %1399 = vmatprep.mubr.bf16.mxu1 %v3615_v16 }
  0x6e   : > { %1380 = vmatpush1.bf16.msra.mxu1 %v3372_v48  ;;  %v554_v48 = vld [vmem:[%s3865_s20 + $0x1e8] sm:$0xff] }
  0x6f   : > { %1339 = vmatpush1.bf16.msra.mxu0 %v3370_v47  ;;  %1381 = vmatprep.subr.bf16.mxu1 %v3341_v50  ;;  %v538_v47 = vld [vmem:[%s3865_s20 + $0x168] sm:$0xff]  ;;  %v1063_v50 = vsel %vm983_vm0, %v3416_v44, 0 }
  0x70   : > { %1340 = vmatprep.subr.bf16.mxu0 %v3339_v49  ;;  %v1057_v49 = vsel %vm983_vm0, %v3414_v43, 0  ;;  %v3385_v53 = vcombine.high %v538_v47, %v554_v48  ;;  %v3384_v59 = vcombine.low %v538_v47, %v554_v48 }
  0x72   : > { %1382 = vmatpush1.bf16.msra.mxu1 %v3340_v55  ;;  %v521_v55 = vld [vmem:[%s3865_s20 + $0xe0] sm:$0xff] }
  0x73   : > { %1341 = vmatpush1.bf16.msra.mxu0 %v3338_v54  ;;  %3440 = vmatprep.subr.msk.bf16.mxu1 %vm983_vm0, %v3409_v57  ;;  %v505_v54 = vld [vmem:[%s3865_s20 + $0x60] sm:$0xff]  ;;  %v522_v57 = vld [vmem:[%s3865_s20 + $0xe8] sm:$0xff] }
  0x74   : > { %3438 = vmatprep.subr.msk.bf16.mxu0 %vm983_vm0, %v3407_v56  ;;  %v506_v56 = vld [vmem:[%s3865_s20 + $0x68] sm:$0xff]  ;;  %v3351_v61 = vcombine.high %v505_v54, %v521_v55 }
  0x75   : > { %3437 = vmatmul.mubr.msk.bf16.vlgmr.msra.gmra.mxu1 %vm979_vm1, %v3890_v52  ;;  %v3353_v62 = vcombine.high %v506_v56, %v522_v57  ;;  %v3352_v4 = vcombine.low %v506_v56, %v522_v57 }
  0x76   : > { %3435 = vmatmul.mubr.msk.bf16.vlgmr.msra.gmra.mxu0 %vm979_vm1, %v3890_v52  ;;  %1460 = vmatpush1.bf16.msra.mxu1 %v1039_v1 }
  0x77   : > { %1419 = vmatpush1.bf16.msra.mxu0 %v1033_v0  ;;  %1461 = vmatprep.subr.bf16.mxu1 %v3377_v3  ;;  %v3616_v0 = vmov 1983009808   ;;  %v3350_v3 = vcombine.low %v505_v54, %v521_v55 }
  0x78   : > { %1420 = vmatprep.subr.bf16.mxu0 %v3375_v2  ;;  %1440 = vmatprep.mubr.bf16.mxu0 %v3615_v16  ;;  %v2061_v1 = vunpack.c.l.s4 %v3616_v0  ;;  %v572_v2 = vld [vmem:[%s3865_s20 + $0x278] sm:$0x33] }
  0x79   : > { %1481 = vmatprep.mubr.bf16.mxu1 %v3615_v16 }
  0x7a   : > { %1462 = vmatpush1.bf16.msra.mxu1 %v3376_v9  ;;  %v3420_v9 = vcombine.low %v572_v2, %v572_v2  ;;  %v2062_v12 = vunpack.c.0.s8 %v2061_v1 }
  0x7b   : > { %1421 = vmatpush1.bf16.msra.mxu0 %v3374_v8  ;;  %1463 = vmatprep.subr.bf16.mxu1 %v3345_v11  ;;  %v3421_v8 = vcombine.high %v572_v2, %v572_v2  ;;  %v555_v11 = vld [vmem:[%s3865_s20 + $0x1f0] sm:$0xff]  ;;  %v2042_v2 = vld [vmem:[%s4019_s9 + $0x28] sm:$0xff] }
  0x7c   : > { %1422 = vmatprep.subr.bf16.mxu0 %v3343_v10  ;;  %v539_v10 = vld [vmem:[%s3865_s20 + $0x170] sm:$0xff]  ;;  %v1075_v19 = vsel %vm983_vm0, %v3420_v9, 0  ;;  %v4035_v23 = vsub.s32 %v2062_v12, %v4021_v6 }
  0x7e   : > { %1464 = vmatpush1.bf16.msra.mxu1 %v3344_v15  ;;  %v2037_v15 = vld [vmem:[%s4019_s9] sm:$0xff]  ;;  %v2151_v9 = vrot.slane %v2042_v2, %v4035_v23 }
  0x7f   : > { %1423 = vmatpush1.bf16.msra.mxu0 %v3342_v14  ;;  %3444 = vmatprep.subr.msk.bf16.mxu1 %vm983_vm0, %v3413_v18  ;;  %v556_v14 = vld [vmem:[%s3865_s20 + $0x1f8] sm:$0xff]  ;;  %v3387_v18 = vcombine.high %v539_v10, %v555_v11  ;;  %v2059_v24 = vcombine.high %v2037_v15, %v2037_v15  ;;  %v2066_v32 = vrot.slane %v2037_v15, %v4035_v23 }
  0x80   : > { %3442 = vmatprep.subr.msk.bf16.mxu0 %vm983_vm0, %v3411_v17  ;;  %v1069_v17 = vsel %vm983_vm0, %v3418_v5, 0  ;;  %v3389_v20 = vcombine.high %v540_v13, %v556_v14  ;;  %v3388_v29 = vcombine.low %v540_v13, %v556_v14  ;;  %v2159_v14 = vcombine.high %v2151_v9, %v2151_v9 }
  0x81   : > { %3441 = vmatmul.mubr.msk.bf16.vlgmr.msra.gmra.mxu1 %vm979_vm1, %v3890_v52  ;;  %v2074_v37 = vcombine.high %v2066_v32, %v2066_v32 }
  0x82   : > { %3439 = vmatmul.mubr.msk.bf16.vlgmr.msra.gmra.mxu0 %vm979_vm1, %v3890_v52  ;;  %1542 = vmatpush1.bf16.msra.mxu1 %v1051_v26  ;;  %v524_v26 = vld [vmem:[%s3865_s20 + $0xf8] sm:$0xff] }
  0x83   : > { %1501 = vmatpush1.bf16.msra.mxu0 %v1045_v25  ;;  %1543 = vmatprep.subr.bf16.mxu1 %v3381_v28  ;;  %v508_v25 = vld [vmem:[%s3865_s20 + $0x78] sm:$0xff]  ;;  %v3386_v28 = vcombine.low %v539_v10, %v555_v11  ;;  %v2043_v11 = vld [vmem:[%s4019_s9 + $0x30] sm:$0xff] }
  0x84   : > { %1502 = vmatprep.subr.bf16.mxu0 %v3379_v27  ;;  %1522 = vmatprep.mubr.bf16.mxu0 %v3615_v16  ;;  %v2038_v27 = vld [vmem:[%s4019_s9 + $0x8] sm:$0xff]  ;;  %v3357_v31 = vcombine.high %v508_v25, %v524_v26 }
  0x85   : > { %1563 = vmatprep.mubr.bf16.mxu1 %v3615_v16 }
  0x86   : > { %1544 = vmatpush1.bf16.msra.mxu1 %v3380_v34  ;;  %v2076_v34 = vcombine.high %v2038_v27, %v2038_v27 }
  0x87   : > { %1503 = vmatpush1.bf16.msra.mxu0 %v3378_v33  ;;  %1545 = vmatprep.subr.bf16.mxu1 %v3349_v36  ;;  %v2073_v33 = vrot.slane %v2059_v24, %v4035_v23  ;;  %v3356_v36 = vcombine.low %v508_v25, %v524_v26 }
  0x88   : > { %1504 = vmatprep.subr.bf16.mxu0 %v3347_v35  ;;  %v3354_v35 = vcombine.low %v507_v21, %v523_v22  ;;  %v2260_v21 = vsel %vm983_vm0, %v2151_v9, 0 }
  0x89   : > { %v2075_v38 = vcombine.high %v2073_v33, %v2073_v33  ;;  %v2206_v43 = vsel %vm983_vm0, %v2073_v33, 0 }
  0x8a   : > { %1546 = vmatpush1.bf16.msra.mxu1 %v3348_v40  ;;  %v2090_v40 = vrot.slane %v2076_v34, %v4035_v23 }
  0x8b   : > { %1505 = vmatpush1.bf16.msra.mxu0 %v3346_v39  ;;  %3448 = vmatprep.subr.msk.bf16.mxu1 %vm983_vm0, %v3417_v42  ;;  %v2083_v39 = vrot.slane %v2038_v27, %v4035_v23  ;;  %v2200_v42 = vsel %vm983_vm0, %v2066_v32, 0 }
  0x8c   : > { %3446 = vmatprep.subr.msk.bf16.mxu0 %vm983_vm0, %v3415_v41  ;;  %v2039_v41 = vld [vmem:[%s4019_s9 + $0x10] sm:$0xff]  ;;  %v2092_v45 = vcombine.high %v2090_v40, %v2090_v40 }
  0x8d   : > { %3445 = vmatmul.mubr.msk.bf16.vlgmr.msra.gmra.mxu1 %vm979_vm1, %v3890_v52  ;;  %v2091_v44 = vcombine.high %v2083_v39, %v2083_v39  ;;  %v2093_v46 = vcombine.high %v2039_v41, %v2039_v41  ;;  %v2100_v47 = vrot.slane %v2039_v41, %v4035_v23 }
  0x8e   : > { %3443 = vmatmul.mubr.msk.bf16.vlgmr.msra.gmra.mxu0 %vm979_vm1, %v3890_v52  ;;  %1624 = vmatpush1.bf16.msra.mxu1 %v1063_v50  ;;  %v4069_v50 = vld [vmem:[%s4310_s4] sm:$0x1] }
  0x8f   : > { %1583 = vmatpush1.bf16.msra.mxu0 %v1057_v49  ;;  %1625 = vmatprep.subr.bf16.mxu1 %v3385_v53  ;;  %v2107_v48 = vrot.slane %v2093_v46, %v4035_v23  ;;  %v2040_v49 = vld [vmem:[%s4019_s9 + $0x18] sm:$0xff]  ;;  %v2108_v53 = vcombine.high %v2100_v47, %v2100_v47 }
  0x90   : > { %1584 = vmatprep.subr.bf16.mxu0 %v3383_v51  ;;  %1604 = vmatprep.mubr.bf16.mxu0 %v3615_v16  ;;  %v2218_v51 = vsel %vm983_vm0, %v2090_v40, 0  ;;  %v2110_v55 = vcombine.high %v2040_v49, %v2040_v49  ;;  %v2117_v56 = vrot.slane %v2040_v49, %v4035_v23 }
  0x91   : > { %1645 = vmatprep.mubr.bf16.mxu1 %v3615_v16  ;;  %v2109_v54 = vcombine.high %v2107_v48, %v2107_v48  ;;  %v2230_v60 = vsel %vm983_vm0, %v2107_v48, 0 }
  0x92   : > { %1626 = vmatpush1.bf16.msra.mxu1 %v3384_v59  ;;  %v2124_v57 = vrot.slane %v2110_v55, %v4035_v23  ;;  %v2224_v59 = vsel %vm983_vm0, %v2100_v47, 0 }
  0x93   : > { %1585 = vmatpush1.bf16.msra.mxu0 %v3382_v58  ;;  %1627 = vmatprep.subr.bf16.mxu1 %v3353_v62  ;;  %v2041_v58 = vld [vmem:[%s4019_s9 + $0x20] sm:$0xff] }
  0x94   : > { %1586 = vmatprep.subr.bf16.mxu0 %v3351_v61  ;;  %v2125_v61 = vcombine.high %v2117_v56, %v2117_v56  ;;  %v2126_v62 = vcombine.high %v2124_v57, %v2124_v57  ;;  %v2127_v63 = vcombine.high %v2041_v58, %v2041_v58  ;;  %v2134_v0 = vrot.slane %v2041_v58, %v4035_v23 }
  0x96   : > { %1628 = vmatpush1.bf16.msra.mxu1 %v3352_v4  ;;  %v2141_v1 = vrot.slane %v2127_v63, %v4035_v23  ;;  %v2242_v4 = vsel %vm983_vm0, %v2124_v57, 0  ;;  %v2142_v5 = vcombine.high %v2134_v0, %v2134_v0  ;;  %v2248_v12 = vsel %vm983_vm0, %v2134_v0, 0 }
  0x97   : > { %1587 = vmatpush1.bf16.msra.mxu0 %v3350_v3  ;;  %3452 = vmatprep.subr.msk.bf16.mxu1 %vm983_vm0, %v3421_v8  ;;  %v2236_v3 = vsel %vm983_vm0, %v2117_v56, 0  ;;  %v2144_v8 = vcombine.high %v2042_v2, %v2042_v2 }
  0x98   : > { %3450 = vmatprep.subr.msk.bf16.mxu0 %vm983_vm0, %v3419_v7  ;;  %v2143_v7 = vcombine.high %v2141_v1, %v2141_v1  ;;  %v2254_v13 = vsel %vm983_vm0, %v2141_v1, 0 }
  0x99   : > { %3449 = vmatmul.mubr.msk.bf16.vlgmr.msra.gmra.mxu1 %vm979_vm1, %v3890_v52  ;;  %v2158_v10 = vrot.slane %v2144_v8, %v4035_v23 }
  0x9a   : > { %3447 = vmatmul.mubr.msk.bf16.vlgmr.msra.gmra.mxu0 %vm979_vm1, %v3890_v52  ;;  %1706 = vmatpush1.bf16.msra.mxu1 %v1075_v19 }
  0x9b   : > { %1665 = vmatpush1.bf16.msra.mxu0 %v1069_v17  ;;  %1707 = vmatprep.subr.bf16.mxu1 %v3389_v20  ;;  %v2160_v15 = vcombine.high %v2158_v10, %v2158_v10  ;;  %v2161_v17 = vcombine.high %v2043_v11, %v2043_v11  ;;  %v2044_v20 = vld [vmem:[%s4019_s9 + $0x38] sm:$0xff]  ;;  %v2266_v22 = vsel %vm983_vm0, %v2158_v10, 0 }
  0x9c   : > { %1666 = vmatprep.subr.bf16.mxu0 %v3387_v18  ;;  %1686 = vmatprep.mubr.bf16.mxu0 %v3615_v16  ;;  %v2168_v18 = vrot.slane %v2043_v11, %v4035_v23  ;;  %v2178_v26 = vcombine.high %v2044_v20, %v2044_v20  ;;  %v2185_v27 = vrot.slane %v2044_v20, %v4035_v23 }
  0x9d   : > { %1727 = vmatprep.mubr.bf16.mxu1 %v3615_v16  ;;  %v2175_v19 = vrot.slane %v2161_v17, %v4035_v23 }
  0x9e   : > { %1708 = vmatpush1.bf16.msra.mxu1 %v3388_v29  ;;  %v2176_v24 = vcombine.high %v2168_v18, %v2168_v18  ;;  %v2272_v29 = vsel %vm983_vm0, %v2168_v18, 0 }
  0x9f   : > { %1667 = vmatpush1.bf16.msra.mxu0 %v3386_v28  ;;  %1709 = vmatprep.subr.bf16.mxu1 %v3357_v31  ;;  %v2177_v25 = vcombine.high %v2175_v19, %v2175_v19  ;;  %v2192_v28 = vrot.slane %v2178_v26, %v4035_v23  ;;  %v2193_v31 = vcombine.high %v2185_v27, %v2185_v27  ;;  %v2284_v23 = vsel %vm983_vm0, %v2185_v27, 0 }
  0xa0   : > { %1668 = vmatprep.subr.bf16.mxu0 %v3355_v30  ;;  %v2278_v30 = vsel %vm983_vm0, %v2175_v19, 0 }
  0xa1   : > { %v2194_v32 = vcombine.high %v2192_v28, %v2192_v28  ;;  %v2290_v33 = vsel %vm983_vm0, %v2192_v28, 0 }
  0xa2   : > { %1710 = vmatpush1.bf16.msra.mxu1 %v3356_v36 }
  0xa3   : > { %1669 = vmatpush1.bf16.msra.mxu0 %v3354_v35  ;;  %3472 = vmatprep.subr.msk.bf16.mxu1 %vm983_vm0, %v2075_v38 }
  0xa4   : > { %3470 = vmatprep.subr.msk.bf16.mxu0 %vm983_vm0, %v2074_v37 }
  0xa5   : > { %3453 = vmatmul.mubr.msk.bf16.vlgmr.msra.gmra.mxu1 %vm979_vm1, %v3890_v52 }
  0xa6   : > { %3451 = vmatmul.mubr.msk.bf16.vlgmr.msra.gmra.mxu0 %vm979_vm1, %v3890_v52  ;;  %2351 = vmatpush1.bf16.msra.mxu1 %v2206_v43  ;;  %v2212_v52 = vsel %vm983_vm0, %v2083_v39, 0  ;;  %v3617_v39 = vmov 1966171168  }
  0xa7   : > { %2310 = vmatpush1.bf16.msra.mxu0 %v2200_v42  ;;  %2327 = vmatprep.mubr.bf16.mxu0 %v3615_v16  ;;  %v1837_v40 = vunpack.c.l.s4 %v3617_v39 }
  0xa8   : > { %2368 = vmatprep.mubr.bf16.mxu1 %v3615_v16  ;;  %3474 = vmatprep.subr.msk.bf16.mxu0 %vm983_vm0, %v2091_v44 }
  0xa9   : > { %3476 = vmatprep.subr.msk.bf16.mxu1 %vm983_vm0, %v2092_v45  ;;  %v1838_v48 = vunpack.c.0.s8 %v1837_v40 }
  0xad   : > { %3473 = vmatmul.mubr.msk.bf16.vlgmr.msra.gmra.mxu1 %vm2195_vm2, %v4069_v50 }
  0xae   : > { %3471 = vmatmul.mubr.msk.bf16.vlgmr.msra.gmra.mxu0 %vm2195_vm2, %v4069_v50  ;;  %2433 = vmatpush1.bf16.msra.mxu1 %v2218_v51 }
  0xaf   : > { %2392 = vmatpush1.bf16.msra.mxu0 %v2212_v52  ;;  %2409 = vmatprep.mubr.bf16.mxu0 %v3615_v16 }
  0xb0   : > { %2450 = vmatprep.mubr.bf16.mxu1 %v3615_v16  ;;  %3478 = vmatprep.subr.msk.bf16.mxu0 %vm983_vm0, %v2108_v53  ;;  %v4164_v53 = vsub.s32 %v1838_v48, %v4021_v6 }
  0xb1   : > { %3480 = vmatprep.subr.msk.bf16.mxu1 %vm983_vm0, %v2109_v54 }
  0xb5   : > { %3477 = vmatmul.mubr.msk.bf16.vlgmr.msra.gmra.mxu1 %vm2195_vm2, %v4069_v50 }
  0xb6   : > { %3475 = vmatmul.mubr.msk.bf16.vlgmr.msra.gmra.mxu0 %vm2195_vm2, %v4069_v50  ;;  %2515 = vmatpush1.bf16.msra.mxu1 %v2230_v60 }
  0xb7   : > { %2474 = vmatpush1.bf16.msra.mxu0 %v2224_v59  ;;  %2491 = vmatprep.mubr.bf16.mxu0 %v3615_v16 }
  0xb8   : > { %2532 = vmatprep.mubr.bf16.mxu1 %v3615_v16  ;;  %3482 = vmatprep.subr.msk.bf16.mxu0 %vm983_vm0, %v2125_v61 }
  0xb9   : > { %3484 = vmatprep.subr.msk.bf16.mxu1 %vm983_vm0, %v2126_v62 }
  0xbd   : > { %3481 = vmatmul.mubr.msk.bf16.vlgmr.msra.gmra.mxu1 %vm2195_vm2, %v4069_v50 }
  0xbe   : > { %3479 = vmatmul.mubr.msk.bf16.vlgmr.msra.gmra.mxu0 %vm2195_vm2, %v4069_v50  ;;  %2597 = vmatpush1.bf16.msra.mxu1 %v2242_v4 }
  0xbf   : > { %2556 = vmatpush1.bf16.msra.mxu0 %v2236_v3  ;;  %2573 = vmatprep.mubr.bf16.mxu0 %v3615_v16 }
  0xc0   : > { %2614 = vmatprep.mubr.bf16.mxu1 %v3615_v16  ;;  %3486 = vmatprep.subr.msk.bf16.mxu0 %vm983_vm0, %v2142_v5  ;;  %v4157_v36 = vpop.permute.xlu0 %576 }
  0xc1   : > { %3488 = vmatprep.subr.msk.bf16.mxu1 %vm983_vm0, %v2143_v7 }
  0xc5   : > { %3485 = vmatmul.mubr.msk.bf16.vlgmr.msra.gmra.mxu1 %vm2195_vm2, %v4069_v50 }
  0xc6   : > { %3483 = vmatmul.mubr.msk.bf16.vlgmr.msra.gmra.mxu0 %vm2195_vm2, %v4069_v50  ;;  %2679 = vmatpush1.bf16.msra.mxu1 %v2254_v13 }
  0xc7   : > { %2638 = vmatpush1.bf16.msra.mxu0 %v2248_v12  ;;  %2655 = vmatprep.mubr.bf16.mxu0 %v3615_v16 }
  0xc8   : > { %2696 = vmatprep.mubr.bf16.mxu1 %v3615_v16  ;;  %3490 = vmatprep.subr.msk.bf16.mxu0 %vm983_vm0, %v2159_v14 }
  0xc9   : > { %3492 = vmatprep.subr.msk.bf16.mxu1 %vm983_vm0, %v2160_v15 }
  0xcd   : > { %3489 = vmatmul.mubr.msk.bf16.vlgmr.msra.gmra.mxu1 %vm2195_vm2, %v4069_v50 }
  0xce   : > { %3487 = vmatmul.mubr.msk.bf16.vlgmr.msra.gmra.mxu0 %vm2195_vm2, %v4069_v50  ;;  %2761 = vmatpush1.bf16.msra.mxu1 %v2266_v22 }
  0xcf   : > { %2720 = vmatpush1.bf16.msra.mxu0 %v2260_v21  ;;  %2737 = vmatprep.mubr.bf16.mxu0 %v3615_v16 }
  0xd0   : > { %2778 = vmatprep.mubr.bf16.mxu1 %v3615_v16  ;;  %3494 = vmatprep.subr.msk.bf16.mxu0 %vm983_vm0, %v2176_v24 }
  0xd1   : > { %3496 = vmatprep.subr.msk.bf16.mxu1 %vm983_vm0, %v2177_v25 }
  0xd5   : > { %3493 = vmatmul.mubr.msk.bf16.vlgmr.msra.gmra.mxu1 %vm2195_vm2, %v4069_v50 }
  0xd6   : > { %3491 = vmatmul.mubr.msk.bf16.vlgmr.msra.gmra.mxu0 %vm2195_vm2, %v4069_v50  ;;  %2843 = vmatpush1.bf16.msra.mxu1 %v2278_v30 }
  0xd7   : > { %2802 = vmatpush1.bf16.msra.mxu0 %v2272_v29  ;;  %2819 = vmatprep.mubr.bf16.mxu0 %v3615_v16 }
  0xd8   : > { %2860 = vmatprep.mubr.bf16.mxu1 %v3615_v16  ;;  %3498 = vmatprep.subr.msk.bf16.mxu0 %vm983_vm0, %v2193_v31 }
  0xd9   : > { %3500 = vmatprep.subr.msk.bf16.mxu1 %vm983_vm0, %v2194_v32 }
  0xdd   : > { %3497 = vmatmul.mubr.msk.bf16.vlgmr.msra.gmra.mxu1 %vm2195_vm2, %v4069_v50 }
  0xde   : > { %3495 = vmatmul.mubr.msk.bf16.vlgmr.msra.gmra.mxu0 %vm2195_vm2, %v4069_v50  ;;  %2925 = vmatpush1.bf16.msra.mxu1 %v2290_v33 }
  0xdf   : > { %2884 = vmatpush1.bf16.msra.mxu0 %v2284_v23  ;;  %2901 = vmatprep.mubr.bf16.mxu0 %v3615_v16 }
  0xe0   : > { %2942 = vmatprep.mubr.bf16.mxu1 %v3615_v16 }
  0xe5   : > { %3501 = vmatmul.mubr.msk.bf16.vlgmr.msra.gmra.mxu1 %vm2195_vm2, %v4069_v50 }
  0xe6   : > { %3499 = vmatmul.mubr.msk.bf16.vlgmr.msra.gmra.mxu0 %vm2195_vm2, %v4069_v50 }
 0x111   : > { %v1155_v35 = vpop.f32.mrf.mxu1 }
 0x112   : > { %v1114_v34 = vpop.f32.mrf.mxu0  ;;  %v1156_v44 = vadd.f32 %v1155_v35, %v4157_v36 }
 0x113   : > { %v1157_v38 = vpop.f32.mrf.mxu1  ;;  %v1115_v43 = vadd.f32 %v1114_v34, %v4157_v36 }
 0x114   : > { %v1116_v37 = vpop.f32.mrf.mxu0  ;;  %v1158_v45 = vadd.f32 %v1157_v38, %v4157_v36  ;;  %v1738_v52 = vmax.f32 %v1156_v44, 0.0 }
 0x115   : > { %v1159_v42 = vpop.f32.mrf.mxu1  ;;  %v1117_v16 = vadd.f32 %v1116_v37, %v4157_v36  ;;  %v1736_v49 = vmax.f32 %v1115_v43, 0.0 }
 0x116   : > { %v1118_v41 = vpop.f32.mrf.mxu0  ;;  %v1739_v51 = vmax.f32 %v1158_v45, 0.0 }
 0x117   : > { %v1160_v47 = vpop.f32.mrf.mxu1  ;;  %v1737_v50 = vmax.f32 %v1117_v16, 0.0 }
 0x118   : > { %v1119_v46 = vpop.f32.mrf.mxu0  ;;  %v3455_v57 = vpack.c.bf16 %v1739_v51, %v1738_v52 }
 0x119   : > { %v3454_v56 = vpack.c.bf16 %v1737_v50, %v1736_v49 }
 0x11a   : > { %v1849_v4 = vrot.slane %v3455_v57, %v4164_v53 }
 0x11b   : > { %v1842_v6 = vrot.slane %v3454_v56, %v4164_v53 }
 0x11d   : > { %v1237_v55 = vpop.f32.mrf.mxu1  ;;  %v1864_v12 = vcombine.low %v1842_v6, %v1849_v4 }
 0x11e   : > { %v1196_v54 = vpop.f32.mrf.mxu0  ;;  %v1238_v59 = vadd.f32 %v1237_v55, %v4157_v36 }
 0x11f   : > { %v1197_v58 = vadd.f32 %v1196_v54, %v4157_v36  ;;  %v1239_v61 = vpop.f32.mrf.mxu1  ;;  %v1872_v19 = vrot.slane %v1864_v12, %v4164_v53 }
 0x120   : > { %v1198_v60 = vpop.f32.mrf.mxu0  ;;  %v1742_v63 = vmax.f32 %v1238_v59, 0.0  ;;  %v1240_v1 = vadd.f32 %v1239_v61, %v4157_v36 }
 0x121   : > { %v1740_v62 = vmax.f32 %v1197_v58, 0.0  ;;  %v1199_v0 = vadd.f32 %v1198_v60, %v4157_v36  ;;  %v1241_v3 = vpop.f32.mrf.mxu1 }
 0x122   : > { %v1200_v2 = vpop.f32.mrf.mxu0  ;;  %v1743_v7 = vmax.f32 %v1240_v1, 0.0 }
 0x123   : > { %v1741_v5 = vmax.f32 %v1199_v0, 0.0  ;;  %v1242_v9 = vpop.f32.mrf.mxu1 }
 0x124   : > { %v1201_v8 = vpop.f32.mrf.mxu0  ;;  %v3457_v11 = vpack.c.bf16 %v1743_v7, %v1742_v63 }
 0x125   : > { %v3456_v10 = vpack.c.bf16 %v1741_v5, %v1740_v62 }
 0x126   : > { %v1863_v14 = vrot.slane %v3457_v11, %v4164_v53 }
 0x127   : > { %v1856_v13 = vrot.slane %v3456_v10, %v4164_v53 }
 0x129   : > { %v1865_v15 = vcombine.low %v1856_v13, %v1863_v14  ;;  %v1319_v18 = vpop.f32.mrf.mxu1 }
 0x12a   : > { %v1278_v17 = vpop.f32.mrf.mxu0  ;;  %v1320_v28 = vadd.f32 %v1319_v18, %v4157_v36 }
 0x12b   : > { %v1879_v20 = vrot.slane %v1865_v15, %v4164_v53  ;;  %v1321_v22 = vpop.f32.mrf.mxu1  ;;  %v1279_v27 = vadd.f32 %v1278_v17, %v4157_v36 }
 0x12c   : > { %v1280_v21 = vpop.f32.mrf.mxu0  ;;  %v1322_v30 = vadd.f32 %v1321_v22, %v4157_v36  ;;  %v1746_v33 = vmax.f32 %v1320_v28, 0.0 }
 0x12d   : > { %v1880_v24 = vcombine.low %v1872_v19, %v1879_v20  ;;  %v1323_v26 = vpop.f32.mrf.mxu1  ;;  %v1281_v29 = vadd.f32 %v1280_v21, %v4157_v36  ;;  %v1744_v23 = vmax.f32 %v1279_v27, 0.0 }
 0x12e   : > { %v1282_v25 = vpop.f32.mrf.mxu0  ;;  %v1747_v35 = vmax.f32 %v1322_v30, 0.0 }
 0x12f   : > { %2032 = vst [vmem:[%s4180_s14] sm:$0xff] %v1880_v24  ;;  %v1324_v32 = vpop.f32.mrf.mxu1  ;;  %v1745_v34 = vmax.f32 %v1281_v29, 0.0 }
 0x130   : > { %v1283_v31 = vpop.f32.mrf.mxu0  ;;  %v3459_v40 = vpack.c.bf16 %v1747_v35, %v1746_v33 }
 0x131   : > { %v3458_v39 = vpack.c.bf16 %v1745_v34, %v1744_v23 }
 0x132   : > { %v1898_v52 = vrot.slane %v3459_v40, %v4164_v53 }
 0x133   : > { %v1891_v50 = vrot.slane %v3458_v39, %v4164_v53 }
 0x135   : > { %v1401_v38 = vpop.f32.mrf.mxu1  ;;  %v1913_v59 = vcombine.low %v1891_v50, %v1898_v52 }
 0x136   : > { %v1360_v37 = vpop.f32.mrf.mxu0  ;;  %v1402_v42 = vadd.f32 %v1401_v38, %v4157_v36 }
 0x137   : > { %v1361_v41 = vadd.f32 %v1360_v37, %v4157_v36  ;;  %v1403_v16 = vpop.f32.mrf.mxu1  ;;  %v1921_v1 = vrot.slane %v1913_v59, %v4164_v53 }
 0x138   : > { %v1362_v43 = vpop.f32.mrf.mxu0  ;;  %v1750_v45 = vmax.f32 %v1402_v42, 0.0  ;;  %v1404_v47 = vadd.f32 %v1403_v16, %v4157_v36 }
 0x139   : > { %v1748_v44 = vmax.f32 %v1361_v41, 0.0  ;;  %v1363_v46 = vadd.f32 %v1362_v43, %v4157_v36  ;;  %v1405_v49 = vpop.f32.mrf.mxu1 }
 0x13a   : > { %v1364_v48 = vpop.f32.mrf.mxu0  ;;  %v1751_v54 = vmax.f32 %v1404_v47, 0.0 }
 0x13b   : > { %v1749_v51 = vmax.f32 %v1363_v46, 0.0  ;;  %v1406_v56 = vpop.f32.mrf.mxu1 }
 0x13c   : > { %v1365_v55 = vpop.f32.mrf.mxu0  ;;  %v3461_v58 = vpack.c.bf16 %v1751_v54, %v1750_v45 }
 0x13d   : > { %v3460_v57 = vpack.c.bf16 %v1749_v51, %v1748_v44 }
 0x13e   : > { %v1912_v61 = vrot.slane %v3461_v58, %v4164_v53 }
 0x13f   : > { %v1905_v60 = vrot.slane %v3460_v57, %v4164_v53 }
 0x141   : > { %v1914_v62 = vcombine.low %v1905_v60, %v1912_v61  ;;  %v1483_v0 = vpop.f32.mrf.mxu1 }
 0x142   : > { %v1442_v63 = vpop.f32.mrf.mxu0  ;;  %v1484_v9 = vadd.f32 %v1483_v0, %v4157_v36 }
 0x143   : > { %v1928_v2 = vrot.slane %v1914_v62, %v4164_v53  ;;  %v1485_v6 = vpop.f32.mrf.mxu1  ;;  %v1443_v8 = vadd.f32 %v1442_v63, %v4157_v36 }
 0x144   : > { %v1444_v3 = vpop.f32.mrf.mxu0  ;;  %v1486_v11 = vadd.f32 %v1485_v6, %v4157_v36  ;;  %v1754_v15 = vmax.f32 %v1484_v9, 0.0 }
 0x145   : > { %v1929_v4 = vcombine.low %v1921_v1, %v1928_v2  ;;  %v1487_v7 = vpop.f32.mrf.mxu1  ;;  %v1445_v10 = vadd.f32 %v1444_v3, %v4157_v36  ;;  %v1752_v14 = vmax.f32 %v1443_v8, 0.0 }
 0x146   : > { %v1446_v5 = vpop.f32.mrf.mxu0  ;;  %v1755_v18 = vmax.f32 %v1486_v11, 0.0 }
 0x147   : > { %2033 = vst [vmem:[%s4180_s14 + $0x8] sm:$0xff] %v1929_v4  ;;  %v1488_v13 = vpop.f32.mrf.mxu1  ;;  %v1753_v17 = vmax.f32 %v1445_v10, 0.0 }
 0x148   : > { %v1447_v12 = vpop.f32.mrf.mxu0  ;;  %v3463_v22 = vpack.c.bf16 %v1755_v18, %v1754_v15 }
 0x149   : > { %v3462_v21 = vpack.c.bf16 %v1753_v17, %v1752_v14 }
 0x14a   : > { %v1947_v34 = vrot.slane %v3463_v22, %v4164_v53 }
 0x14b   : > { %v1940_v33 = vrot.slane %v3462_v21, %v4164_v53 }
 0x14d   : > { %v1565_v20 = vpop.f32.mrf.mxu1  ;;  %v1962_v42 = vcombine.low %v1940_v33, %v1947_v34 }
 0x14e   : > { %v1524_v19 = vpop.f32.mrf.mxu0  ;;  %v1566_v25 = vadd.f32 %v1565_v20, %v4157_v36 }
 0x14f   : > { %v1525_v24 = vadd.f32 %v1524_v19, %v4157_v36  ;;  %v1567_v27 = vpop.f32.mrf.mxu1  ;;  %v1970_v47 = vrot.slane %v1962_v42, %v4164_v53 }
 0x150   : > { %v1526_v26 = vpop.f32.mrf.mxu0  ;;  %v1758_v29 = vmax.f32 %v1566_v25, 0.0  ;;  %v1568_v31 = vadd.f32 %v1567_v27, %v4157_v36 }
 0x151   : > { %v1756_v28 = vmax.f32 %v1525_v24, 0.0  ;;  %v1527_v30 = vadd.f32 %v1526_v26, %v4157_v36  ;;  %v1569_v23 = vpop.f32.mrf.mxu1 }
 0x152   : > { %v1528_v32 = vpop.f32.mrf.mxu0  ;;  %v1759_v37 = vmax.f32 %v1568_v31, 0.0 }
 0x153   : > { %v1757_v35 = vmax.f32 %v1527_v30, 0.0  ;;  %v1570_v39 = vpop.f32.mrf.mxu1 }
 0x154   : > { %v1529_v38 = vpop.f32.mrf.mxu0  ;;  %v3465_v41 = vpack.c.bf16 %v1759_v37, %v1758_v29  ;;  %v4225_v29 = vpop.permute.xlu0 %2048 }
 0x155   : > { %v3464_v40 = vpack.c.bf16 %v1757_v35, %v1756_v28 }
 0x156   : > { %v1961_v16 = vrot.slane %v3465_v41, %v4164_v53 }
 0x157   : > { %v1954_v43 = vrot.slane %v3464_v40, %v4164_v53 }
 0x159   : > { %v1963_v44 = vcombine.low %v1954_v43, %v1961_v16  ;;  %v1647_v46 = vpop.f32.mrf.mxu1 }
 0x15a   : > { %v1606_v45 = vpop.f32.mrf.mxu0  ;;  %v1648_v54 = vadd.f32 %v1647_v46, %v4157_v36 }
 0x15b   : > { %v1977_v48 = vrot.slane %v1963_v44, %v4164_v53  ;;  %v1649_v50 = vpop.f32.mrf.mxu1  ;;  %v1607_v51 = vadd.f32 %v1606_v45, %v4157_v36 }
 0x15c   : > { %v1608_v49 = vpop.f32.mrf.mxu0  ;;  %v1650_v56 = vadd.f32 %v1649_v50, %v4157_v36  ;;  %v1762_v62 = vmax.f32 %v1648_v54, 0.0 }
 0x15d   : > { %v1978_v52 = vcombine.low %v1970_v47, %v1977_v48  ;;  %v1609_v55 = vadd.f32 %v1608_v49, %v4157_v36  ;;  %v1651_v58 = vpop.f32.mrf.mxu1  ;;  %v1760_v61 = vmax.f32 %v1607_v51, 0.0 }
 0x15e   : > { %v1610_v57 = vpop.f32.mrf.mxu0  ;;  %v1763_v0 = vmax.f32 %v1650_v56, 0.0 }
 0x15f   : > { %2034 = vst [vmem:[%s4180_s14 + $0x10] sm:$0xff] %v1978_v52  ;;  %v1652_v60 = vpop.f32.mrf.mxu1  ;;  %v1761_v63 = vmax.f32 %v1609_v55, 0.0 }
 0x160   : > { %v1611_v59 = vpop.f32.mrf.mxu0  ;;  %v3467_v2 = vpack.c.bf16 %v1763_v0, %v1762_v62 }
 0x161   : > { %v3466_v1 = vpack.c.bf16 %v1761_v63, %v1760_v61 }
 0x162   : > { %v1996_v12 = vrot.slane %v3467_v2, %v4164_v53 }
 0x163   : > { %v1989_v11 = vrot.slane %v3466_v1, %v4164_v53 }
 0x165   : > { %v1729_v6 = vpop.f32.mrf.mxu1  ;;  %v2011_v27 = vcombine.low %v1989_v11, %v1996_v12 }
 0x166   : > { %v1688_v3 = vpop.f32.mrf.mxu0  ;;  %v1730_v5 = vadd.f32 %v1729_v6, %v4157_v36 }
 0x167   : > { %v1689_v4 = vadd.f32 %v1688_v3, %v4157_v36  ;;  %v1731_v8 = vpop.f32.mrf.mxu1  ;;  %v2019_v39 = vrot.slane %v2011_v27, %v4164_v53 }
 0x168   : > { %v1690_v7 = vpop.f32.mrf.mxu0  ;;  %v1732_v10 = vadd.f32 %v1731_v8, %v4157_v36  ;;  %v1766_v17 = vmax.f32 %v1730_v5, 0.0 }
 0x169   : > { %v1691_v9 = vadd.f32 %v1690_v7, %v4157_v36  ;;  %v1733_v14 = vpop.f32.mrf.mxu1  ;;  %v1764_v15 = vmax.f32 %v1689_v4, 0.0 }
 0x16a   : > { %v1692_v13 = vpop.f32.mrf.mxu0  ;;  %v1767_v19 = vmax.f32 %v1732_v10, 0.0 }
 0x16b   : > { %v1765_v18 = vmax.f32 %v1691_v9, 0.0  ;;  %v1734_v21 = vpop.f32.mrf.mxu1 }
 0x16c   : > { %v1693_v20 = vpop.f32.mrf.mxu0  ;;  %v3469_v24 = vpack.c.bf16 %v1767_v19, %v1766_v17 }
 0x16d   : > { %v3468_v22 = vpack.c.bf16 %v1765_v18, %v1764_v15  ;;  %v2370_v26 = vpop.f32.mrf.mxu1 }
 0x16e   : > { %v2329_v25 = vpop.f32.mrf.mxu0  ;;  %v2010_v36 = vrot.slane %v3469_v24, %v4164_v53  ;;  %v2371_v35 = vadd.f32 %v2370_v26, %v4225_v29 }
 0x16f   : > { %v2003_v28 = vrot.slane %v3468_v22, %v4164_v53  ;;  %v2372_v31 = vpop.f32.mrf.mxu1  ;;  %v2330_v34 = vadd.f32 %v2329_v25, %v4225_v29 }
 0x170   : > { %v2331_v30 = vpop.f32.mrf.mxu0  ;;  %v2373_v33 = vadd.f32 %v2372_v31, %v4225_v29 }
 0x171   : > { %v2012_v32 = vcombine.low %v2003_v28, %v2010_v36  ;;  %v2332_v23 = vadd.f32 %v2331_v30, %v4225_v29  ;;  %v2374_v38 = vpop.f32.mrf.mxu1 }
 0x172   : > { %v2333_v37 = vpop.f32.mrf.mxu0  ;;  %v3503_v42 = vpack.c.bf16 %v2373_v33, %v2371_v35 }
 0x173   : > { %v2026_v40 = vrot.slane %v2012_v32, %v4164_v53  ;;  %v3502_v41 = vpack.c.bf16 %v2332_v23, %v2330_v34  ;;  %v2375_v16 = vpop.f32.mrf.mxu1 }
 0x174   : > { %v2334_v43 = vpop.f32.mrf.mxu0  ;;  %v3032_v48 = vrot.slane %v3503_v42, %v4164_v53 }
 0x175   : > { %v2027_v44 = vcombine.low %v2019_v39, %v2026_v40  ;;  %v2452_v46 = vpop.f32.mrf.mxu1  ;;  %v3025_v47 = vrot.slane %v3502_v41, %v4164_v53 }
 0x176   : > { %v2411_v45 = vpop.f32.mrf.mxu0  ;;  %v2453_v51 = vadd.f32 %v2452_v46, %v4225_v29 }
 0x177   : > { %2035 = vst [vmem:[%s4180_s14 + $0x18] sm:$0xff] %v2027_v44  ;;  %v2454_v50 = vpop.f32.mrf.mxu1  ;;  %v2412_v52 = vadd.f32 %v2411_v45, %v4225_v29  ;;  %v3047_v62 = vcombine.low %v3025_v47, %v3032_v48 }
 0x178   : > { %v2413_v49 = vpop.f32.mrf.mxu0  ;;  %v2455_v55 = vadd.f32 %v2454_v50, %v4225_v29 }
 0x179   : > { %v2414_v54 = vadd.f32 %v2413_v49, %v4225_v29  ;;  %v2456_v57 = vpop.f32.mrf.mxu1  ;;  %v3055_v5 = vrot.slane %v3047_v62, %v4164_v53 }
 0x17a   : > { %v2415_v56 = vpop.f32.mrf.mxu0  ;;  %v3505_v59 = vpack.c.bf16 %v2455_v55, %v2453_v51 }
 0x17b   : > { %v3504_v58 = vpack.c.bf16 %v2414_v54, %v2412_v52  ;;  %v2457_v61 = vpop.f32.mrf.mxu1 }
 0x17c   : > { %v2416_v60 = vpop.f32.mrf.mxu0  ;;  %v3046_v0 = vrot.slane %v3505_v59, %v4164_v53 }
 0x17d   : > { %v3039_v63 = vrot.slane %v3504_v58, %v4164_v53  ;;  %v2534_v2 = vpop.f32.mrf.mxu1 }
 0x17e   : > { %v2493_v1 = vpop.f32.mrf.mxu0  ;;  %v2535_v11 = vadd.f32 %v2534_v2, %v4225_v29 }
 0x17f   : > { %v3048_v3 = vcombine.low %v3039_v63, %v3046_v0  ;;  %v2536_v4 = vpop.f32.mrf.mxu1  ;;  %v2494_v10 = vadd.f32 %v2493_v1, %v4225_v29 }
 0x180   : > { %v2495_v6 = vpop.f32.mrf.mxu0  ;;  %v2537_v9 = vadd.f32 %v2536_v4, %v4225_v29 }
 0x181   : > { %v3062_v7 = vrot.slane %v3048_v3, %v4164_v53  ;;  %v2496_v8 = vadd.f32 %v2495_v6, %v4225_v29  ;;  %v2538_v13 = vpop.f32.mrf.mxu1 }
 0x182   : > { %v2497_v12 = vpop.f32.mrf.mxu0  ;;  %v3507_v17 = vpack.c.bf16 %v2537_v9, %v2535_v11 }
 0x183   : > { %v3063_v14 = vcombine.low %v3055_v5, %v3062_v7  ;;  %v3506_v15 = vpack.c.bf16 %v2496_v8, %v2494_v10  ;;  %v2539_v19 = vpop.f32.mrf.mxu1 }
 0x184   : > { %v2498_v18 = vpop.f32.mrf.mxu0  ;;  %v3081_v24 = vrot.slane %v3507_v17, %v4164_v53 }
 0x185   : > { %3215 = vst [vmem:[%s4250_s17] sm:$0xff] %v3063_v14  ;;  %v2616_v21 = vpop.f32.mrf.mxu1  ;;  %v3074_v22 = vrot.slane %v3506_v15, %v4164_v53 }
 0x186   : > { %v2575_v20 = vpop.f32.mrf.mxu0  ;;  %v2617_v28 = vadd.f32 %v2616_v21, %v4225_v29 }
 0x187   : > { %v2618_v26 = vpop.f32.mrf.mxu1  ;;  %v2576_v27 = vadd.f32 %v2575_v20, %v4225_v29  ;;  %v3096_v37 = vcombine.low %v3074_v22, %v3081_v24 }
 0x188   : > { %v2577_v25 = vpop.f32.mrf.mxu0  ;;  %v2619_v30 = vadd.f32 %v2618_v26, %v4225_v29 }
 0x189   : > { %v2578_v36 = vadd.f32 %v2577_v25, %v4225_v29  ;;  %v2620_v32 = vpop.f32.mrf.mxu1  ;;  %v3104_v44 = vrot.slane %v3096_v37, %v4164_v53 }
 0x18a   : > { %v2579_v31 = vpop.f32.mrf.mxu0  ;;  %v3509_v33 = vpack.c.bf16 %v2619_v30, %v2617_v28 }
 0x18b   : > { %v3508_v23 = vpack.c.bf16 %v2578_v36, %v2576_v27  ;;  %v2621_v35 = vpop.f32.mrf.mxu1 }
 0x18c   : > { %v2580_v34 = vpop.f32.mrf.mxu0  ;;  %v3095_v39 = vrot.slane %v3509_v33, %v4164_v53 }
 0x18d   : > { %v3088_v38 = vrot.slane %v3508_v23, %v4164_v53  ;;  %v2698_v41 = vpop.f32.mrf.mxu1 }
 0x18e   : > { %v2657_v40 = vpop.f32.mrf.mxu0  ;;  %v2699_v49 = vadd.f32 %v2698_v41, %v4225_v29 }
 0x18f   : > { %v3097_v42 = vcombine.low %v3088_v38, %v3095_v39  ;;  %v2700_v16 = vpop.f32.mrf.mxu1  ;;  %v2658_v48 = vadd.f32 %v2657_v40, %v4225_v29 }
 0x190   : > { %v2659_v43 = vpop.f32.mrf.mxu0  ;;  %v2701_v47 = vadd.f32 %v2700_v16, %v4225_v29 }
 0x191   : > { %v3111_v45 = vrot.slane %v3097_v42, %v4164_v53  ;;  %v2660_v46 = vadd.f32 %v2659_v43, %v4225_v29  ;;  %v2702_v52 = vpop.f32.mrf.mxu1 }
 0x192   : > { %v2661_v50 = vpop.f32.mrf.mxu0  ;;  %v3511_v55 = vpack.c.bf16 %v2701_v47, %v2699_v49 }
 0x193   : > { %v3112_v51 = vcombine.low %v3104_v44, %v3111_v45  ;;  %v3510_v54 = vpack.c.bf16 %v2660_v46, %v2658_v48  ;;  %v2703_v57 = vpop.f32.mrf.mxu1 }
 0x194   : > { %v2662_v56 = vpop.f32.mrf.mxu0  ;;  %v3130_v61 = vrot.slane %v3511_v55, %v4164_v53 }
 0x195   : > { %3216 = vst [vmem:[%s4250_s17 + $0x8] sm:$0xff] %v3112_v51  ;;  %v2780_v59 = vpop.f32.mrf.mxu1  ;;  %v3123_v60 = vrot.slane %v3510_v54, %v4164_v53 }
 0x196   : > { %v2739_v58 = vpop.f32.mrf.mxu0  ;;  %v2781_v1 = vadd.f32 %v2780_v59, %v4225_v29 }
 0x197   : > { %v2782_v63 = vpop.f32.mrf.mxu1  ;;  %v2740_v0 = vadd.f32 %v2739_v58, %v4225_v29  ;;  %v3145_v10 = vcombine.low %v3123_v60, %v3130_v61 }
 0x198   : > { %v2741_v62 = vpop.f32.mrf.mxu0  ;;  %v2783_v3 = vadd.f32 %v2782_v63, %v4225_v29 }
 0x199   : > { %v2742_v2 = vadd.f32 %v2741_v62, %v4225_v29  ;;  %v2784_v4 = vpop.f32.mrf.mxu1  ;;  %v3153_v19 = vrot.slane %v3145_v10, %v4164_v53 }
 0x19a   : > { %v2743_v6 = vpop.f32.mrf.mxu0  ;;  %v3513_v7 = vpack.c.bf16 %v2783_v3, %v2781_v1 }
 0x19b   : > { %v3512_v5 = vpack.c.bf16 %v2742_v2, %v2740_v0  ;;  %v2785_v9 = vpop.f32.mrf.mxu1 }
 0x19c   : > { %v2744_v8 = vpop.f32.mrf.mxu0  ;;  %v3144_v12 = vrot.slane %v3513_v7, %v4164_v53 }
 0x19d   : > { %v3137_v11 = vrot.slane %v3512_v5, %v4164_v53  ;;  %v2862_v14 = vpop.f32.mrf.mxu1 }
 0x19e   : > { %v2821_v13 = vpop.f32.mrf.mxu0  ;;  %v2863_v25 = vadd.f32 %v2862_v14, %v4225_v29 }
 0x19f   : > { %v3146_v15 = vcombine.low %v3137_v11, %v3144_v12  ;;  %v2864_v18 = vpop.f32.mrf.mxu1  ;;  %v2822_v24 = vadd.f32 %v2821_v13, %v4225_v29 }
 0x1a0   : > { %v2823_v17 = vpop.f32.mrf.mxu0  ;;  %v2865_v22 = vadd.f32 %v2864_v18, %v4225_v29 }
 0x1a1   : > { %v3160_v20 = vrot.slane %v3146_v15, %v4164_v53  ;;  %v2824_v21 = vadd.f32 %v2823_v17, %v4225_v29  ;;  %v2866_v27 = vpop.f32.mrf.mxu1 }
 0x1a2   : > { %v2825_v26 = vpop.f32.mrf.mxu0  ;;  %v3515_v30 = vpack.c.bf16 %v2865_v22, %v2863_v25 }
 0x1a3   : > { %v3161_v28 = vcombine.low %v3153_v19, %v3160_v20  ;;  %v3514_v36 = vpack.c.bf16 %v2824_v21, %v2822_v24  ;;  %v2867_v32 = vpop.f32.mrf.mxu1 }
 0x1a4   : > { %v2826_v31 = vpop.f32.mrf.mxu0  ;;  %v3179_v35 = vrot.slane %v3515_v30, %v4164_v53 }
 0x1a5   : > { %3217 = vst [vmem:[%s4250_s17 + $0x10] sm:$0xff] %v3161_v28  ;;  %v2944_v33 = vpop.f32.mrf.mxu1  ;;  %v3172_v34 = vrot.slane %v3514_v36, %v4164_v53 }
 0x1a6   : > { %v2903_v23 = vpop.f32.mrf.mxu0  ;;  %v2945_v40 = vadd.f32 %v2944_v33, %v4225_v29 }
 0x1a7   : > { %v2946_v38 = vpop.f32.mrf.mxu1  ;;  %v2904_v39 = vadd.f32 %v2903_v23, %v4225_v29  ;;  %v3194_v48 = vcombine.low %v3172_v34, %v3179_v35 }
 0x1a8   : > { %v2905_v37 = vpop.f32.mrf.mxu0  ;;  %v2947_v42 = vadd.f32 %v2946_v38, %v4225_v29 }
 0x1a9   : > { %v2906_v41 = vadd.f32 %v2905_v37, %v4225_v29  ;;  %v2948_v16 = vpop.f32.mrf.mxu1  ;;  %v3202_v51 = vrot.slane %v3194_v48, %v4164_v53 }
 0x1aa   : > { %v2907_v43 = vpop.f32.mrf.mxu0  ;;  %v3517_v45 = vpack.c.bf16 %v2947_v42, %v2945_v40 }
 0x1ab   : > { %v3516_v44 = vpack.c.bf16 %v2906_v41, %v2904_v39  ;;  %v2949_v47 = vpop.f32.mrf.mxu1 }
 0x1ac   : > { %v2908_v46 = vpop.f32.mrf.mxu0  ;;  %v3193_v50 = vrot.slane %v3517_v45, %v4164_v53 }
 0x1ad   : > { %v3186_v49 = vrot.slane %v3516_v44, %v4164_v53 }
 0x1af   : > { %v3195_v52 = vcombine.low %v3186_v49, %v3193_v50 }
 0x1b1   : > { %v3209_v54 = vrot.slane %v3195_v52, %v4164_v53 }
 0x1b3   : > { %v3210_v55 = vcombine.low %v3202_v51, %v3209_v54 }
 0x1b5   : > { %3218 = vst [vmem:[%s4250_s17 + $0x18] sm:$0xff] %v3210_v55 }
 0x1b6 PF: > { %p15_p9 = scmp.ge.s32.totalorder %s3675_s28, 4   ;;  %s4314_s24 = smov %s3609_s25 }
 0x1b7   : > { %s4315_s25 = smov %s3684_s8  ;;  %s4316_s26 = smov %s3675_s28 }
 0x1b8   :  { %17 = sbr.rel (!%p15_p9) target bundleno = 2 (0x2), region = 117 }

// kernel: _lambda_.13
= control target key start
LH: loop header
LB: loop body
LE: loop exit
PB: predicated region body
PF: predicated region fallthrough
CT: control target
= control target key end

     0   :  { %s803_s12 = smov 0   ;;  %s805_s13 = smov 0   ;;  %s944_s0 = inlined_call_operand.vmem [shape: bf16[2,40], index: 0, kind: input, shape index: {}]   ;;  %s945_s1 = inlined_call_operand.vmem [shape: bf16[40,2048], index: 1, kind: input, shape index: {}]   ;;  %s946_s2 = inlined_call_operand.vmem [shape: f32[2,1], index: 2, kind: input, shape index: {}]   ;;  %s947_s3 = inlined_call_operand.vmem [shape: bf16[2,2048], index: 3, kind: output, shape index: {}]  }
   0x1   :  { %s807_s14 = smov 0  }
   0x2 LB: > { %s673_s15 = sadd.s32 4294967295, %s779_s14   ;;  %s820_s16 = sadd.s32 1, %s779_s14   ;;  %s779_s14 = sphi %s807_s14, %s950_s14   ;;  %s775_s13 = sphi %s805_s13, %s949_s13   ;;  %s771_s12 = sphi %s803_s12, %s948_s12  }
   0x3   : > { %s38_s17 = ssub.s32 %s779_s14, %s820_s16  ;;  %s41_s18 = sadd.s32 1, %s775_s13 }
   0x4   : > { %p39_p0 = scmp.eq.s32.totalorder %s38_s17, 0  ;;  %p48_p1 = scmp.ne.s32.totalorder %s775_s13, %s771_s12 }
   0x5   : > { %p49_p2 = scmp.eq.s32.totalorder %s779_s14, 0  ;;  %p676_p4 = scmp.ge.s32.totalorder %s779_s14, 2 }
   0x6   : > { %s829_s19 = scalar_select %p39_p0, %s775_s13, %s41_s18  }
   0x7   : > { %p50_p3 = por %p49_p2, %p48_p1  ;;  %127 = sbr.rel (%p676_p4) target bundleno = 27 (0x1b), region = 24 }
   0xc   : > { %130 = sbr.rel (!%p50_p3) target bundleno = 27 (0x1b), region = 28  ;;  %s132_s20 = sand.u32 (%p50_p3), 1, %s775_s13  }
   0xd   : > { %s719_s21 = sshll.u32 (%p50_p3), %s779_s14, 5  ;;  %s720_s22 = smul.u32 (%p50_p3), 160, %s132_s20 }
   0xe   : > { %s837_s25 = scalar_lea.vmem (%p50_p3), %s945_s1, %s719_s21 }
   0xf   : > { %v150_v0 = vld [vmem:[%s837_s25] sm:$0xff] (%p50_p3)  ;;  %v152_v1 = vld [vmem:[%s837_s25 + $0x8] sm:$0xff] (%p50_p3)  ;;  %v154_v2 = vld [vmem:[%s837_s25 + $0x10] sm:$0xff] (%p50_p3)  ;;  %s845_s26 = scalar_lea.vmem (%p50_p3), [#allocation2], %s720_s22 }
  0x10   : > { %v156_v3 = vld [vmem:[%s837_s25 + $0x18] sm:$0xff] (%p50_p3)  ;;  %v158_v4 = vld [vmem:[%s837_s25 + $0x40] sm:$0xff] (%p50_p3)  ;;  %v160_v5 = vld [vmem:[%s837_s25 + $0x48] sm:$0xff] (%p50_p3)  ;;  %151 = vst [vmem:[%s845_s26] sm:$0xff] (%p50_p3), %v150_v0 }
  0x11   : > { %153 = vst [vmem:[%s845_s26 + $0x8] sm:$0xff] %v152_v1  ;;  %155 = vst [vmem:[%s845_s26 + $0x10] sm:$0xff] %v154_v2  ;;  %v162_v6 = vld [vmem:[%s837_s25 + $0x50] sm:$0xff]  ;;  %v164_v7 = vld [vmem:[%s837_s25 + $0x58] sm:$0xff] }
  0x12   : > { %157 = vst [vmem:[%s845_s26 + $0x18] sm:$0xff] %v156_v3  ;;  %159 = vst [vmem:[%s845_s26 + $0x20] sm:$0xff] %v158_v4  ;;  %v166_v8 = vld [vmem:[%s837_s25 + $0x80] sm:$0xff]  ;;  %v168_v9 = vld [vmem:[%s837_s25 + $0x88] sm:$0xff] }
  0x13   : > { %161 = vst [vmem:[%s845_s26 + $0x28] sm:$0xff] %v160_v5  ;;  %163 = vst [vmem:[%s845_s26 + $0x30] sm:$0xff] %v162_v6  ;;  %v170_v10 = vld [vmem:[%s837_s25 + $0x90] sm:$0xff]  ;;  %v172_v11 = vld [vmem:[%s837_s25 + $0x98] sm:$0xff] }
  0x14   : > { %165 = vst [vmem:[%s845_s26 + $0x38] sm:$0xff] %v164_v7  ;;  %167 = vst [vmem:[%s845_s26 + $0x40] sm:$0xff] %v166_v8  ;;  %v174_v12 = vld [vmem:[%s837_s25 + $0xc0] sm:$0xff]  ;;  %v176_v13 = vld [vmem:[%s837_s25 + $0xc8] sm:$0xff] }
  0x15   : > { %169 = vst [vmem:[%s845_s26 + $0x48] sm:$0xff] %v168_v9  ;;  %171 = vst [vmem:[%s845_s26 + $0x50] sm:$0xff] %v170_v10  ;;  %v178_v14 = vld [vmem:[%s837_s25 + $0xd0] sm:$0xff]  ;;  %v180_v15 = vld [vmem:[%s837_s25 + $0xd8] sm:$0xff] }
  0x16   : > { %173 = vst [vmem:[%s845_s26 + $0x58] sm:$0xff] %v172_v11  ;;  %175 = vst [vmem:[%s845_s26 + $0x60] sm:$0xff] %v174_v12  ;;  %v182_v16 = vld [vmem:[%s837_s25 + $0x100] sm:$0xff]  ;;  %v184_v17 = vld [vmem:[%s837_s25 + $0x108] sm:$0xff] }
  0x17   : > { %177 = vst [vmem:[%s845_s26 + $0x68] sm:$0xff] %v176_v13  ;;  %179 = vst [vmem:[%s845_s26 + $0x70] sm:$0xff] %v178_v14  ;;  %v186_v18 = vld [vmem:[%s837_s25 + $0x110] sm:$0xff]  ;;  %v188_v19 = vld [vmem:[%s837_s25 + $0x118] sm:$0xff] }
  0x18   : > { %181 = vst [vmem:[%s845_s26 + $0x78] sm:$0xff] %v180_v15  ;;  %183 = vst [vmem:[%s845_s26 + $0x80] sm:$0xff] %v182_v16 }
  0x19   : > { %185 = vst [vmem:[%s845_s26 + $0x88] sm:$0xff] %v184_v17  ;;  %187 = vst [vmem:[%s845_s26 + $0x90] sm:$0xff] %v186_v18 }
  0x1a   : > { %189 = vst [vmem:[%s845_s26 + $0x98] sm:$0xff] %v188_v19 }
  0x1b PF: > { %p679_p5 = scmp.ge.s32.totalorder %s779_s14, 1  ;;  %p194_p6 = scmp.lt.s32.totalorder %s779_s14, 3 }
  0x1d   : > { %p195_p7 = pnand %p679_p5, %p194_p6 }
  0x1e   : > { %s201_s27 = sand.u32 (!%p195_p7), 1, %s771_s12   ;;  %s680_s7 = sshll.u32 (!%p195_p7), %s673_s15, 3 }
  0x1f   : > { %198 = sbr.rel (%p195_p7) target bundleno = 272 (0x110), region = 51  ;;  %p225_p8 = scmp.lt.s32.totalorder (!%p195_p7), %s680_s7, 15 }
  0x20   : > { %s721_s28 = smul.u32 (!%p195_p7), 160, %s201_s27 }
  0x22   : > { %s890_s4 = scalar_lea.vmem (!%p195_p7), [#allocation2], %s721_s28 }
  0x24   : > { %v781_v20 = vmov 0   ;;  %v251_v21 = vld [vmem:[%s946_s2] sm:$0x3]  ;;  %vm361_vm0 = vcmask 1043456   ;;  %v248_v23 = vld [vmem:[%s890_s4 + $0x88] sm:$0xff]  ;;  %v249_v44 = vld [vmem:[%s890_s4 + $0x90] sm:$0xff]  ;;  %v573_v11 = vlaneseq }
  0x25   : > { %418 = vmatprep.mubr.bf16.mxu0 %v781_v20  ;;  %459 = vmatprep.mubr.bf16.mxu1 %v781_v20  ;;  %v247_v22 = vld [vmem:[%s890_s4 + $0x80] sm:$0xff]  ;;  %v700_v26 = vcombine.high %v248_v23, %v248_v23  ;;  %v699_v28 = vcombine.low %v248_v23, %v248_v23  ;;  %v240_v30 = vld [vmem:[%s890_s4 + $0x48] sm:$0xff]  ;;  %v250_v45 = vld [vmem:[%s890_s4 + $0x98] sm:$0xff]  ;;  %v702_v48 = vcombine.high %v249_v44, %v249_v44  ;;  %vm357_vm1 = vcmask 326656   ;;  %s952_s7 = smov (!%p225_p8, %s680_s7), 15 }
  0x26   : > { %748 = vset.pattern.permute.xlu0 %v781_v20  ;;  %v239_v24 = vld [vmem:[%s890_s4 + $0x40] sm:$0xff]  ;;  %v698_v25 = vcombine.high %v247_v22, %v247_v22  ;;  %v697_v27 = vcombine.low %v247_v22, %v247_v22  ;;  %v244_v31 = vld [vmem:[%s890_s4 + $0x68] sm:$0xff]  ;;  %v704_v49 = vcombine.high %v250_v45, %v250_v45  ;;  %v701_v50 = vcombine.low %v249_v44, %v249_v44  ;;  %v241_v52 = vld [vmem:[%s890_s4 + $0x50] sm:$0xff]  ;;  %s227_s10 = scalar_lea.vmem %s947_s3, %s952_s7 }
  0x27   : > { %254 = vperm.xlu0 %748, %v251_v21   ;;  %v243_v29 = vld [vmem:[%s890_s4 + $0x60] sm:$0xff]  ;;  %v692_v33 = vcombine.high %v240_v30, %v244_v31  ;;  %v232_v36 = vld [vmem:[%s890_s4 + $0x8] sm:$0xff]  ;;  %707 = vmatprep.subr.msk.bf16.mxu1 %vm361_vm0, %v700_v26  ;;  %v369_v38 = vsel %vm361_vm0, %v699_v28, 0  ;;  %v691_v41 = vcombine.low %v240_v30, %v244_v31  ;;  %v703_v51 = vcombine.low %v250_v45, %v250_v45  ;;  %v245_v53 = vld [vmem:[%s890_s4 + $0x70] sm:$0xff] }
  0x28   : > { %v690_v32 = vcombine.high %v239_v24, %v243_v29  ;;  %v231_v34 = vld [vmem:[%s890_s4] sm:$0xff]  ;;  %705 = vmatprep.subr.msk.bf16.mxu0 %vm361_vm0, %v698_v25  ;;  %v363_v37 = vsel %vm361_vm0, %v697_v27, 0  ;;  %v236_v39 = vld [vmem:[%s890_s4 + $0x28] sm:$0xff]  ;;  %438 = vmatpush1.bf16.msra.mxu1 %v369_v38  ;;  %v689_v40 = vcombine.low %v239_v24, %v243_v29  ;;  %v242_v54 = vld [vmem:[%s890_s4 + $0x58] sm:$0xff]  ;;  %v375_v57 = vsel %vm361_vm0, %v701_v50, 0 }
  0x29   : > { %v235_v35 = vld [vmem:[%s890_s4 + $0x20] sm:$0xff]  ;;  %397 = vmatpush1.bf16.msra.mxu0 %v363_v37  ;;  %439 = vmatprep.subr.bf16.mxu1 %v692_v33  ;;  %v684_v43 = vcombine.high %v232_v36, %v236_v39  ;;  %v683_v47 = vcombine.low %v232_v36, %v236_v39  ;;  %v246_v55 = vld [vmem:[%s890_s4 + $0x78] sm:$0xff]  ;;  %v381_v58 = vsel %vm361_vm0, %v703_v51, 0  ;;  %v694_v59 = vcombine.high %v241_v52, %v245_v53  ;;  %v233_v61 = vld [vmem:[%s890_s4 + $0x10] sm:$0xff] }
  0x2a   : > { %398 = vmatprep.subr.bf16.mxu0 %v690_v32  ;;  %v682_v42 = vcombine.high %v231_v34, %v235_v35  ;;  %v681_v46 = vcombine.low %v231_v34, %v235_v35  ;;  %v230_v56 = vld [vmem:[%s944_s0] sm:$0x1]  ;;  %v696_v60 = vcombine.high %v242_v54, %v246_v55  ;;  %v237_v62 = vld [vmem:[%s890_s4 + $0x30] sm:$0xff]  ;;  %v234_v63 = vld [vmem:[%s890_s4 + $0x18] sm:$0xff]  ;;  %v693_v1 = vcombine.low %v241_v52, %v245_v53 }
  0x2b   : > { %v238_v0 = vld [vmem:[%s890_s4 + $0x38] sm:$0xff]  ;;  %v695_v2 = vcombine.low %v242_v54, %v246_v55  ;;  %v686_v3 = vcombine.high %v233_v61, %v237_v62  ;;  %v685_v5 = vcombine.low %v233_v61, %v237_v62  ;;  %v782_v9 = vmov 1966171168  }
  0x2c   : > { %440 = vmatpush1.bf16.msra.mxu1 %v691_v41  ;;  %v688_v4 = vcombine.high %v234_v63, %v238_v0  ;;  %v687_v6 = vcombine.low %v234_v63, %v238_v0  ;;  %v571_v10 = vunpack.c.l.s4 %v782_v9  ;;  %v574_v18 = vshrl.u32 %v573_v11, 7 }
  0x2d   : > { %399 = vmatpush1.bf16.msra.mxu0 %v689_v40  ;;  %441 = vmatprep.subr.bf16.mxu1 %v684_v43 }
  0x2e   : > { %400 = vmatprep.subr.bf16.mxu0 %v682_v42  ;;  %v572_v17 = vunpack.c.0.s8 %v571_v10 }
  0x30   : > { %442 = vmatpush1.bf16.msra.mxu1 %v683_v47  ;;  %v575_v26 = vsub.s32 %v572_v17, %v574_v18 }
  0x31   : > { %401 = vmatpush1.bf16.msra.mxu0 %v681_v46  ;;  %711 = vmatprep.subr.msk.bf16.mxu1 %vm361_vm0, %v704_v49 }
  0x32   : > { %709 = vmatprep.subr.msk.bf16.mxu0 %vm361_vm0, %v702_v48 }
  0x33   : > { %708 = vmatmul.mubr.msk.bf16.vlgmr.msra.gmra.mxu1 %vm357_vm1, %v230_v56 }
  0x34   : > { %706 = vmatmul.mubr.msk.bf16.vlgmr.msra.gmra.mxu0 %vm357_vm1, %v230_v56  ;;  %520 = vmatpush1.bf16.msra.mxu1 %v381_v58 }
  0x35   : > { %479 = vmatpush1.bf16.msra.mxu0 %v375_v57  ;;  %521 = vmatprep.subr.bf16.mxu1 %v696_v60 }
  0x36   : > { %480 = vmatprep.subr.bf16.mxu0 %v694_v59  ;;  %500 = vmatprep.mubr.bf16.mxu0 %v781_v20 }
  0x37   : > { %541 = vmatprep.mubr.bf16.mxu1 %v781_v20 }
  0x38   : > { %522 = vmatpush1.bf16.msra.mxu1 %v695_v2 }
  0x39   : > { %481 = vmatpush1.bf16.msra.mxu0 %v693_v1  ;;  %523 = vmatprep.subr.bf16.mxu1 %v688_v4 }
  0x3a   : > { %482 = vmatprep.subr.bf16.mxu0 %v686_v3 }
  0x3c   : > { %524 = vmatpush1.bf16.msra.mxu1 %v687_v6 }
  0x3d   : > { %483 = vmatpush1.bf16.msra.mxu0 %v685_v5 }
  0x3f   : > { %712 = vmatmul.mubr.msk.bf16.vlgmr.msra.gmra.mxu1 %vm357_vm1, %v230_v56 }
  0x40   : > { %710 = vmatmul.mubr.msk.bf16.vlgmr.msra.gmra.mxu0 %vm357_vm1, %v230_v56 }
  0xa2   : > { %v255_v14 = vpop.permute.xlu0 %254 }
  0xf3   : > { %v461_v8 = vpop.f32.mrf.mxu1 }
  0xf4   : > { %v420_v7 = vpop.f32.mrf.mxu0  ;;  %v462_v21 = vadd.f32 %v461_v8, %v255_v14 }
  0xf5   : > { %v463_v13 = vpop.f32.mrf.mxu1  ;;  %v421_v19 = vadd.f32 %v420_v7, %v255_v14 }
  0xf6   : > { %v422_v12 = vpop.f32.mrf.mxu0  ;;  %v464_v22 = vadd.f32 %v463_v13, %v255_v14 }
  0xf7   : > { %v465_v16 = vpop.f32.mrf.mxu1  ;;  %v423_v20 = vadd.f32 %v422_v12, %v255_v14 }
  0xf8   : > { %v424_v15 = vpop.f32.mrf.mxu0  ;;  %v714_v27 = vpack.c.bf16 %v464_v22, %v462_v21 }
  0xf9   : > { %v466_v24 = vpop.f32.mrf.mxu1  ;;  %v713_v25 = vpack.c.bf16 %v423_v20, %v421_v19 }
  0xfa   : > { %v425_v23 = vpop.f32.mrf.mxu0  ;;  %v583_v31 = vrot.slane %v714_v27, %v575_v26 }
  0xfb   : > { %v576_v30 = vrot.slane %v713_v25, %v575_v26 }
  0xfd   : > { %v598_v44 = vcombine.low %v576_v30, %v583_v31 }
  0xff   : > { %v543_v29 = vpop.f32.mrf.mxu1  ;;  %v606_v48 = vrot.slane %v598_v44, %v575_v26 }
 0x100   : > { %v502_v28 = vpop.f32.mrf.mxu0  ;;  %v544_v35 = vadd.f32 %v543_v29, %v255_v14 }
 0x101   : > { %v545_v33 = vpop.f32.mrf.mxu1  ;;  %v503_v34 = vadd.f32 %v502_v28, %v255_v14 }
 0x102   : > { %v504_v32 = vpop.f32.mrf.mxu0  ;;  %v546_v37 = vadd.f32 %v545_v33, %v255_v14 }
 0x103   : > { %v505_v36 = vadd.f32 %v504_v32, %v255_v14  ;;  %v547_v39 = vpop.f32.mrf.mxu1 }
 0x104   : > { %v506_v38 = vpop.f32.mrf.mxu0  ;;  %v716_v41 = vpack.c.bf16 %v546_v37, %v544_v35 }
 0x105   : > { %v715_v40 = vpack.c.bf16 %v505_v36, %v503_v34  ;;  %v548_v43 = vpop.f32.mrf.mxu1 }
 0x106   : > { %v507_v42 = vpop.f32.mrf.mxu0  ;;  %v597_v46 = vrot.slane %v716_v41, %v575_v26 }
 0x107   : > { %v590_v45 = vrot.slane %v715_v40, %v575_v26 }
 0x109   : > { %v599_v47 = vcombine.low %v590_v45, %v597_v46 }
 0x10b   : > { %v613_v49 = vrot.slane %v599_v47, %v575_v26 }
 0x10d   : > { %v614_v50 = vcombine.low %v606_v48, %v613_v49 }
 0x10f   : > { %616 = vst [vmem:[%s227_s10] sm:$0xff] %v614_v50 }
 0x110 PF: > { %p10_p9 = scmp.ge.s32.totalorder %s820_s16, 4   ;;  %s948_s12 = smov %s775_s13 }
 0x111   : > { %s949_s13 = smov %s829_s19  ;;  %s950_s14 = smov %s820_s16 }
 0x112   :  { %12 = sbr.rel (!%p10_p9) target bundleno = 2 (0x2), region = 90 }

// kernel: _lambda_.20
= control target key start
LH: loop header
LB: loop body
LE: loop exit
PB: predicated region body
PF: predicated region fallthrough
CT: control target
= control target key end

     0   :  { %s535_s12 = smov 0   ;;  %s537_s13 = smov 0   ;;  %s593_s0 = inlined_call_operand.vmem [shape: bf16[4,72], index: 0, kind: input, shape index: {}]   ;;  %s594_s1 = inlined_call_operand.vmem [shape: bf16[72,512], index: 1, kind: input, shape index: {}]   ;;  %s595_s2 = inlined_call_operand.vmem [shape: f32[4,1], index: 2, kind: input, shape index: {}]   ;;  %s596_s3 = inlined_call_operand.vmem [shape: f32[4,512], index: 3, kind: output, shape index: {}]  }
   0x1   :  { %s539_s14 = smov 0  }
   0x2 LB: > { %s424_s15 = sadd.s32 4294967295, %s512_s14   ;;  %s552_s16 = sadd.s32 1, %s512_s14   ;;  %s512_s14 = sphi %s539_s14, %s599_s14   ;;  %s508_s13 = sphi %s537_s13, %s598_s13   ;;  %s504_s12 = sphi %s535_s12, %s597_s12  }
   0x3   : > { %s38_s17 = ssub.s32 %s512_s14, %s552_s16  ;;  %s41_s18 = sadd.s32 1, %s508_s13 }
   0x4   : > { %p39_p0 = scmp.eq.s32.totalorder %s38_s17, 0  ;;  %p48_p1 = scmp.ne.s32.totalorder %s508_s13, %s504_s12 }
   0x5   : > { %p49_p2 = scmp.eq.s32.totalorder %s512_s14, 0  ;;  %p427_p4 = scmp.ge.s32.totalorder %s512_s14, 2 }
   0x6   : > { %s561_s19 = scalar_select %p39_p0, %s508_s13, %s41_s18  }
   0x7   : > { %p50_p3 = por %p49_p2, %p48_p1  ;;  %127 = sbr.rel (%p427_p4) target bundleno = 21 (0x15), region = 24 }
   0xc   : > { %130 = sbr.rel (!%p50_p3) target bundleno = 21 (0x15), region = 28  ;;  %s132_s20 = sand.u32 (%p50_p3), 1, %s508_s13  }
   0xd   : > { %s447_s21 = sshll.u32 (%p50_p3), %s512_s14, 3  ;;  %s448_s22 = smul.u32 (%p50_p3), 72, %s132_s20 }
   0xe   : > { %s137_s25 = scalar_lea.vmem (%p50_p3), %s594_s1, %s447_s21 }
   0xf   : > { %v182_v0 = vld [vmem:[%s137_s25] sm:$0xff] (%p50_p3)  ;;  %v184_v1 = vld [vmem:[%s137_s25 + $0x10] sm:$0xff] (%p50_p3)  ;;  %s134_s26 = scalar_lea.vmem (%p50_p3), [#allocation2], %s448_s22 }
  0x10   : > { %v186_v2 = vld [vmem:[%s137_s25 + $0x20] sm:$0xff] (%p50_p3)  ;;  %v188_v3 = vld [vmem:[%s137_s25 + $0x30] sm:$0xff] (%p50_p3)  ;;  %183 = vst [vmem:[%s134_s26] sm:$0xff] (%p50_p3), %v182_v0  ;;  %185 = vst [vmem:[%s134_s26 + $0x8] sm:$0xff] (%p50_p3), %v184_v1 }
  0x11   : > { %v190_v4 = vld [vmem:[%s137_s25 + $0x40] sm:$0xff]  ;;  %v192_v5 = vld [vmem:[%s137_s25 + $0x50] sm:$0xff]  ;;  %187 = vst [vmem:[%s134_s26 + $0x10] sm:$0xff] %v186_v2  ;;  %189 = vst [vmem:[%s134_s26 + $0x18] sm:$0xff] %v188_v3 }
  0x12   : > { %191 = vst [vmem:[%s134_s26 + $0x20] sm:$0xff] %v190_v4  ;;  %193 = vst [vmem:[%s134_s26 + $0x28] sm:$0xff] %v192_v5  ;;  %v194_v6 = vld [vmem:[%s137_s25 + $0x60] sm:$0xff]  ;;  %v196_v7 = vld [vmem:[%s137_s25 + $0x70] sm:$0xff] }
  0x13   : > { %v198_v8 = vld [vmem:[%s137_s25 + $0x80] sm:$0xff]  ;;  %195 = vst [vmem:[%s134_s26 + $0x30] sm:$0xff] %v194_v6  ;;  %197 = vst [vmem:[%s134_s26 + $0x38] sm:$0xff] %v196_v7 }
  0x14   : > { %199 = vst [vmem:[%s134_s26 + $0x40] sm:$0xff] %v198_v8 }
  0x15 PF: > { %p430_p5 = scmp.ge.s32.totalorder %s512_s14, 1  ;;  %p204_p6 = scmp.lt.s32.totalorder %s512_s14, 3 }
  0x17   : > { %p205_p7 = pnand %p430_p5, %p204_p6 }
  0x18   : > { %s211_s27 = sand.u32 (!%p205_p7), 1, %s504_s12   ;;  %s431_s7 = sshll.u32 (!%p205_p7), %s424_s15, 1 }
  0x19   : > { %208 = sbr.rel (%p205_p7) target bundleno = 256 (0x100), region = 66  ;;  %p236_p8 = scmp.lt.s32.totalorder (!%p205_p7), %s431_s7, 3 }
  0x1a   : > { %s449_s28 = smul.u32 (!%p205_p7), 72, %s211_s27 }
  0x1c   : > { %s213_s4 = scalar_lea.vmem (!%p205_p7), [#allocation2], %s449_s28 }
  0x1e   : > { %v514_v9 = vmov 0   ;;  %v252_v10 = vld [vmem:[%s595_s2] sm:$0xf]  ;;  %vm307_vm0 = vcmask 1043456   ;;  %v478_v14 = vld [vmem:[%s213_s4 + $0x34] ss:$8 sps:$4 sm:$0xff]  }
  0x1f   : > { %346 = vmatprep.mubr.bf16.mxu0 %v514_v9  ;;  %475 = vset.pattern.permute.xlu0 %v514_v9  ;;  %v251_v11 = vld [vmem:[%s213_s4 + $0x40] sm:$0xff]  ;;  %v480_v16 = vld [vmem:[%s213_s4 + $0x30] ss:$8 sps:$4 sm:$0xff]   ;;  %v484_v19 = vld [vmem:[%s213_s4 + $0x14] ss:$8 sps:$4 sm:$0xff]   ;;  %vm303_vm1 = vcmask 588800  }
  0x20   : > { %255 = vperm.xlu0 %475, %v252_v10   ;;  %v442_v12 = vcombine.high %v251_v11, %v251_v11  ;;  %v441_v13 = vcombine.low %v251_v11, %v251_v11  ;;  %v481_v17 = vld [vmem:[%s213_s4 + $0x24] ss:$8 sps:$4 sm:$0xff]   ;;  %v483_v18 = vld [vmem:[%s213_s4 + $0x20] ss:$8 sps:$4 sm:$0xff]   ;;  %v486_v20 = vld [vmem:[%s213_s4 + $0x10] ss:$8 sps:$4 sm:$0xff]  }
  0x21   : > { %v487_v21 = vld [vmem:[%s213_s4 + $0x4] ss:$8 sps:$4 sm:$0xff]   ;;  %v489_v22 = vld [vmem:[%s213_s4] ss:$8 sps:$4 sm:$0xff]   ;;  %s601_s7 = smov (!%p236_p8, %s431_s7), 3 }
  0x22   : > { %443 = vmatprep.subr.msk.bf16.mxu0 %vm307_vm0, %v442_v12  ;;  %v309_v15 = vsel %vm307_vm0, %v441_v13, 0  ;;  %v242_v23 = vld [vmem:[%s593_s0] sm:$0x3]  ;;  %s432_s8 = sshll.u32 %s601_s7, 2 }
  0x23   : > { %321 = vmatpush1.bf16.msra.mxu0 %v309_v15  ;;  %s239_s11 = scalar_lea.vmem %s596_s3, %s432_s8 }
  0x24   : > { %322 = vmatprep.subr.bf16.mxu0 %v478_v14 }
  0x27   : > { %323 = vmatpush1.bf16.msra.mxu0 %v480_v16 }
  0x28   : > { %324 = vmatprep.subr.bf16.mxu0 %v481_v17 }
  0x2b   : > { %325 = vmatpush1.bf16.msra.mxu0 %v483_v18 }
  0x2c   : > { %326 = vmatprep.subr.bf16.mxu0 %v484_v19 }
  0x2f   : > { %327 = vmatpush1.bf16.msra.mxu0 %v486_v20 }
  0x30   : > { %328 = vmatprep.subr.bf16.mxu0 %v487_v21 }
  0x33   : > { %329 = vmatpush1.bf16.msra.mxu0 %v489_v22 }
  0x36   : > { %444 = vmatmul.mubr.msk.bf16.vlgmr.msra.gmra.mxu0 %vm303_vm1, %v242_v23 }
  0x9b   : > { %v256_v24 = vpop.permute.xlu0 %255 }
  0xf6   : > { %v348_v25 = vpop.f32.mrf.mxu0 }
  0xf7   : > { %v349_v26 = vadd.f32 %v348_v25, %v256_v24 }
  0xf8   : > { %v350_v27 = vpop.f32.mrf.mxu0 }
  0xf9   : > { %v351_v28 = vadd.f32 %v350_v27, %v256_v24  ;;  %v355_v30 = vmax.f32 %v349_v26, 0.0 }
  0xfa   : > { %v352_v29 = vpop.f32.mrf.mxu0 }
  0xfb   : > { %v356_v31 = vmax.f32 %v351_v28, 0.0 }
  0xfc   : > { %v353_v32 = vpop.f32.mrf.mxu0 }
  0xfd   : > { %v359_v33 = vcombine.low %v355_v30, %v356_v31 }
  0xff   : > { %361 = vst [vmem:[%s239_s11] sm:$0xff] %v359_v33 }
 0x100 PF: > { %p10_p9 = scmp.ge.s32.totalorder %s552_s16, 4   ;;  %s597_s12 = smov %s508_s13 }
 0x101   : > { %s598_s13 = smov %s561_s19  ;;  %s599_s14 = smov %s552_s16 }
 0x102   :  { %12 = sbr.rel (!%p10_p9) target bundleno = 2 (0x2), region = 105 }

// kernel: _lambda_.14
= control target key start
LH: loop header
LB: loop body
LE: loop exit
PB: predicated region body
PF: predicated region fallthrough
CT: control target
= control target key end

     0   :  { %s1261_s24 = smov 0   ;;  %s1263_s25 = smov 0   ;;  %s1400_s0 = inlined_call_operand.vmem [shape: bf16[18,2048], index: 0, kind: input, shape index: {}]   ;;  %s1401_s1 = inlined_call_operand.vmem [shape: bf16[2,2048], index: 1, kind: input, shape index: {}]   ;;  %s1402_s2 = inlined_call_operand.vmem [shape: bf16[4,18], index: 2, kind: input, shape index: {}]   ;;  %s1403_s3 = inlined_call_operand.vmem [shape: f32[4,1], index: 3, kind: input, shape index: {}]   ;;  %s1404_s4 = inlined_call_operand.vmem [shape: bf16[4,2], index: 4, kind: input, shape index: {}]   ;;  %s1405_s5 = inlined_call_operand.vmem [shape: f32[4,1], index: 5, kind: input, shape index: {}]   ;;  %s1406_s6 = inlined_call_operand.vmem [shape: bf16[4,2048], index: 6, kind: output, shape index: {0}]   ;;  %s1407_s7 = inlined_call_operand.vmem [shape: bf16[4,2048], index: 7, kind: output, shape index: {1}]  }
   0x1   :  { %s1265_s26 = smov 0  }
   0x2 LB: > { %s1100_s27 = sadd.s32 4294967295, %s1216_s26   ;;  %s1278_s28 = sadd.s32 1, %s1216_s26   ;;  %s1216_s26 = sphi %s1265_s26, %s1410_s26   ;;  %s1212_s25 = sphi %s1263_s25, %s1409_s25   ;;  %s1208_s24 = sphi %s1261_s24, %s1408_s24  }
   0x3   : > { %s22_s29 = ssub.s32 %s1216_s26, %s1278_s28  ;;  %s25_s30 = sadd.s32 1, %s1212_s25 }
   0x4   : > { %p23_p0 = scmp.eq.s32.totalorder %s22_s29, 0  ;;  %p32_p1 = scmp.ne.s32.totalorder %s1212_s25, %s1208_s24 }
   0x5   : > { %p33_p2 = scmp.eq.s32.totalorder %s1216_s26, 0  ;;  %p1103_p4 = scmp.ge.s32.totalorder %s1216_s26, 2 }
   0x6   : > { %s1287_s8 = scalar_select %p23_p0, %s1212_s25, %s25_s30  }
   0x7   : > { %p34_p3 = por %p33_p2, %p32_p1  ;;  %232 = sbr.rel (%p1103_p4) target bundleno = 23 (0x17), region = 32 }
   0xc   : > { %235 = sbr.rel (!%p34_p3) target bundleno = 23 (0x17), region = 36  ;;  %s237_s9 = sand.u32 (%p34_p3), 1, %s1212_s25  }
   0xd   : > { %s1154_s10 = sshll.u32 (%p34_p3), %s1216_s26, 5  ;;  %s1155_s11 = smul.u32 (%p34_p3), 96, %s237_s9 }
   0xe   : > { %s242_s14 = scalar_lea.vmem (%p34_p3), %s1400_s0, %s1154_s10 }
   0xf   : > { %v255_v0 = vld [vmem:[%s242_s14] sm:$0xff] (%p34_p3)  ;;  %v257_v1 = vld [vmem:[%s242_s14 + $0x8] sm:$0xff] (%p34_p3)  ;;  %v259_v2 = vld [vmem:[%s242_s14 + $0x10] sm:$0xff] (%p34_p3)  ;;  %s239_s15 = scalar_lea.vmem (%p34_p3), [#allocation2], %s1155_s11 }
  0x10   : > { %v261_v3 = vld [vmem:[%s242_s14 + $0x18] sm:$0xff] (%p34_p3)  ;;  %v263_v4 = vld [vmem:[%s242_s14 + $0x40] sm:$0xff] (%p34_p3)  ;;  %v265_v5 = vld [vmem:[%s242_s14 + $0x48] sm:$0xff] (%p34_p3)  ;;  %256 = vst [vmem:[%s239_s15] sm:$0xff] (%p34_p3), %v255_v0 }
  0x11   : > { %258 = vst [vmem:[%s239_s15 + $0x8] sm:$0xff] %v257_v1  ;;  %260 = vst [vmem:[%s239_s15 + $0x10] sm:$0xff] %v259_v2  ;;  %v267_v6 = vld [vmem:[%s242_s14 + $0x50] sm:$0xff]  ;;  %v269_v7 = vld [vmem:[%s242_s14 + $0x58] sm:$0xff] }
  0x12   : > { %262 = vst [vmem:[%s239_s15 + $0x18] sm:$0xff] %v261_v3  ;;  %264 = vst [vmem:[%s239_s15 + $0x20] sm:$0xff] %v263_v4  ;;  %v271_v8 = vld [vmem:[%s242_s14 + $0x80] sm:$0xff]  ;;  %v273_v9 = vld [vmem:[%s242_s14 + $0x88] sm:$0xff] }
  0x13   : > { %266 = vst [vmem:[%s239_s15 + $0x28] sm:$0xff] %v265_v5  ;;  %268 = vst [vmem:[%s239_s15 + $0x30] sm:$0xff] %v267_v6  ;;  %v275_v10 = vld [vmem:[%s242_s14 + $0x90] sm:$0xff]  ;;  %v277_v11 = vld [vmem:[%s242_s14 + $0x98] sm:$0xff] }
  0x14   : > { %270 = vst [vmem:[%s239_s15 + $0x38] sm:$0xff] %v269_v7  ;;  %272 = vst [vmem:[%s239_s15 + $0x40] sm:$0xff] %v271_v8 }
  0x15   : > { %274 = vst [vmem:[%s239_s15 + $0x48] sm:$0xff] %v273_v9  ;;  %276 = vst [vmem:[%s239_s15 + $0x50] sm:$0xff] %v275_v10 }
  0x16   : > { %278 = vst [vmem:[%s239_s15 + $0x58] sm:$0xff] %v277_v11 }
  0x17 PF: > { %p1106_p5 = scmp.ge.s32.totalorder %s1216_s26, 1  ;;  %p291_p6 = scmp.lt.s32.totalorder %s1216_s26, 3 }
  0x19   : > { %p292_p7 = pnand %p1106_p5, %p291_p6 }
  0x1a   : > { %s298_s16 = sand.u32 (!%p292_p7), 1, %s1208_s24   ;;  %s1107_s18 = sshll.u32 (!%p292_p7), %s1100_s27, 3 }
  0x1b   : > { %295 = sbr.rel (%p292_p7) target bundleno = 272 (0x110), region = 63  ;;  %p340_p8 = scmp.lt.s32.totalorder (!%p292_p7), %s1107_s18, 15 }
  0x1c   : > { %s1156_s17 = smul.u32 (!%p292_p7), 96, %s298_s16 }
  0x1e   : > { %s1306_s21 = scalar_lea.vmem (!%p292_p7), [#allocation2], %s1156_s17 }
  0x20   : > { %v1218_v12 = vmov 0   ;;  %v658_v13 = vlaneseq  ;;  %v1219_v14 = vmov 1966171168   ;;  %vm440_vm0 = vcmask 1040384   ;;  %v370_v16 = vld [vmem:[%s1403_s3] sm:$0xf] }
  0x21   : > { %497 = vmatprep.mubr.bf16.mxu0 %v1218_v12  ;;  %538 = vmatprep.mubr.bf16.mxu1 %v1218_v12  ;;  %v702_v15 = vunpack.c.l.s4 %v1219_v14  ;;  %v366_v17 = vld [vmem:[%s1306_s21 + $0x40] sm:$0x11]  ;;  %v367_v18 = vld [vmem:[%s1306_s21 + $0x48] sm:$0x11]  ;;  %s1412_s18 = smov (!%p340_p8, %s1107_s18), 15  ;;  %v360_v42 = vld [vmem:[%s1306_s21 + $0x10] sm:$0xff] }
  0x22   : > { %1184 = vset.pattern.permute.xlu0 %v1218_v12  ;;  %v358_v19 = vld [vmem:[%s1306_s21] sm:$0xff]  ;;  %v1121_v20 = vcombine.high %v366_v17, %v366_v17  ;;  %v1123_v21 = vcombine.high %v367_v18, %v367_v18  ;;  %v1120_v22 = vcombine.low %v366_v17, %v366_v17  ;;  %v1122_v23 = vcombine.low %v367_v18, %v367_v18  ;;  %v359_v25 = vld [vmem:[%s1306_s21 + $0x8] sm:$0xff]  ;;  %v368_v29 = vld [vmem:[%s1306_s21 + $0x50] sm:$0x11]  ;;  %s342_s24 = scalar_lea.vmem %s1401_s1, %s1412_s18  ;;  %s1109_s11 = sshll.u32 %s1412_s18, 1 }
  0x23   : > { %373 = vperm.xlu0 %1184, %v370_v16   ;;  %v362_v24 = vld [vmem:[%s1306_s21 + $0x20] sm:$0xff]  ;;  %v363_v26 = vld [vmem:[%s1306_s21 + $0x28] sm:$0xff]  ;;  %v369_v30 = vld [vmem:[%s1306_s21 + $0x58] sm:$0x11]  ;;  %v1322_v31 = vshrl.u32 %v658_v13, 7  ;;  %v703_v32 = vunpack.c.0.s8 %v702_v15  ;;  %v1125_v38 = vcombine.high %v368_v29, %v368_v29  ;;  %v1124_v40 = vcombine.low %v368_v29, %v368_v29  ;;  %s1375_s14 = scalar_lea.vmem %s1406_s6, %s1109_s11  ;;  %s354_s17 = scalar_lea.vmem %s1407_s7, %s1109_s11 }
  0x24   : > { %v1113_v27 = vcombine.high %v358_v19, %v362_v24  ;;  %v1115_v28 = vcombine.high %v359_v25, %v363_v26  ;;  %1128 = vmatprep.subr.msk.bf16.mxu0 %vm440_vm0, %v1121_v20  ;;  %1130 = vmatprep.subr.msk.bf16.mxu1 %vm440_vm0, %v1123_v21  ;;  %v442_v33 = vsel %vm440_vm0, %v1120_v22, 0  ;;  %v448_v34 = vsel %vm440_vm0, %v1122_v23, 0  ;;  %v693_v35 = vld [vmem:[%s1405_s5] sm:$0xf]  ;;  %v364_v43 = vld [vmem:[%s1306_s21 + $0x30] sm:$0xff]  ;;  %v361_v45 = vld [vmem:[%s1306_s21 + $0x18] sm:$0xff] }
  0x25   : > { %478 = vmatpush1.bf16.msra.mxu0 %v442_v33  ;;  %519 = vmatpush1.bf16.msra.mxu1 %v448_v34  ;;  %v1112_v36 = vcombine.low %v358_v19, %v362_v24  ;;  %v1114_v37 = vcombine.low %v359_v25, %v363_v26  ;;  %v1127_v39 = vcombine.high %v369_v30, %v369_v30  ;;  %v692_v44 = vld [vmem:[%s342_s24] sm:$0xff]  ;;  %v365_v46 = vld [vmem:[%s1306_s21 + $0x38] sm:$0xff]  ;;  %vm436_vm1 = vcmask 146432  }
  0x26   : > { %479 = vmatprep.subr.bf16.mxu0 %v1113_v27  ;;  %520 = vmatprep.subr.bf16.mxu1 %v1115_v28  ;;  %v1126_v41 = vcombine.low %v369_v30, %v369_v30  ;;  %v706_v47 = vsub.s32 %v703_v32, %v1322_v31  ;;  %v700_v48 = vcombine.high %v692_v44, %v692_v44  ;;  %v357_v49 = vld [vmem:[%s1402_s2] sm:$0x3]  ;;  %v454_v52 = vsel %vm440_vm0, %v1124_v40, 0 }
  0x27   : > { %696 = vperm.xlu0 %1184, %v693_v35   ;;  %v1117_v50 = vcombine.high %v360_v42, %v364_v43  ;;  %v1119_v54 = vcombine.high %v361_v45, %v365_v46  ;;  %v1116_v59 = vcombine.low %v360_v42, %v364_v43  ;;  %v1118_v60 = vcombine.low %v361_v45, %v365_v46  ;;  %v691_v6 = vld [vmem:[%s1404_s4] sm:$0x3] }
  0x28   : > { %v707_v51 = vrot.slane %v692_v44, %v706_v47  ;;  %v460_v53 = vsel %vm440_vm0, %v1126_v41, 0  ;;  %v714_v55 = vrot.slane %v700_v48, %v706_v47  ;;  %vm749_vm2 = vcmask 15360  }
  0x29   : > { %480 = vmatpush1.bf16.msra.mxu0 %v1112_v36  ;;  %521 = vmatpush1.bf16.msra.mxu1 %v1114_v37  ;;  %v1220_v9 = vmov 1983009808  }
  0x2a   : > { %1132 = vmatprep.subr.msk.bf16.mxu0 %vm440_vm0, %v1125_v38  ;;  %1134 = vmatprep.subr.msk.bf16.mxu1 %vm440_vm0, %v1127_v39  ;;  %v715_v56 = vcombine.high %v707_v51, %v707_v51  ;;  %v723_v57 = vrot.slane %v707_v51, %v706_v47  ;;  %v716_v58 = vcombine.high %v714_v55, %v714_v55  ;;  %v656_v10 = vunpack.c.l.s4 %v1220_v9 }
  0x2b   : > { %v730_v3 = vrot.slane %v714_v55, %v706_v47 }
  0x2c   : > { %1129 = vmatmul.mubr.msk.bf16.vlgmr.msra.gmra.mxu0 %vm436_vm1, %v357_v49  ;;  %1131 = vmatmul.mubr.msk.bf16.vlgmr.msra.gmra.mxu1 %vm436_vm1, %v357_v49  ;;  %v737_v61 = vrot.slane %v715_v56, %v706_v47  ;;  %v745_v62 = vcombine.high %v723_v57, %v723_v57  ;;  %v744_v0 = vrot.slane %v716_v58, %v706_v47  ;;  %v754_v1 = vsel %vm440_vm0, %v723_v57, 0 }
  0x2d   : > { %560 = vmatpush1.bf16.msra.mxu0 %v454_v52  ;;  %601 = vmatpush1.bf16.msra.mxu1 %v460_v53  ;;  %v746_v5 = vcombine.high %v730_v3, %v730_v3  ;;  %v766_v7 = vsel %vm440_vm0, %v730_v3, 0  ;;  %v657_v13 = vunpack.c.0.s8 %v656_v10 }
  0x2e   : > { %561 = vmatprep.subr.bf16.mxu0 %v1117_v50  ;;  %602 = vmatprep.subr.bf16.mxu1 %v1119_v54  ;;  %v747_v63 = vcombine.high %v737_v61, %v737_v61  ;;  %v760_v2 = vsel %vm440_vm0, %v745_v62, 0  ;;  %v748_v4 = vcombine.high %v744_v0, %v744_v0 }
  0x2f   : > { %579 = vmatprep.mubr.bf16.mxu0 %v1218_v12  ;;  %620 = vmatprep.mubr.bf16.mxu1 %v1218_v12  ;;  %v772_v8 = vsel %vm440_vm0, %v746_v5, 0  ;;  %v1365_v22 = vsub.s32 %v657_v13, %v1322_v31 }
  0x31   : > { %562 = vmatpush1.bf16.msra.mxu0 %v1116_v59  ;;  %603 = vmatpush1.bf16.msra.mxu1 %v1118_v60 }
  0x32   : > { %1140 = vmatprep.subr.msk.bf16.mxu0 %vm440_vm0, %v737_v61  ;;  %1142 = vmatprep.subr.msk.bf16.mxu1 %vm440_vm0, %v747_v63 }
  0x34   : > { %1133 = vmatmul.mubr.msk.bf16.vlgmr.msra.gmra.mxu0 %vm436_vm1, %v357_v49  ;;  %1135 = vmatmul.mubr.msk.bf16.vlgmr.msra.gmra.mxu1 %vm436_vm1, %v357_v49 }
  0x35   : > { %792 = vmatpush1.bf16.msra.mxu0 %v754_v1  ;;  %833 = vmatpush1.bf16.msra.mxu1 %v760_v2 }
  0x36   : > { %809 = vmatprep.mubr.bf16.mxu0 %v1218_v12  ;;  %850 = vmatprep.mubr.bf16.mxu1 %v1218_v12 }
  0x37   : > { %1144 = vmatprep.subr.msk.bf16.mxu0 %vm440_vm0, %v744_v0  ;;  %1146 = vmatprep.subr.msk.bf16.mxu1 %vm440_vm0, %v748_v4 }
  0x3c   : > { %1141 = vmatmul.mubr.msk.bf16.vlgmr.msra.gmra.mxu0 %vm749_vm2, %v691_v6  ;;  %1143 = vmatmul.mubr.msk.bf16.vlgmr.msra.gmra.mxu1 %vm749_vm2, %v691_v6 }
  0x3d   : > { %874 = vmatpush1.bf16.msra.mxu0 %v766_v7  ;;  %915 = vmatpush1.bf16.msra.mxu1 %v772_v8 }
  0x3e   : > { %891 = vmatprep.mubr.bf16.mxu0 %v1218_v12  ;;  %932 = vmatprep.mubr.bf16.mxu1 %v1218_v12 }
  0x44   : > { %1145 = vmatmul.mubr.msk.bf16.vlgmr.msra.gmra.mxu0 %vm749_vm2, %v691_v6  ;;  %1147 = vmatmul.mubr.msk.bf16.vlgmr.msra.gmra.mxu1 %vm749_vm2, %v691_v6 }
  0x9e   : > { %v374_v11 = vpop.permute.xlu0 %373 }
  0xa2   : > { %v697_v52 = vpop.permute.xlu0 %696 }
  0xec   : > { %v499_v14 = vpop.f32.mrf.mxu0  ;;  %v540_v15 = vpop.f32.mrf.mxu1 }
  0xed   : > { %v500_v16 = vadd.f32 %v499_v14, %v374_v11  ;;  %v541_v17 = vadd.f32 %v540_v15, %v374_v11 }
  0xee   : > { %v501_v18 = vpop.f32.mrf.mxu0  ;;  %v542_v19 = vpop.f32.mrf.mxu1 }
  0xef   : > { %v502_v20 = vadd.f32 %v501_v18, %v374_v11  ;;  %v543_v21 = vadd.f32 %v542_v19, %v374_v11  ;;  %v629_v24 = vmax.f32 %v500_v16, 0.0  ;;  %v631_v26 = vmax.f32 %v541_v17, 0.0 }
  0xf0   : > { %v503_v23 = vpop.f32.mrf.mxu0  ;;  %v544_v12 = vpop.f32.mrf.mxu1 }
  0xf1   : > { %v630_v25 = vmax.f32 %v502_v20, 0.0  ;;  %v632_v27 = vmax.f32 %v543_v21, 0.0 }
  0xf2   : > { %v504_v28 = vpop.f32.mrf.mxu0  ;;  %v545_v29 = vpop.f32.mrf.mxu1 }
  0xf3   : > { %v1136_v30 = vpack.c.bf16 %v630_v25, %v629_v24  ;;  %v1137_v32 = vpack.c.bf16 %v632_v27, %v631_v26 }
  0xf4   : > { %v581_v33 = vpop.f32.mrf.mxu0  ;;  %v622_v34 = vpop.f32.mrf.mxu1 }
  0xf5   : > { %v661_v35 = vrot.slane %v1136_v30, %v1365_v22  ;;  %v668_v36 = vrot.slane %v1137_v32, %v1365_v22  ;;  %v582_v31 = vadd.f32 %v581_v33, %v374_v11  ;;  %v623_v37 = vadd.f32 %v622_v34, %v374_v11 }
  0xf6   : > { %v583_v38 = vpop.f32.mrf.mxu0  ;;  %v624_v39 = vpop.f32.mrf.mxu1 }
  0xf7   : > { %v669_v40 = vcombine.low %v661_v35, %v668_v36  ;;  %v584_v41 = vadd.f32 %v583_v38, %v374_v11  ;;  %v625_v42 = vadd.f32 %v624_v39, %v374_v11  ;;  %v633_v45 = vmax.f32 %v582_v31, 0.0 }
  0xf8   : > { %v585_v43 = vpop.f32.mrf.mxu0  ;;  %v626_v44 = vpop.f32.mrf.mxu1  ;;  %v635_v47 = vmax.f32 %v623_v37, 0.0 }
  0xf9   : > { %689 = vst [vmem:[%s1375_s14] sm:$0xff] %v669_v40  ;;  %v634_v46 = vmax.f32 %v584_v41, 0.0  ;;  %v636_v48 = vmax.f32 %v625_v42, 0.0 }
  0xfa   : > { %v586_v49 = vpop.f32.mrf.mxu0  ;;  %v627_v50 = vpop.f32.mrf.mxu1 }
  0xfb   : > { %v1138_v51 = vpack.c.bf16 %v634_v46, %v633_v45  ;;  %v1139_v53 = vpack.c.bf16 %v636_v48, %v635_v47 }
  0xfc   : > { %v811_v54 = vpop.f32.mrf.mxu0  ;;  %v852_v55 = vpop.f32.mrf.mxu1 }
  0xfd   : > { %v678_v56 = vrot.slane %v1138_v51, %v1365_v22  ;;  %v685_v57 = vrot.slane %v1139_v53, %v1365_v22  ;;  %v812_v60 = vadd.f32 %v811_v54, %v697_v52  ;;  %v853_v62 = vadd.f32 %v852_v55, %v697_v52 }
  0xfe   : > { %v813_v58 = vpop.f32.mrf.mxu0  ;;  %v854_v59 = vpop.f32.mrf.mxu1 }
  0xff   : > { %v814_v61 = vadd.f32 %v813_v58, %v697_v52  ;;  %v855_v63 = vadd.f32 %v854_v59, %v697_v52  ;;  %v686_v0 = vcombine.low %v678_v56, %v685_v57 }
 0x100   : > { %v815_v1 = vpop.f32.mrf.mxu0  ;;  %v856_v2 = vpop.f32.mrf.mxu1 }
 0x101   : > { %v1148_v3 = vpack.c.bf16 %v814_v61, %v812_v60  ;;  %v1149_v4 = vpack.c.bf16 %v855_v63, %v853_v62  ;;  %690 = vst [vmem:[%s1375_s14 + $0x8] sm:$0xff] %v686_v0 }
 0x102   : > { %v816_v5 = vpop.f32.mrf.mxu0  ;;  %v857_v6 = vpop.f32.mrf.mxu1 }
 0x103   : > { %v965_v7 = vrot.slane %v1148_v3, %v1365_v22  ;;  %v972_v8 = vrot.slane %v1149_v4, %v1365_v22 }
 0x104   : > { %v893_v9 = vpop.f32.mrf.mxu0  ;;  %v934_v10 = vpop.f32.mrf.mxu1 }
 0x105   : > { %v973_v11 = vcombine.low %v965_v7, %v972_v8  ;;  %v894_v15 = vadd.f32 %v893_v9, %v697_v52  ;;  %v935_v16 = vadd.f32 %v934_v10, %v697_v52 }
 0x106   : > { %v895_v13 = vpop.f32.mrf.mxu0  ;;  %v936_v14 = vpop.f32.mrf.mxu1 }
 0x107   : > { %993 = vst [vmem:[%s354_s17] sm:$0xff] %v973_v11  ;;  %v896_v17 = vadd.f32 %v895_v13, %v697_v52  ;;  %v937_v18 = vadd.f32 %v936_v14, %v697_v52 }
 0x108   : > { %v897_v19 = vpop.f32.mrf.mxu0  ;;  %v938_v20 = vpop.f32.mrf.mxu1 }
 0x109   : > { %v1150_v21 = vpack.c.bf16 %v896_v17, %v894_v15  ;;  %v1151_v23 = vpack.c.bf16 %v937_v18, %v935_v16 }
 0x10a   : > { %v898_v12 = vpop.f32.mrf.mxu0  ;;  %v939_v24 = vpop.f32.mrf.mxu1 }
 0x10b   : > { %v982_v25 = vrot.slane %v1150_v21, %v1365_v22  ;;  %v989_v26 = vrot.slane %v1151_v23, %v1365_v22 }
 0x10d   : > { %v990_v27 = vcombine.low %v982_v25, %v989_v26 }
 0x10f   : > { %994 = vst [vmem:[%s354_s17 + $0x8] sm:$0xff] %v990_v27 }
 0x110 PF: > { %p15_p9 = scmp.ge.s32.totalorder %s1278_s28, 4   ;;  %s1408_s24 = smov %s1212_s25 }
 0x111   : > { %s1409_s25 = smov %s1287_s8  ;;  %s1410_s26 = smov %s1278_s28 }
 0x112   :  { %17 = sbr.rel (!%p15_p9) target bundleno = 2 (0x2), region = 117 }

// kernel: _lambda_.15
= control target key start
LH: loop header
LB: loop body
LE: loop exit
PB: predicated region body
PF: predicated region fallthrough
CT: control target
= control target key end

     0   :  { %s547_s12 = smov 0   ;;  %s549_s13 = smov 0   ;;  %s605_s0 = inlined_call_operand.vmem [shape: bf16[4,80], index: 0, kind: input, shape index: {}]   ;;  %s606_s1 = inlined_call_operand.vmem [shape: bf16[80,512], index: 1, kind: input, shape index: {}]   ;;  %s607_s2 = inlined_call_operand.vmem [shape: f32[4,1], index: 2, kind: input, shape index: {}]   ;;  %s608_s3 = inlined_call_operand.vmem [shape: bf16[4,512], index: 3, kind: output, shape index: {}]  }
   0x1   :  { %s551_s14 = smov 0  }
   0x2 LB: > { %s434_s15 = sadd.s32 4294967295, %s524_s14   ;;  %s564_s16 = sadd.s32 1, %s524_s14   ;;  %s524_s14 = sphi %s551_s14, %s611_s14   ;;  %s520_s13 = sphi %s549_s13, %s610_s13   ;;  %s516_s12 = sphi %s547_s12, %s609_s12  }
   0x3   : > { %s38_s17 = ssub.s32 %s524_s14, %s564_s16  ;;  %s41_s18 = sadd.s32 1, %s520_s13 }
   0x4   : > { %p39_p0 = scmp.eq.s32.totalorder %s38_s17, 0  ;;  %p48_p1 = scmp.ne.s32.totalorder %s520_s13, %s516_s12 }
   0x5   : > { %p49_p2 = scmp.eq.s32.totalorder %s524_s14, 0  ;;  %p437_p4 = scmp.ge.s32.totalorder %s524_s14, 2 }
   0x6   : > { %s573_s19 = scalar_select %p39_p0, %s520_s13, %s41_s18  }
   0x7   : > { %p50_p3 = por %p49_p2, %p48_p1  ;;  %127 = sbr.rel (%p437_p4) target bundleno = 21 (0x15), region = 24 }
   0xc   : > { %130 = sbr.rel (!%p50_p3) target bundleno = 21 (0x15), region = 28  ;;  %s132_s20 = sand.u32 (%p50_p3), 1, %s520_s13  }
   0xd   : > { %s458_s21 = sshll.u32 (%p50_p3), %s524_s14, 3  ;;  %s459_s22 = smul.u32 (%p50_p3), 80, %s132_s20 }
   0xe   : > { %s137_s25 = scalar_lea.vmem (%p50_p3), %s606_s1, %s458_s21 }
   0xf   : > { %v184_v0 = vld [vmem:[%s137_s25] sm:$0xff] (%p50_p3)  ;;  %v186_v1 = vld [vmem:[%s137_s25 + $0x10] sm:$0xff] (%p50_p3)  ;;  %s134_s26 = scalar_lea.vmem (%p50_p3), [#allocation2], %s459_s22 }
  0x10   : > { %v188_v2 = vld [vmem:[%s137_s25 + $0x20] sm:$0xff] (%p50_p3)  ;;  %v190_v3 = vld [vmem:[%s137_s25 + $0x30] sm:$0xff] (%p50_p3)  ;;  %185 = vst [vmem:[%s134_s26] sm:$0xff] (%p50_p3), %v184_v0  ;;  %187 = vst [vmem:[%s134_s26 + $0x8] sm:$0xff] (%p50_p3), %v186_v1 }
  0x11   : > { %v192_v4 = vld [vmem:[%s137_s25 + $0x40] sm:$0xff]  ;;  %v194_v5 = vld [vmem:[%s137_s25 + $0x50] sm:$0xff]  ;;  %189 = vst [vmem:[%s134_s26 + $0x10] sm:$0xff] %v188_v2  ;;  %191 = vst [vmem:[%s134_s26 + $0x18] sm:$0xff] %v190_v3 }
  0x12   : > { %193 = vst [vmem:[%s134_s26 + $0x20] sm:$0xff] %v192_v4  ;;  %195 = vst [vmem:[%s134_s26 + $0x28] sm:$0xff] %v194_v5  ;;  %v196_v6 = vld [vmem:[%s137_s25 + $0x60] sm:$0xff]  ;;  %v198_v7 = vld [vmem:[%s137_s25 + $0x70] sm:$0xff] }
  0x13   : > { %v200_v8 = vld [vmem:[%s137_s25 + $0x80] sm:$0xff]  ;;  %197 = vst [vmem:[%s134_s26 + $0x30] sm:$0xff] %v196_v6  ;;  %199 = vst [vmem:[%s134_s26 + $0x38] sm:$0xff] %v198_v7  ;;  %v202_v9 = vld [vmem:[%s137_s25 + $0x90] sm:$0xff] }
  0x14   : > { %201 = vst [vmem:[%s134_s26 + $0x40] sm:$0xff] %v200_v8  ;;  %203 = vst [vmem:[%s134_s26 + $0x48] sm:$0xff] %v202_v9 }
  0x15 PF: > { %p440_p5 = scmp.ge.s32.totalorder %s524_s14, 1  ;;  %p208_p6 = scmp.lt.s32.totalorder %s524_s14, 3 }
  0x17   : > { %p209_p7 = pnand %p440_p5, %p208_p6 }
  0x18   : > { %s215_s27 = sand.u32 (!%p209_p7), 1, %s516_s12   ;;  %s441_s7 = sshll.u32 (!%p209_p7), %s434_s15, 1 }
  0x19   : > { %212 = sbr.rel (%p209_p7) target bundleno = 252 (0xfc), region = 66  ;;  %p240_p8 = scmp.lt.s32.totalorder (!%p209_p7), %s441_s7, 3 }
  0x1a   : > { %s460_s28 = smul.u32 (!%p209_p7), 80, %s215_s27 }
  0x1c   : > { %s217_s4 = scalar_lea.vmem (!%p209_p7), [#allocation2], %s460_s28 }
  0x1e   : > { %v526_v10 = vmov 0   ;;  %v257_v11 = vld [vmem:[%s607_s2] sm:$0xf]  ;;  %v487_v12 = vld [vmem:[%s217_s4 + $0x44] ss:$8 sps:$4 sm:$0xff]   ;;  %vm313_vm0 = vcmask 654336  }
  0x1f   : > { %349 = vmatprep.mubr.bf16.mxu0 %v526_v10  ;;  %486 = vset.pattern.permute.xlu0 %v526_v10  ;;  %v489_v13 = vld [vmem:[%s217_s4 + $0x40] ss:$8 sps:$4 sm:$0xff]   ;;  %v490_v14 = vld [vmem:[%s217_s4 + $0x34] ss:$8 sps:$4 sm:$0xff]   ;;  %v492_v15 = vld [vmem:[%s217_s4 + $0x30] ss:$8 sps:$4 sm:$0xff]  }
  0x20   : > { %260 = vperm.xlu0 %486, %v257_v11   ;;  %323 = vmatprep.subr.bf16.mxu0 %v487_v12  ;;  %v493_v16 = vld [vmem:[%s217_s4 + $0x24] ss:$8 sps:$4 sm:$0xff]   ;;  %v495_v17 = vld [vmem:[%s217_s4 + $0x20] ss:$8 sps:$4 sm:$0xff]   ;;  %v496_v18 = vld [vmem:[%s217_s4 + $0x14] ss:$8 sps:$4 sm:$0xff]  }
  0x21   : > { %324 = vmatpush1.bf16.msra.mxu0 %v489_v13  ;;  %v498_v19 = vld [vmem:[%s217_s4 + $0x10] ss:$8 sps:$4 sm:$0xff]   ;;  %v499_v20 = vld [vmem:[%s217_s4 + $0x4] ss:$8 sps:$4 sm:$0xff]   ;;  %v501_v21 = vld [vmem:[%s217_s4] ss:$8 sps:$4 sm:$0xff]  }
  0x22   : > { %325 = vmatprep.subr.bf16.mxu0 %v490_v14  ;;  %v246_v22 = vld [vmem:[%s605_s0] sm:$0x3]  ;;  %s613_s7 = smov (!%p240_p8, %s441_s7), 3 }
  0x23   : > { %s442_s8 = sshll.u32 %s613_s7, 1 }
  0x24   : > { %s243_s11 = scalar_lea.vmem %s608_s3, %s442_s8 }
  0x25   : > { %326 = vmatpush1.bf16.msra.mxu0 %v492_v15 }
  0x26   : > { %327 = vmatprep.subr.bf16.mxu0 %v493_v16 }
  0x29   : > { %328 = vmatpush1.bf16.msra.mxu0 %v495_v17 }
  0x2a   : > { %329 = vmatprep.subr.bf16.mxu0 %v496_v18 }
  0x2d   : > { %330 = vmatpush1.bf16.msra.mxu0 %v498_v19 }
  0x2e   : > { %331 = vmatprep.subr.bf16.mxu0 %v499_v20 }
  0x31   : > { %332 = vmatpush1.bf16.msra.mxu0 %v501_v21 }
  0x34   : > { %453 = vmatmul.mubr.msk.bf16.vlgmr.msra.gmra.mxu0 %vm313_vm0, %v246_v22 }
  0x9b   : > { %v261_v23 = vpop.permute.xlu0 %260 }
  0xf4   : > { %v351_v24 = vpop.f32.mrf.mxu0 }
  0xf5   : > { %v352_v26 = vadd.f32 %v351_v24, %v261_v23 }
  0xf6   : > { %v353_v25 = vpop.f32.mrf.mxu0 }
  0xf7   : > { %v354_v27 = vadd.f32 %v353_v25, %v261_v23 }
  0xf8   : > { %v355_v28 = vpop.f32.mrf.mxu0 }
  0xf9   : > { %v454_v29 = vpack.c.bf16 %v354_v27, %v352_v26 }
  0xfa   : > { %v356_v30 = vpop.f32.mrf.mxu0 }
  0xfb   : > { %455 = vst.sshfl [vmem:[%s243_s11] sm:$0x33 pattern:$0x76325410] %v454_v29 }
  0xfc PF: > { %p10_p9 = scmp.ge.s32.totalorder %s564_s16, 4   ;;  %s609_s12 = smov %s520_s13 }
  0xfd   : > { %s610_s13 = smov %s573_s19  ;;  %s611_s14 = smov %s564_s16 }
  0xfe   :  { %12 = sbr.rel (!%p10_p9) target bundleno = 2 (0x2), region = 105 }

// kernel: _lambda_.21
= control target key start
LH: loop header
LB: loop body
LE: loop exit
PB: predicated region body
PF: predicated region fallthrough
CT: control target
= control target key end

     0   :  { %v175_v0 = vmov 0   ;;  %vm100_vm0 = vcmask 130048   ;;  %s232_s1 = inlined_call_operand.vmem [shape: bf16[144,128], index: 1, kind: input, shape index: {}]   ;;  %s233_s0 = inlined_call_operand.vmem [shape: bf16[8,144], index: 0, kind: input, shape index: {}]   ;;  %s234_s2 = inlined_call_operand.vmem [shape: f32[8,1], index: 2, kind: input, shape index: {}]   ;;  %s235_s3 = inlined_call_operand.vmem [shape: f32[8,128], index: 3, kind: output, shape index: {}]  }
   0x1   :  { %104 = vmatprep.subr.bf16.mxu0 %v175_v0  ;;  %v164_v1 = vld [vmem:[%s232_s1 + $0x38] sm:$0xff]   ;;  %163 = vset.pattern.permute.xlu0 %v175_v0  ;;  %v165_v2 = vld [vmem:[%s232_s1 + $0x30] sm:$0xff]   ;;  %v166_v3 = vld [vmem:[%s232_s1 + $0x28] sm:$0xff]  }
   0x2   :  { %105 = vmatpush1.bf16.msra.mxu0 %v164_v1  ;;  %v15_v4 = vld [vmem:[%s233_s0] sm:$0xff]  ;;  %v168_v8 = vld [vmem:[%s232_s1 + $0x18] sm:$0xff]   ;;  %v169_v9 = vld [vmem:[%s232_s1 + $0x10] sm:$0xff]  }
   0x3   :  { %106 = vmatprep.subr.bf16.mxu0 %v175_v0  ;;  %v34_v5 = vld [vmem:[%s234_s2] sm:$0xff]  ;;  %v151_v7 = vcombine.high %v15_v4, %v15_v4  ;;  %v170_v10 = vld [vmem:[%s232_s1 + $0x8] sm:$0xff]   ;;  %v150_v13 = vcombine.low %v15_v4, %v15_v4 }
   0x4   :  { %v167_v6 = vld [vmem:[%s232_s1 + $0x20] sm:$0xff]   ;;  %37 = vperm.xlu0 %163, %v34_v5  }
   0x5   :  { %161 = vmatprep.mubr.msk.bf16.mxu0 %vm100_vm0, %v151_v7  ;;  %v171_v11 = vld [vmem:[%s232_s1] sm:$0xff]  }
   0x6   :  { %107 = vmatpush1.bf16.msra.mxu0 %v165_v2  ;;  %v172_v12 = vld [vmem:[%s232_s1 + $0x40] sm:$0xff]  }
   0x7   :  { %108 = vmatprep.subr.bf16.mxu0 %v175_v0 }
   0xa   :  { %109 = vmatpush1.bf16.msra.mxu0 %v166_v3 }
   0xb   :  { %110 = vmatprep.subr.bf16.mxu0 %v175_v0 }
   0xe   :  { %111 = vmatpush1.bf16.msra.mxu0 %v167_v6 }
   0xf   :  { %112 = vmatprep.subr.bf16.mxu0 %v175_v0 }
  0x12   :  { %113 = vmatpush1.bf16.msra.mxu0 %v168_v8 }
  0x13   :  { %114 = vmatprep.subr.bf16.mxu0 %v175_v0 }
  0x16   :  { %115 = vmatpush1.bf16.msra.mxu0 %v169_v9 }
  0x17   :  { %116 = vmatprep.subr.bf16.mxu0 %v175_v0 }
  0x1a   :  { %117 = vmatpush1.bf16.msra.mxu0 %v170_v10 }
  0x1b   :  { %118 = vmatprep.subr.bf16.mxu0 %v175_v0 }
  0x1e   :  { %119 = vmatpush1.bf16.msra.mxu0 %v171_v11 }
  0x1f   :  { %134 = vmatprep.subr.bf16.mxu0 %v175_v0 }
  0x22   :  { %135 = vmatpush2.bf16.msra.mxu0 %v172_v12 }
  0x25   :  { %137 = vmatmul.mubr.bf16.vlgmr.msra.gmra.mxu0 %v150_v13 }
  0x7f   :  { %v38_v14 = vpop.permute.xlu0 %37 }
  0xe5   :  { %v138_v15 = vpop.f32.mrf.mxu0 }
  0xe6   :  { %v139_v16 = vadd.f32 %v138_v15, %v38_v14 }
  0xe7   :  { %v140_v17 = vpop.f32.mrf.mxu0 }
  0xe8   :  { %v144_v18 = vmax.f32 %v139_v16, 0.0 }
  0xe9   :  { %v141_v19 = vpop.f32.mrf.mxu0 }
  0xea   :  { %145 = vst [vmem:[%s235_s3] sm:$0xff] %v144_v18 }
  0xeb   :  { %v142_v20 = vpop.f32.mrf.mxu0 }

// kernel: _lambda_.16
= control target key start
LH: loop header
LB: loop body
LE: loop exit
PB: predicated region body
PF: predicated region fallthrough
CT: control target
= control target key end

     0   :  { %s787_s24 = smov 0   ;;  %s789_s25 = smov 0   ;;  %s865_s0 = inlined_call_operand.vmem [shape: bf16[36,512], index: 0, kind: input, shape index: {}]   ;;  %s866_s1 = inlined_call_operand.vmem [shape: bf16[4,512], index: 1, kind: input, shape index: {}]   ;;  %s867_s2 = inlined_call_operand.vmem [shape: bf16[8,36], index: 2, kind: input, shape index: {}]   ;;  %s868_s3 = inlined_call_operand.vmem [shape: f32[8,1], index: 3, kind: input, shape index: {}]   ;;  %s869_s4 = inlined_call_operand.vmem [shape: bf16[8,4], index: 4, kind: input, shape index: {}]   ;;  %s870_s5 = inlined_call_operand.vmem [shape: f32[8,1], index: 5, kind: input, shape index: {}]   ;;  %s871_s6 = inlined_call_operand.vmem [shape: bf16[8,512], index: 6, kind: output, shape index: {0}]   ;;  %s872_s7 = inlined_call_operand.vmem [shape: bf16[8,512], index: 7, kind: output, shape index: {1}]  }
   0x1   :  { %s791_s26 = smov 0  }
   0x2 LB: > { %s655_s27 = sadd.s32 4294967295, %s744_s26   ;;  %s804_s28 = sadd.s32 1, %s744_s26   ;;  %s744_s26 = sphi %s791_s26, %s875_s26   ;;  %s740_s25 = sphi %s789_s25, %s874_s25   ;;  %s736_s24 = sphi %s787_s24, %s873_s24  }
   0x3   : > { %s22_s29 = ssub.s32 %s744_s26, %s804_s28  ;;  %s25_s30 = sadd.s32 1, %s740_s25 }
   0x4   : > { %p23_p0 = scmp.eq.s32.totalorder %s22_s29, 0  ;;  %p32_p1 = scmp.ne.s32.totalorder %s740_s25, %s736_s24 }
   0x5   : > { %p33_p2 = scmp.eq.s32.totalorder %s744_s26, 0  ;;  %p658_p4 = scmp.ge.s32.totalorder %s744_s26, 2 }
   0x6   : > { %s813_s8 = scalar_select %p23_p0, %s740_s25, %s25_s30  }
   0x7   : > { %p34_p3 = por %p33_p2, %p32_p1  ;;  %232 = sbr.rel (%p658_p4) target bundleno = 19 (0x13), region = 32 }
   0xc   : > { %235 = sbr.rel (!%p34_p3) target bundleno = 19 (0x13), region = 36  ;;  %s237_s9 = sand.u32 (%p34_p3), 1, %s740_s25  }
   0xd   : > { %s683_s10 = sshll.u32 (%p34_p3), %s744_s26, 3  ;;  %s686_s11 = smul.u32 (%p34_p3), 40, %s237_s9 }
   0xe   : > { %s242_s14 = scalar_lea.vmem (%p34_p3), %s865_s0, %s683_s10 }
   0xf   : > { %v279_v0 = vld [vmem:[%s242_s14] sm:$0xff] (%p34_p3)  ;;  %v281_v1 = vld [vmem:[%s242_s14 + $0x10] sm:$0xff] (%p34_p3)  ;;  %s239_s15 = scalar_lea.vmem (%p34_p3), [#allocation2], %s686_s11 }
  0x10   : > { %v283_v2 = vld [vmem:[%s242_s14 + $0x20] sm:$0xff] (%p34_p3)  ;;  %v285_v3 = vld [vmem:[%s242_s14 + $0x30] sm:$0xff] (%p34_p3)  ;;  %280 = vst [vmem:[%s239_s15] sm:$0xff] (%p34_p3), %v279_v0  ;;  %282 = vst [vmem:[%s239_s15 + $0x8] sm:$0xff] (%p34_p3), %v281_v1 }
  0x11   : > { %v287_v4 = vld [vmem:[%s242_s14 + $0x40] sm:$0xff]  ;;  %284 = vst [vmem:[%s239_s15 + $0x10] sm:$0xff] %v283_v2  ;;  %286 = vst [vmem:[%s239_s15 + $0x18] sm:$0xff] %v285_v3 }
  0x12   : > { %288 = vst [vmem:[%s239_s15 + $0x20] sm:$0xff] %v287_v4 }
  0x13 PF: > { %p661_p5 = scmp.ge.s32.totalorder %s744_s26, 1  ;;  %p302_p6 = scmp.lt.s32.totalorder %s744_s26, 3 }
  0x15   : > { %p303_p7 = pnand %p661_p5, %p302_p6 }
  0x16   : > { %s309_s16 = sand.u32 (!%p303_p7), 1, %s736_s24   ;;  %s662_s17 = sshll.u32 (!%p303_p7), %s655_s27, 1 }
  0x17   : > { %306 = sbr.rel (%p303_p7) target bundleno = 247 (0xf7), region = 78  ;;  %p352_p8 = scmp.lt.s32.totalorder (!%p303_p7), %s662_s17, 3 }
  0x18   : > { %s687_s18 = smul.u32 (!%p303_p7), 40, %s309_s16 }
  0x1a   : > { %s311_s23 = scalar_lea.vmem (!%p303_p7), [#allocation2], %s687_s18 }
  0x1c   : > { %v746_v5 = vmov 0   ;;  %v376_v6 = vld [vmem:[%s868_s3] sm:$0xff]  ;;  %vm411_vm0 = vcmask 1041408   ;;  %s877_s17 = smov (!%p352_p8, %s662_s17), 3  ;;  %vm487_vm1 = vcmask 31744   ;;  %vm407_vm2 = vcmask 293888  }
  0x1d   : > { %529 = vmatprep.mubr.bf16.mxu1 %v746_v5  ;;  %450 = vmatprep.mubr.bf16.mxu0 %v746_v5  ;;  %v472_v7 = vld [vmem:[%s870_s5] sm:$0xff]  ;;  %s663_s24 = sshll.u32 %s877_s17, 1  ;;  %s665_s12 = sshll.u32 %s877_s17, 2 }
  0x1e   : > { %713 = vset.pattern.permute.xlu0 %v746_v5  ;;  %v375_v8 = vld [vmem:[%s311_s23 + $0x20] sm:$0x33]  ;;  %v716_v11 = vld [vmem:[%s311_s23 + $0x14] ss:$8 sps:$4 sm:$0xff]   ;;  %s355_s29 = scalar_lea.vmem %s866_s1, %s663_s24  ;;  %v718_v14 = vld [vmem:[%s311_s23 + $0x10] ss:$8 sps:$4 sm:$0xff]   ;;  %s367_s15 = scalar_lea.vmem %s872_s7, %s665_s12 }
  0x1f   : > { %379 = vperm.xlu0 %713, %v376_v6   ;;  %v673_v9 = vcombine.high %v375_v8, %v375_v8  ;;  %v672_v10 = vcombine.low %v375_v8, %v375_v8  ;;  %v677_v13 = vld.sshfl [vmem:[%s355_s29] sm:$0x33 pattern:$0x76325410]  ;;  %v719_v17 = vld [vmem:[%s311_s23 + $0x4] ss:$8 sps:$4 sm:$0xff]   ;;  %s361_s18 = scalar_lea.vmem %s871_s6, %s665_s12 }
  0x20   : > { %v486_v15 = vcombine.high %v677_v13, %v677_v13  ;;  %v492_v16 = vsel %vm411_vm0, %v677_v13, 0  ;;  %v470_v18 = vld [vmem:[%s869_s4] sm:$0xf] }
  0x21   : > { %674 = vmatprep.subr.msk.bf16.mxu0 %vm411_vm0, %v673_v9  ;;  %v413_v12 = vsel %vm411_vm0, %v672_v10, 0  ;;  %v721_v19 = vld [vmem:[%s311_s23] ss:$8 sps:$4 sm:$0xff]  }
  0x22   : > { %429 = vmatpush1.bf16.msra.mxu0 %v413_v12  ;;  %678 = vmatprep.subr.msk.bf16.mxu1 %vm411_vm0, %v486_v15  ;;  %v370_v20 = vld [vmem:[%s867_s2] sm:$0xf] }
  0x23   : > { %475 = vperm.xlu0 %713, %v472_v7   ;;  %430 = vmatprep.subr.bf16.mxu0 %v716_v11 }
  0x24   : > { %512 = vmatpush1.bf16.msra.mxu1 %v492_v16 }
  0x26   : > { %431 = vmatpush1.bf16.msra.mxu0 %v718_v14 }
  0x27   : > { %432 = vmatprep.subr.bf16.mxu0 %v719_v17  ;;  %679 = vmatmul.mubr.msk.bf16.vlgmr.msra.gmra.mxu1 %vm487_vm1, %v470_v18 }
  0x2a   : > { %433 = vmatpush1.bf16.msra.mxu0 %v721_v19 }
  0x2d   : > { %675 = vmatmul.mubr.msk.bf16.vlgmr.msra.gmra.mxu0 %vm407_vm2, %v370_v20 }
  0x9a   : > { %v380_v21 = vpop.permute.xlu0 %379 }
  0x9e   : > { %v476_v22 = vpop.permute.xlu0 %475 }
  0xe7   : > { %v531_v23 = vpop.f32.mrf.mxu1 }
  0xe8   : > { %v532_v24 = vadd.f32 %v531_v23, %v476_v22 }
  0xe9   : > { %v533_v25 = vpop.f32.mrf.mxu1 }
  0xea   : > { %v534_v26 = vadd.f32 %v533_v25, %v476_v22 }
  0xeb   : > { %v535_v28 = vpop.f32.mrf.mxu1 }
  0xec   : > { %v685_v29 = vpack.c.bf16 %v534_v26, %v532_v24 }
  0xed   : > { %v452_v27 = vpop.f32.mrf.mxu0  ;;  %v536_v32 = vpop.f32.mrf.mxu1 }
  0xee   : > { %v453_v30 = vadd.f32 %v452_v27, %v380_v21  ;;  %546 = vst [vmem:[%s367_s15] sm:$0xff] %v685_v29 }
  0xef   : > { %v454_v31 = vpop.f32.mrf.mxu0 }
  0xf0   : > { %v455_v33 = vadd.f32 %v454_v31, %v380_v21  ;;  %v459_v35 = vmax.f32 %v453_v30, 0.0 }
  0xf1   : > { %v456_v34 = vpop.f32.mrf.mxu0 }
  0xf2   : > { %v460_v36 = vmax.f32 %v455_v33, 0.0 }
  0xf3   : > { %v457_v37 = vpop.f32.mrf.mxu0 }
  0xf4   : > { %v684_v38 = vpack.c.bf16 %v460_v36, %v459_v35 }
  0xf6   : > { %469 = vst [vmem:[%s361_s18] sm:$0xff] %v684_v38 }
  0xf7 PF: > { %p15_p9 = scmp.ge.s32.totalorder %s804_s28, 4   ;;  %s873_s24 = smov %s740_s25 }
  0xf8   : > { %s874_s25 = smov %s813_s8  ;;  %s875_s26 = smov %s804_s28 }
  0xf9   :  { %17 = sbr.rel (!%p15_p9) target bundleno = 2 (0x2), region = 132 }

// kernel: _lambda_.17
= control target key start
LH: loop header
LB: loop body
LE: loop exit
PB: predicated region body
PF: predicated region fallthrough
CT: control target
= control target key end

     0   :  { %v185_v0 = vmov 0   ;;  %vm108_vm0 = vcmask 261120   ;;  %s245_s1 = inlined_call_operand.vmem [shape: bf16[160,128], index: 1, kind: input, shape index: {}]   ;;  %s246_s0 = inlined_call_operand.vmem [shape: bf16[8,160], index: 0, kind: input, shape index: {}]   ;;  %s247_s2 = inlined_call_operand.vmem [shape: f32[8,1], index: 2, kind: input, shape index: {}]   ;;  %s248_s3 = inlined_call_operand.vmem [shape: bf16[8,128], index: 3, kind: output, shape index: {}]  }
   0x1   :  { %112 = vmatprep.subr.bf16.mxu0 %v185_v0  ;;  %v173_v1 = vld [vmem:[%s245_s1 + $0x38] sm:$0xff]   ;;  %172 = vset.pattern.permute.xlu0 %v185_v0  ;;  %v174_v2 = vld [vmem:[%s245_s1 + $0x30] sm:$0xff]   ;;  %v175_v3 = vld [vmem:[%s245_s1 + $0x28] sm:$0xff]  }
   0x2   :  { %113 = vmatpush1.bf16.msra.mxu0 %v173_v1  ;;  %v176_v4 = vld [vmem:[%s245_s1 + $0x20] sm:$0xff]   ;;  %v177_v8 = vld [vmem:[%s245_s1 + $0x18] sm:$0xff]   ;;  %v178_v9 = vld [vmem:[%s245_s1 + $0x10] sm:$0xff]  }
   0x3   :  { %114 = vmatprep.subr.bf16.mxu0 %v185_v0  ;;  %v15_v5 = vld [vmem:[%s246_s0] sm:$0xff]  ;;  %v179_v10 = vld [vmem:[%s245_s1 + $0x8] sm:$0xff]  }
   0x4   :  { %v36_v6 = vld [vmem:[%s247_s2] sm:$0xff]  ;;  %v159_v7 = vcombine.high %v15_v5, %v15_v5  ;;  %v181_v12 = vld [vmem:[%s245_s1 + $0x48] sm:$0xff]   ;;  %v158_v14 = vcombine.low %v15_v5, %v15_v5 }
   0x5   :  { %39 = vperm.xlu0 %172, %v36_v6   ;;  %v180_v11 = vld [vmem:[%s245_s1] sm:$0xff]  }
   0x6   :  { %115 = vmatpush1.bf16.msra.mxu0 %v174_v2  ;;  %170 = vmatprep.mubr.msk.bf16.mxu0 %vm108_vm0, %v159_v7  ;;  %v182_v13 = vld [vmem:[%s245_s1 + $0x40] sm:$0xff]  }
   0x7   :  { %116 = vmatprep.subr.bf16.mxu0 %v185_v0 }
   0xa   :  { %117 = vmatpush1.bf16.msra.mxu0 %v175_v3 }
   0xb   :  { %118 = vmatprep.subr.bf16.mxu0 %v185_v0 }
   0xe   :  { %119 = vmatpush1.bf16.msra.mxu0 %v176_v4 }
   0xf   :  { %120 = vmatprep.subr.bf16.mxu0 %v185_v0 }
  0x12   :  { %121 = vmatpush1.bf16.msra.mxu0 %v177_v8 }
  0x13   :  { %122 = vmatprep.subr.bf16.mxu0 %v185_v0 }
  0x16   :  { %123 = vmatpush1.bf16.msra.mxu0 %v178_v9 }
  0x17   :  { %124 = vmatprep.subr.bf16.mxu0 %v185_v0 }
  0x1a   :  { %125 = vmatpush1.bf16.msra.mxu0 %v179_v10 }
  0x1b   :  { %126 = vmatprep.subr.bf16.mxu0 %v185_v0 }
  0x1e   :  { %127 = vmatpush1.bf16.msra.mxu0 %v180_v11 }
  0x1f   :  { %140 = vmatprep.subr.bf16.mxu0 %v185_v0 }
  0x22   :  { %141 = vmatpush2.bf16.msra.mxu0 %v181_v12 }
  0x23   :  { %142 = vmatprep.subr.bf16.mxu0 %v185_v0 }
  0x26   :  { %143 = vmatpush2.bf16.msra.mxu0 %v182_v13 }
  0x29   :  { %145 = vmatmul.mubr.bf16.vlgmr.msra.gmra.mxu0 %v158_v14 }
  0x80   :  { %v40_v15 = vpop.permute.xlu0 %39 }
  0xe9   :  { %v146_v16 = vpop.f32.mrf.mxu0 }
  0xea   :  { %v147_v17 = vadd.f32 %v146_v16, %v40_v15 }
  0xeb   :  { %v148_v18 = vpop.f32.mrf.mxu0 }
  0xec   :  { %v152_v19 = vpack.c.bf16 %v147_v17, %v147_v17 }
  0xed   :  { %v149_v20 = vpop.f32.mrf.mxu0 }
  0xee   :  { %153 = vst [vmem:[%s248_s3] sm:$0xf] %v152_v19 }
  0xef   :  { %v150_v21 = vpop.f32.mrf.mxu0 }

// kernel: _lambda_.22
= control target key start
LH: loop header
LB: loop body
LE: loop exit
PB: predicated region body
PF: predicated region fallthrough
CT: control target
= control target key end

     0   :  { %v365_v1 = vmov 0.0   ;;  %vm366_vm0 = vmmov 0   ;;  %v367_v3 = vmov 0   ;;  %vm190_vm1 = vcmask 261120   ;;  %s466_s1 = inlined_call_operand.vmem [shape: bf16[288,32], index: 1, kind: input, shape index: {}]   ;;  %s467_s0 = inlined_call_operand.vmem [shape: bf16[16,288], index: 0, kind: input, shape index: {}]   ;;  %s468_s2 = inlined_call_operand.vmem [shape: f32[16,1], index: 2, kind: input, shape index: {}]   ;;  %s469_s3 = inlined_call_operand.vmem [shape: f32[16,32], index: 3, kind: output, shape index: {}]  }
   0x1   :  { %v343_v0 = vld [vmem:[%s466_s1 + $0x78] sm:$0xff]   ;;  %331 = vmatprep.subr.bf16.mxu1 %v365_v1  ;;  %335 = vmatprep.mubr.msk.bf16.mxu1 %vm366_vm0, %v365_v1  ;;  %v345_v4 = vld [vmem:[%s466_s1 + $0x70] sm:$0xff]   ;;  %v347_v6 = vld [vmem:[%s466_s1 + $0x68] sm:$0xff]  }
   0x2   :  { %v344_v2 = vld [vmem:[%s466_s1 + $0x38] sm:$0xff]   ;;  %342 = vset.pattern.permute.xlu0 %v367_v3  ;;  %306 = vmatprep.subr.bf16.mxu0 %v343_v0  ;;  %v346_v5 = vld [vmem:[%s466_s1 + $0x30] sm:$0xff]   ;;  %v348_v7 = vld [vmem:[%s466_s1 + $0x28] sm:$0xff]  }
   0x3   :  { %307 = vmatpush3.bf16.msra.mxu0 %v344_v2  ;;  %v349_v8 = vld [vmem:[%s466_s1 + $0x60] sm:$0xff]   ;;  %v351_v10 = vld [vmem:[%s466_s1 + $0x58] sm:$0xff]   ;;  %v357_v11 = vld [vmem:[%s466_s1 + $0x88] sm:$0xff]  }
   0x4   :  { %308 = vmatprep.subr.bf16.mxu0 %v345_v4  ;;  %v350_v9 = vld [vmem:[%s466_s1 + $0x20] sm:$0xff]   ;;  %v352_v12 = vld [vmem:[%s466_s1 + $0x18] sm:$0xff]   ;;  %v353_v13 = vld [vmem:[%s466_s1 + $0x50] sm:$0xff]   ;;  %332 = vmatpush3.bf16.msra.mxu1 %v357_v11 }
   0x5   :  { %333 = vmatprep.subr.bf16.mxu1 %v365_v1  ;;  %v360_v14 = vld [vmem:[%s466_s1 + $0x80] sm:$0xff]   ;;  %v354_v15 = vld [vmem:[%s466_s1 + $0x10] sm:$0xff]   ;;  %v355_v17 = vld [vmem:[%s466_s1 + $0x48] sm:$0xff]  }
   0x6   :  { %v363_v16 = vld [vmem:[%s467_s0 + $0x4] ss:$12 sps:$4 sm:$0xff]   ;;  %v364_v18 = vld [vmem:[%s467_s0 + $0x8] ss:$12 sps:$4 sm:$0xff]   ;;  %v361_v24 = vld [vmem:[%s467_s0] ss:$12 sps:$4 sm:$0xff]  }
   0x7   :  { %309 = vmatpush3.bf16.msra.mxu0 %v346_v5  ;;  %v55_v19 = vld [vmem:[%s468_s2] sm:$0xff]  ;;  %226 = vmatprep.mubr.bf16.mxu0 %v363_v16  ;;  %v56_v20 = vld [vmem:[%s468_s2 + $0x8] sm:$0xff] }
   0x8   :  { %310 = vmatprep.subr.bf16.mxu0 %v347_v6  ;;  %334 = vmatpush3.bf16.msra.mxu1 %v360_v14  ;;  %v356_v21 = vld [vmem:[%s466_s1 + $0x8] sm:$0xff]   ;;  %v358_v22 = vld [vmem:[%s466_s1 + $0x40] sm:$0xff]  }
   0x9   :  { %59 = vperm.xlu0 %342, %v55_v19   ;;  %v359_v23 = vld [vmem:[%s466_s1] sm:$0xff]  }
   0xb   :  { %311 = vmatpush3.bf16.msra.mxu0 %v348_v7  ;;  %336 = vmatmul.mubr.msk.bf16.vlgmr.msra.gmra.mxu1 %vm190_vm1, %v364_v18 }
   0xc   :  { %312 = vmatprep.subr.bf16.mxu0 %v349_v8 }
   0xd   :  { %64 = vperm.xlu0 %342, %v56_v20  }
   0xf   :  { %313 = vmatpush3.bf16.msra.mxu0 %v350_v9 }
  0x10   :  { %314 = vmatprep.subr.bf16.mxu0 %v351_v10 }
  0x13   :  { %315 = vmatpush3.bf16.msra.mxu0 %v352_v12 }
  0x14   :  { %316 = vmatprep.subr.bf16.mxu0 %v353_v13 }
  0x17   :  { %317 = vmatpush3.bf16.msra.mxu0 %v354_v15 }
  0x18   :  { %318 = vmatprep.subr.bf16.mxu0 %v355_v17 }
  0x1b   :  { %319 = vmatpush3.bf16.msra.mxu0 %v356_v21 }
  0x1c   :  { %320 = vmatprep.subr.bf16.mxu0 %v358_v22 }
  0x1f   :  { %321 = vmatpush3.bf16.msra.mxu0 %v359_v23 }
  0x22   :  { %227 = vmatmul.mubr.bf16.vlgmr.msra.gmra.mxu0 %v361_v24 }
  0x84   :  { %v60_v30 = vpop.permute.xlu0 %59 }
  0x88   :  { %v65_v38 = vpop.permute.xlu0 %64 }
  0xcb   :  { %v269_v25 = vpop.f32.mrf.mxu1 }
  0xcd   :  { %v337_v26 = vpop.f32.mrf.mxu1 }
  0xcf   :  { %v272_v27 = vpop.f32.mrf.mxu1 }
  0xd1   :  { %v338_v28 = vpop.f32.mrf.mxu1 }
  0xe2   :  { %v322_v29 = vpop.f32.mrf.mxu0 }
  0xe4   :  { %v323_v31 = vpop.f32.mrf.mxu0 }
  0xe5   :  { %v324_v32 = vadd.f32 %v323_v31, %v322_v29 }
  0xe6   :  { %v325_v33 = vpop.f32.mrf.mxu0 }
  0xe7   :  { %v229_v34 = vadd.f32 %v324_v32, %v60_v30 }
  0xe8   :  { %v326_v35 = vpop.f32.mrf.mxu0 }
  0xe9   :  { %v270_v36 = vadd.f32 %v269_v25, %v229_v34  ;;  %v327_v37 = vadd.f32 %v326_v35, %v325_v33 }
  0xeb   :  { %v276_v39 = vmax.f32 %v270_v36, 0.0  ;;  %v232_v40 = vadd.f32 %v327_v37, %v65_v38 }
  0xed   :  { %278 = vst.msk [vmem:[%s469_s3] sm:$0xff] %vm190_vm1, %v276_v39  ;;  %v273_v41 = vadd.f32 %v272_v27, %v232_v40 }
  0xef   :  { %v277_v42 = vmax.f32 %v273_v41, 0.0 }
  0xf1   :  { %279 = vst.msk [vmem:[%s469_s3 + $0x8] sm:$0xff] %vm190_vm1, %v277_v42 }

// kernel: _lambda_.18
= control target key start
LH: loop header
LB: loop body
LE: loop exit
PB: predicated region body
PF: predicated region fallthrough
CT: control target
= control target key end

     0   :  { %vm85_vm0 = vcmask 1043456   ;;  %v295_v0 = vmov 0.0   ;;  %vm296_vm1 = vmmov 0   ;;  %v297_v7 = vmov 0   ;;  %s380_s0 = inlined_call_operand.vmem [shape: bf16[72,128], index: 0, kind: input, shape index: {}]   ;;  %s381_s1 = inlined_call_operand.vmem [shape: bf16[8,128], index: 1, kind: input, shape index: {}]   ;;  %s382_s4 = inlined_call_operand.vmem [shape: bf16[16,8], index: 4, kind: input, shape index: {}]   ;;  %s383_s3 = inlined_call_operand.vmem [shape: f32[16,1], index: 3, kind: input, shape index: {}]   ;;  %s384_s5 = inlined_call_operand.vmem [shape: f32[16,1], index: 5, kind: input, shape index: {}]   ;;  %s385_s2 = inlined_call_operand.vmem [shape: bf16[16,72], index: 2, kind: input, shape index: {}]   ;;  %s386_s7 = inlined_call_operand.vmem [shape: bf16[16,128], index: 7, kind: output, shape index: {1}]   ;;  %s387_s6 = inlined_call_operand.vmem [shape: bf16[16,128], index: 6, kind: output, shape index: {0}]  }
   0x1   :  { %263 = vmatprep.subr.bf16.mxu0 %v295_v0  ;;  %v288_v1 = vld [vmem:[%s380_s0 + $0x20] ss:$0 sps:$4 sm:$0xff]   ;;  %277 = vmatprep.subr.bf16.mxu1 %v295_v0  ;;  %v289_v3 = vld [vmem:[%s380_s0 + $0x18] sm:$0xff]   ;;  %vm162_vm2 = vcmask 64512   ;;  %v290_v8 = vld [vmem:[%s380_s0 + $0x10] sm:$0xff]   ;;  %vm81_vm3 = vcmask 588800  }
   0x2   :  { %279 = vmatprep.mubr.msk.bf16.mxu1 %vm296_vm1, %v295_v0  ;;  %273 = vmatprep.mubr.msk.bf16.mxu0 %vm296_vm1, %v295_v0  ;;  %v87_v2 = vsel %vm85_vm0, %v288_v1, 0  ;;  %v144_v4 = vld [vmem:[%s381_s1] sm:$0xf]  ;;  %v38_v11 = vld [vmem:[%s383_s3 + $0x8] sm:$0xff] }
   0x3   :  { %264 = vmatpush3.bf16.msra.mxu0 %v87_v2  ;;  %v167_v5 = vsel %vm85_vm0, %v144_v4, 0  ;;  %v292_v6 = vld [vmem:[%s382_s4] sm:$0xff]   ;;  %286 = vset.pattern.permute.xlu0 %v297_v7  ;;  %v146_v12 = vld [vmem:[%s384_s5 + $0x8] sm:$0xff] }
   0x4   :  { %265 = vmatprep.subr.bf16.mxu0 %v295_v0  ;;  %278 = vmatpush3.bf16.msra.mxu1 %v167_v5  ;;  %v37_v9 = vld [vmem:[%s383_s3] sm:$0xff]  ;;  %v291_v13 = vld [vmem:[%s380_s0 + $0x8] sm:$0xff]  }
   0x5   :  { %287 = vset.pattern.permute.xlu1 %v297_v7  ;;  %v145_v10 = vld [vmem:[%s384_s5] sm:$0xff]  ;;  %41 = vperm.xlu0 %286, %v37_v9  }
   0x6   :  { %149 = vperm.xlu1 %287, %v145_v10   ;;  %v293_v14 = vld [vmem:[%s380_s0] sm:$0xff]  }
   0x7   :  { %266 = vmatpush3.bf16.msra.mxu0 %v289_v3  ;;  %280 = vmatmul.mubr.msk.bf16.vlgmr.msra.gmra.mxu1 %vm162_vm2, %v292_v6  ;;  %v294_v15 = vld [vmem:[%s385_s2] sm:$0xff]  }
   0x8   :  { %267 = vmatprep.subr.bf16.mxu0 %v295_v0 }
   0x9   :  { %46 = vperm.xlu0 %286, %v38_v11  }
   0xa   :  { %154 = vperm.xlu1 %287, %v146_v12  }
   0xb   :  { %268 = vmatpush3.bf16.msra.mxu0 %v290_v8 }
   0xc   :  { %269 = vmatprep.subr.bf16.mxu0 %v295_v0 }
   0xf   :  { %270 = vmatpush3.bf16.msra.mxu0 %v291_v13 }
  0x10   :  { %271 = vmatprep.subr.bf16.mxu0 %v295_v0 }
  0x13   :  { %272 = vmatpush3.bf16.msra.mxu0 %v293_v14 }
  0x16   :  { %274 = vmatmul.mubr.msk.bf16.vlgmr.msra.gmra.mxu0 %vm81_vm3, %v294_v15 }
  0x80   :  { %v42_v25 = vpop.permute.xlu0 %41 }
  0x81   :  { %v150_v16 = vpop.permute.xlu1 %149 }
  0x84   :  { %v47_v29 = vpop.permute.xlu0 %46 }
  0x85   :  { %v155_v19 = vpop.permute.xlu1 %154 }
  0xc7   :  { %v203_v17 = vpop.f32.mrf.mxu1 }
  0xc8   :  { %v204_v20 = vadd.f32 %v203_v17, %v150_v16 }
  0xc9   :  { %v281_v18 = vpop.f32.mrf.mxu1 }
  0xcb   :  { %v206_v21 = vpop.f32.mrf.mxu1 }
  0xcc   :  { %v207_v22 = vadd.f32 %v206_v21, %v155_v19 }
  0xcd   :  { %v282_v23 = vpop.f32.mrf.mxu1 }
  0xce   :  { %v253_v24 = vpack.c.bf16 %v207_v22, %v204_v20 }
  0xd0   :  { %254 = vst [vmem:[%s386_s7] sm:$0xff] %v253_v24  }
  0xd6   :  { %v123_v26 = vpop.f32.mrf.mxu0 }
  0xd7   :  { %v124_v28 = vadd.f32 %v123_v26, %v42_v25 }
  0xd8   :  { %v275_v27 = vpop.f32.mrf.mxu0 }
  0xd9   :  { %v130_v33 = vmax.f32 %v124_v28, 0.0 }
  0xda   :  { %v126_v30 = vpop.f32.mrf.mxu0 }
  0xdb   :  { %v127_v31 = vadd.f32 %v126_v30, %v47_v29 }
  0xdc   :  { %v276_v32 = vpop.f32.mrf.mxu0 }
  0xdd   :  { %v131_v34 = vmax.f32 %v127_v31, 0.0 }
  0xdf   :  { %v248_v35 = vpack.c.bf16 %v131_v34, %v130_v33 }
  0xe1   :  { %249 = vst [vmem:[%s387_s6] sm:$0xff] %v248_v35  }

// kernel: _lambda_.19
= control target key start
LH: loop header
LB: loop body
LE: loop exit
PB: predicated region body
PF: predicated region fallthrough
CT: control target
= control target key end

     0   :  { %v402_v1 = vmov 0.0   ;;  %vm403_vm0 = vmmov 0   ;;  %v404_v3 = vmov 0   ;;  %vm206_vm1 = vcmask 523264   ;;  %s506_s1 = inlined_call_operand.vmem [shape: bf16[320,32], index: 1, kind: input, shape index: {}]   ;;  %s507_s0 = inlined_call_operand.vmem [shape: bf16[16,320], index: 0, kind: input, shape index: {}]   ;;  %s508_s2 = inlined_call_operand.vmem [shape: f32[16,1], index: 2, kind: input, shape index: {}]   ;;  %s509_s3 = inlined_call_operand.vmem [shape: bf16[16,32], index: 3, kind: output, shape index: {}]  }
   0x1   :  { %v378_v0 = vld [vmem:[%s506_s1 + $0x78] sm:$0xff]   ;;  %362 = vmatprep.subr.bf16.mxu1 %v402_v1  ;;  %370 = vmatprep.mubr.msk.bf16.mxu1 %vm403_vm0, %v402_v1  ;;  %v380_v4 = vld [vmem:[%s506_s1 + $0x70] sm:$0xff]   ;;  %v382_v6 = vld [vmem:[%s506_s1 + $0x68] sm:$0xff]   ;;  %vm300_vm2 = vcmask 257024  }
   0x2   :  { %v379_v2 = vld [vmem:[%s506_s1 + $0x38] sm:$0xff]   ;;  %377 = vset.pattern.permute.xlu0 %v404_v3  ;;  %335 = vmatprep.subr.bf16.mxu0 %v378_v0  ;;  %v381_v5 = vld [vmem:[%s506_s1 + $0x30] sm:$0xff]   ;;  %v383_v7 = vld [vmem:[%s506_s1 + $0x28] sm:$0xff]  }
   0x3   :  { %336 = vmatpush3.bf16.msra.mxu0 %v379_v2  ;;  %v384_v8 = vld [vmem:[%s506_s1 + $0x60] sm:$0xff]   ;;  %v388_v9 = vld [vmem:[%s506_s1 + $0x98] sm:$0xff]   ;;  %v391_v12 = vld [vmem:[%s506_s1 + $0x90] sm:$0xff]  }
   0x4   :  { %337 = vmatprep.subr.bf16.mxu0 %v380_v4  ;;  %v385_v10 = vld [vmem:[%s506_s1 + $0x20] sm:$0xff]   ;;  %v386_v11 = vld [vmem:[%s506_s1 + $0x58] sm:$0xff]   ;;  %363 = vmatpush3.bf16.msra.mxu1 %v388_v9  ;;  %v389_v14 = vld [vmem:[%s506_s1 + $0x50] sm:$0xff]  }
   0x5   :  { %364 = vmatprep.subr.bf16.mxu1 %v402_v1  ;;  %v387_v13 = vld [vmem:[%s506_s1 + $0x18] sm:$0xff]   ;;  %v394_v15 = vld [vmem:[%s506_s1 + $0x88] sm:$0xff]   ;;  %v390_v16 = vld [vmem:[%s506_s1 + $0x10] sm:$0xff]  }
   0x6   :  { %v392_v17 = vld [vmem:[%s506_s1 + $0x48] sm:$0xff]   ;;  %v397_v18 = vld [vmem:[%s506_s1 + $0x80] sm:$0xff]  }
   0x7   :  { %338 = vmatpush3.bf16.msra.mxu0 %v381_v5  ;;  %v400_v19 = vld [vmem:[%s507_s0 + $0x4] ss:$12 sps:$4 sm:$0xff]   ;;  %v393_v21 = vld [vmem:[%s506_s1 + $0x8] sm:$0xff]  }
   0x8   :  { %339 = vmatprep.subr.bf16.mxu0 %v382_v6  ;;  %365 = vmatpush3.bf16.msra.mxu1 %v391_v12  ;;  %v59_v20 = vld [vmem:[%s508_s2] sm:$0xff]  ;;  %v401_v22 = vld [vmem:[%s507_s0 + $0x8] ss:$12 sps:$4 sm:$0xff]  }
   0x9   :  { %366 = vmatprep.subr.bf16.mxu1 %v402_v1  ;;  %242 = vmatprep.mubr.bf16.mxu0 %v400_v19  ;;  %v395_v23 = vld [vmem:[%s506_s1 + $0x40] sm:$0xff]   ;;  %v60_v24 = vld [vmem:[%s508_s2 + $0x8] sm:$0xff] }
   0xa   :  { %63 = vperm.xlu0 %377, %v59_v20   ;;  %v396_v25 = vld [vmem:[%s506_s1] sm:$0xff]  }
   0xb   :  { %340 = vmatpush3.bf16.msra.mxu0 %v383_v7  ;;  %v398_v26 = vld [vmem:[%s507_s0] ss:$12 sps:$4 sm:$0xff]  }
   0xc   :  { %341 = vmatprep.subr.bf16.mxu0 %v384_v8  ;;  %367 = vmatpush3.bf16.msra.mxu1 %v394_v15 }
   0xd   :  { %368 = vmatprep.subr.bf16.mxu1 %v402_v1 }
   0xe   :  { %68 = vperm.xlu0 %377, %v60_v24  }
   0xf   :  { %342 = vmatpush3.bf16.msra.mxu0 %v385_v10 }
  0x10   :  { %343 = vmatprep.subr.bf16.mxu0 %v386_v11  ;;  %369 = vmatpush3.bf16.msra.mxu1 %v397_v18 }
  0x13   :  { %344 = vmatpush3.bf16.msra.mxu0 %v387_v13  ;;  %371 = vmatmul.mubr.msk.bf16.vlgmr.msra.gmra.mxu1 %vm206_vm1, %v401_v22 }
  0x14   :  { %345 = vmatprep.subr.bf16.mxu0 %v389_v14 }
  0x17   :  { %346 = vmatpush3.bf16.msra.mxu0 %v390_v16 }
  0x18   :  { %347 = vmatprep.subr.bf16.mxu0 %v392_v17 }
  0x1b   :  { %348 = vmatpush3.bf16.msra.mxu0 %v393_v21 }
  0x1c   :  { %349 = vmatprep.subr.bf16.mxu0 %v395_v23 }
  0x1f   :  { %350 = vmatpush3.bf16.msra.mxu0 %v396_v25 }
  0x22   :  { %243 = vmatmul.mubr.bf16.vlgmr.msra.gmra.mxu0 %v398_v26 }
  0x85   :  { %v64_v32 = vpop.permute.xlu0 %63 }
  0x89   :  { %v69_v40 = vpop.permute.xlu0 %68 }
  0xd3   :  { %v285_v27 = vpop.f32.mrf.mxu1 }
  0xd5   :  { %v372_v28 = vpop.f32.mrf.mxu1 }
  0xd7   :  { %v288_v29 = vpop.f32.mrf.mxu1 }
  0xd9   :  { %v373_v30 = vpop.f32.mrf.mxu1 }
  0xe2   :  { %v351_v31 = vpop.f32.mrf.mxu0 }
  0xe4   :  { %v352_v33 = vpop.f32.mrf.mxu0 }
  0xe5   :  { %v353_v34 = vadd.f32 %v352_v33, %v351_v31 }
  0xe6   :  { %v354_v35 = vpop.f32.mrf.mxu0 }
  0xe7   :  { %v245_v36 = vadd.f32 %v353_v34, %v64_v32 }
  0xe8   :  { %v355_v37 = vpop.f32.mrf.mxu0 }
  0xe9   :  { %v286_v38 = vadd.f32 %v285_v27, %v245_v36  ;;  %v356_v39 = vadd.f32 %v355_v37, %v354_v35 }
  0xeb   :  { %v333_v41 = vpack.c.bf16 %v286_v38, %v286_v38  ;;  %v248_v42 = vadd.f32 %v356_v39, %v69_v40 }
  0xed   :  { %301 = vst.msk [vmem:[%s509_s3] sm:$0xf] %vm300_vm2, %v333_v41  ;;  %v289_v43 = vadd.f32 %v288_v29, %v248_v42 }
  0xef   :  { %v334_v44 = vpack.c.bf16 %v289_v43, %v289_v43 }
  0xf1   :  { %302 = vst.msk [vmem:[%s509_s3 + $0x4] sm:$0xf] %vm300_vm2, %v334_v44 }

// kernel: _lambda_.23
= control target key start
LH: loop header
LB: loop body
LE: loop exit
PB: predicated region body
PF: predicated region fallthrough
CT: control target
= control target key end

     0   :  { %v731_v1 = vmov 0   ;;  %vm389_vm0 = vcmask 523264   ;;  %vm547_vm1 = vcmask 64512   ;;  %s920_s1 = inlined_call_operand.vmem [shape: bf16[576,8], index: 1, kind: input, shape index: {}]   ;;  %s921_s0 = inlined_call_operand.vmem [shape: bf16[32,576], index: 0, kind: input, shape index: {}]   ;;  %s922_s2 = inlined_call_operand.vmem [shape: f32[32,1], index: 2, kind: input, shape index: {}]   ;;  %s923_s3 = inlined_call_operand.vmem [shape: f32[32,8], index: 3, kind: output, shape index: {}]  }
   0x1   :  { %v681_v0 = vld [vmem:[%s920_s1 + $0x78] sm:$0xff]   ;;  %679 = vset.pattern.permute.xlu0 %v731_v1  ;;  %680 = vset.pattern.permute.xlu1 %v731_v1  ;;  %v685_v5 = vld [vmem:[%s920_s1 + $0x70] sm:$0xff]   ;;  %v689_v9 = vld [vmem:[%s920_s1 + $0x68] sm:$0xff]  }
   0x2   :  { %v682_v2 = vld [vmem:[%s920_s1 + $0xf8] sm:$0xff]   ;;  %604 = vmatprep.subr.bf16.mxu0 %v681_v0  ;;  %v686_v6 = vld [vmem:[%s920_s1 + $0xf0] sm:$0xff]   ;;  %v690_v10 = vld [vmem:[%s920_s1 + $0xe8] sm:$0xff]  }
   0x3   :  { %v683_v3 = vld [vmem:[%s920_s1 + $0x38] sm:$0xff]   ;;  %632 = vmatprep.subr.bf16.mxu1 %v682_v2  ;;  %v687_v7 = vld [vmem:[%s920_s1 + $0x30] sm:$0xff]   ;;  %v691_v11 = vld [vmem:[%s920_s1 + $0x28] sm:$0xff]  }
   0x4   :  { %v684_v4 = vld [vmem:[%s920_s1 + $0xb8] sm:$0xff]   ;;  %605 = vmatpush3.bf16.msra.mxu0 %v683_v3  ;;  %v688_v8 = vld [vmem:[%s920_s1 + $0xb0] sm:$0xff]   ;;  %v692_v12 = vld [vmem:[%s920_s1 + $0xa8] sm:$0xff]  }
   0x5   :  { %633 = vmatpush3.bf16.msra.mxu1 %v684_v4  ;;  %606 = vmatprep.subr.bf16.mxu0 %v685_v5  ;;  %v693_v13 = vld [vmem:[%s920_s1 + $0x60] sm:$0xff]   ;;  %v697_v17 = vld [vmem:[%s920_s1 + $0x58] sm:$0xff]   ;;  %v701_v21 = vld [vmem:[%s920_s1 + $0x50] sm:$0xff]  }
   0x6   :  { %634 = vmatprep.subr.bf16.mxu1 %v686_v6  ;;  %v694_v14 = vld [vmem:[%s920_s1 + $0xe0] sm:$0xff]   ;;  %v698_v18 = vld [vmem:[%s920_s1 + $0xd8] sm:$0xff]   ;;  %v702_v22 = vld [vmem:[%s920_s1 + $0xd0] sm:$0xff]  }
   0x7   :  { %v695_v15 = vld [vmem:[%s920_s1 + $0x20] sm:$0xff]   ;;  %v699_v19 = vld [vmem:[%s920_s1 + $0x18] sm:$0xff]   ;;  %v703_v23 = vld [vmem:[%s920_s1 + $0x10] sm:$0xff]  }
   0x8   :  { %607 = vmatpush3.bf16.msra.mxu0 %v687_v7  ;;  %v696_v16 = vld [vmem:[%s920_s1 + $0xa0] sm:$0xff]   ;;  %v700_v20 = vld [vmem:[%s920_s1 + $0x98] sm:$0xff]   ;;  %v704_v24 = vld [vmem:[%s920_s1 + $0x90] sm:$0xff]  }
   0x9   :  { %635 = vmatpush3.bf16.msra.mxu1 %v688_v8  ;;  %608 = vmatprep.subr.bf16.mxu0 %v689_v9  ;;  %v705_v25 = vld [vmem:[%s920_s1 + $0x48] sm:$0xff]   ;;  %v709_v29 = vld [vmem:[%s920_s1 + $0x40] sm:$0xff]   ;;  %v719_v37 = vld [vmem:[%s920_s1 + $0x118] sm:$0xff]  }
   0xa   :  { %636 = vmatprep.subr.bf16.mxu1 %v690_v10  ;;  %v706_v26 = vld [vmem:[%s920_s1 + $0xc8] sm:$0xff]   ;;  %v710_v30 = vld [vmem:[%s920_s1 + $0xc0] sm:$0xff]   ;;  %v720_v38 = vld [vmem:[%s920_s1 + $0x110] sm:$0xff]  }
   0xb   :  { %v707_v27 = vld [vmem:[%s920_s1 + $0x8] sm:$0xff]   ;;  %v711_v31 = vld [vmem:[%s920_s1] sm:$0xff]   ;;  %v101_v47 = vld [vmem:[%s922_s2 + $0x10] sm:$0xff] }
   0xc   :  { %609 = vmatpush3.bf16.msra.mxu0 %v691_v11  ;;  %v708_v28 = vld [vmem:[%s920_s1 + $0x88] sm:$0xff]   ;;  %v712_v32 = vld [vmem:[%s920_s1 + $0x80] sm:$0xff]   ;;  %115 = vperm.xlu1 %680, %v101_v47   ;;  %v102_v49 = vld [vmem:[%s922_s2 + $0x18] sm:$0xff] }
   0xd   :  { %637 = vmatpush3.bf16.msra.mxu1 %v692_v12  ;;  %610 = vmatprep.subr.bf16.mxu0 %v693_v13  ;;  %v713_v33 = vld [vmem:[%s921_s0] ss:$20 sps:$4 sm:$0xff]   ;;  %v715_v34 = vld [vmem:[%s921_s0 + $0x4] ss:$20 sps:$4 sm:$0xff]   ;;  %v716_v35 = vld [vmem:[%s921_s0 + $0x8] ss:$20 sps:$4 sm:$0xff]  }
   0xe   :  { %638 = vmatprep.subr.bf16.mxu1 %v694_v14  ;;  %v718_v36 = vld [vmem:[%s921_s0 + $0xc] ss:$20 sps:$4 sm:$0xff]   ;;  %428 = vmatprep.mubr.bf16.mxu0 %v715_v34  ;;  %v723_v40 = vld [vmem:[%s921_s0 + $0x34] ss:$20 sps:$4 sm:$0xff]   ;;  %v726_v43 = vld [vmem:[%s921_s0 + $0x30] ss:$20 sps:$4 sm:$0xff]  }
   0xf   :  { %477 = vmatprep.mubr.bf16.mxu1 %v718_v36  ;;  %v721_v39 = vld [vmem:[%s921_s0 + $0x2c] ss:$20 sps:$4 sm:$0xff]   ;;  %v725_v41 = vld [vmem:[%s921_s0 + $0x28] ss:$20 sps:$4 sm:$0xff]   ;;  %v729_v44 = vld [vmem:[%s921_s0 + $0x10] ss:$20 sps:$4 sm:$0xff]  }
  0x10   :  { %611 = vmatpush3.bf16.msra.mxu0 %v695_v15  ;;  %v727_v42 = vld [vmem:[%s920_s1 + $0x108] sm:$0xff]   ;;  %v728_v45 = vld [vmem:[%s920_s1 + $0x100] sm:$0xff]   ;;  %120 = vperm.xlu1 %680, %v102_v49  }
  0x11   :  { %639 = vmatpush3.bf16.msra.mxu1 %v696_v16  ;;  %612 = vmatprep.subr.bf16.mxu0 %v697_v17  ;;  %v99_v46 = vld [vmem:[%s922_s2] sm:$0xff]  ;;  %v100_v48 = vld [vmem:[%s922_s2 + $0x8] sm:$0xff] }
  0x12   :  { %640 = vmatprep.subr.bf16.mxu1 %v698_v18  ;;  %105 = vperm.xlu0 %679, %v99_v46   ;;  %v730_v50 = vld [vmem:[%s921_s0 + $0x38] ss:$20 sps:$4 sm:$0xff]  }
  0x14   :  { %613 = vmatpush3.bf16.msra.mxu0 %v699_v19 }
  0x15   :  { %641 = vmatpush3.bf16.msra.mxu1 %v700_v20  ;;  %614 = vmatprep.subr.bf16.mxu0 %v701_v21 }
  0x16   :  { %642 = vmatprep.subr.bf16.mxu1 %v702_v22  ;;  %110 = vperm.xlu0 %679, %v100_v48  }
  0x18   :  { %615 = vmatpush3.bf16.msra.mxu0 %v703_v23 }
  0x19   :  { %643 = vmatpush3.bf16.msra.mxu1 %v704_v24  ;;  %616 = vmatprep.subr.bf16.mxu0 %v705_v25 }
  0x1a   :  { %644 = vmatprep.subr.bf16.mxu1 %v706_v26 }
  0x1c   :  { %617 = vmatpush3.bf16.msra.mxu0 %v707_v27 }
  0x1d   :  { %645 = vmatpush3.bf16.msra.mxu1 %v708_v28  ;;  %618 = vmatprep.subr.bf16.mxu0 %v709_v29 }
  0x1e   :  { %646 = vmatprep.subr.bf16.mxu1 %v710_v30 }
  0x20   :  { %619 = vmatpush3.bf16.msra.mxu0 %v711_v31 }
  0x21   :  { %647 = vmatpush3.bf16.msra.mxu1 %v712_v32  ;;  %666 = vmatprep.subr.bf16.mxu0 %v719_v37 }
  0x23   :  { %429 = vmatmul.mubr.bf16.vlgmr.msra.gmra.mxu0 %v713_v33 }
  0x24   :  { %478 = vmatmul.mubr.bf16.vlgmr.msra.gmra.mxu1 %v716_v35  ;;  %667 = vmatpush3.bf16.msra.mxu0 %v719_v37 }
  0x25   :  { %668 = vmatprep.subr.bf16.mxu0 %v720_v38  ;;  %436 = vmatprep.mubr.bf16.mxu0 %v721_v39 }
  0x26   :  { %485 = vmatprep.mubr.bf16.mxu1 %v723_v40 }
  0x28   :  { %669 = vmatpush3.bf16.msra.mxu0 %v720_v38 }
  0x29   :  { %670 = vmatprep.subr.bf16.mxu0 %v727_v42 }
  0x2b   :  { %437 = vmatmul.mubr.bf16.gmra.mxu0 %v725_v41 }
  0x2c   :  { %486 = vmatmul.mubr.bf16.gmra.mxu1 %v726_v43  ;;  %674 = vmatprep.mubr.msk.bf16.mxu0 %vm389_vm0, %v729_v44 }
  0x2d   :  { %671 = vmatpush3.bf16.msra.mxu0 %v727_v42 }
  0x2e   :  { %672 = vmatprep.subr.bf16.mxu0 %v728_v45 }
  0x31   :  { %673 = vmatpush3.bf16.msra.mxu0 %v728_v45 }
  0x34   :  { %675 = vmatmul.mubr.msk.bf16.vlgmr.msra.gmra.mxu0 %vm389_vm0, %v730_v50 }
  0x87   :  { %v116_v0 = vpop.permute.xlu1 %115 }
  0x8b   :  { %v121_v15 = vpop.permute.xlu1 %120 }
  0x8d   :  { %v106_v60 = vpop.permute.xlu0 %105 }
  0x91   :  { %v111_v11 = vpop.permute.xlu0 %110 }
  0xe3   :  { %v620_v51 = vpop.f32.mrf.mxu0 }
  0xe4   :  { %v648_v52 = vpop.f32.mrf.mxu1 }
  0xe5   :  { %v621_v53 = vpop.f32.mrf.mxu0 }
  0xe6   :  { %v649_v54 = vpop.f32.mrf.mxu1  ;;  %v622_v62 = vadd.f32 %v621_v53, %v620_v51 }
  0xe7   :  { %v623_v55 = vpop.f32.mrf.mxu0  ;;  %v650_v7 = vadd.f32 %v649_v54, %v648_v52 }
  0xe8   :  { %v651_v56 = vpop.f32.mrf.mxu1  ;;  %v431_v8 = vadd.f32 %v622_v62, %v106_v60 }
  0xe9   :  { %v624_v57 = vpop.f32.mrf.mxu0 }
  0xea   :  { %v652_v58 = vpop.f32.mrf.mxu1  ;;  %v625_v9 = vadd.f32 %v624_v57, %v623_v55  ;;  %v480_v21 = vadd.f32 %v650_v7, %v431_v8 }
  0xeb   :  { %v626_v59 = vpop.f32.mrf.mxu0  ;;  %v653_v24 = vadd.f32 %v652_v58, %v651_v56 }
  0xec   :  { %v654_v61 = vpop.f32.mrf.mxu1  ;;  %v434_v19 = vadd.f32 %v625_v9, %v111_v11 }
  0xed   :  { %v627_v63 = vpop.f32.mrf.mxu0 }
  0xee   :  { %v628_v1 = vadd.f32 %v627_v63, %v626_v59  ;;  %v655_v2 = vpop.f32.mrf.mxu1  ;;  %v483_v30 = vadd.f32 %v653_v24, %v434_v19 }
  0xef   :  { %v656_v3 = vadd.f32 %v655_v2, %v654_v61  ;;  %v629_v4 = vpop.f32.mrf.mxu0 }
  0xf0   :  { %v439_v5 = vadd.f32 %v628_v1, %v116_v0  ;;  %v657_v6 = vpop.f32.mrf.mxu1 }
  0xf1   :  { %v630_v10 = vpop.f32.mrf.mxu0 }
  0xf2   :  { %v631_v12 = vadd.f32 %v630_v10, %v629_v4  ;;  %v658_v13 = vpop.f32.mrf.mxu1  ;;  %v488_v14 = vadd.f32 %v656_v3, %v439_v5 }
  0xf3   :  { %v659_v16 = vadd.f32 %v658_v13, %v657_v6 }
  0xf4   :  { %v442_v17 = vadd.f32 %v631_v12, %v121_v15  ;;  %v676_v18 = vpop.f32.mrf.mxu0 }
  0xf5   :  { %v537_v20 = vadd.f32 %v676_v18, %v488_v14 }
  0xf6   :  { %v528_v22 = vpop.f32.mrf.mxu0  ;;  %v491_v23 = vadd.f32 %v659_v16, %v442_v17 }
  0xf7   :  { %v545_v25 = vmax.f32 %v537_v20, 0.0  ;;  %v529_v26 = vadd.f32 %v528_v22, %v480_v21 }
  0xf8   :  { %v677_v27 = vpop.f32.mrf.mxu0 }
  0xf9   :  { %550 = vst.msk [vmem:[%s923_s3 + $0x10] sm:$0xff] %vm547_vm1, %v545_v25  ;;  %v543_v28 = vmax.f32 %v529_v26, 0.0  ;;  %v540_v29 = vadd.f32 %v677_v27, %v491_v23 }
  0xfa   :  { %v531_v31 = vpop.f32.mrf.mxu0 }
  0xfb   :  { %548 = vst.msk [vmem:[%s923_s3] sm:$0xff] %vm547_vm1, %v543_v28  ;;  %v546_v32 = vmax.f32 %v540_v29, 0.0  ;;  %v532_v33 = vadd.f32 %v531_v31, %v483_v30 }
  0xfd   :  { %551 = vst.msk [vmem:[%s923_s3 + $0x18] sm:$0xff] %vm547_vm1, %v546_v32  ;;  %v544_v34 = vmax.f32 %v532_v33, 0.0 }
  0xff   :  { %549 = vst.msk [vmem:[%s923_s3 + $0x8] sm:$0xff] %vm547_vm1, %v544_v34 }

</bundles_post_ra>
